<compile_context>
chip_gen: v7x
topology: tpu7x:2x2x1
jax: 0.10.0
libtpu: 0.0.40
codegen_flags: <defaults>
</compile_context>

<pallas_src>
import math
from functools import partial

import jax
import jax.numpy as jnp
from jax import lax
from jax.experimental import pallas as pl
from jax.experimental.pallas import tpu as pltpu


# ----------------------------------------------------------------------------- chip config
_CFG = None


def _chip_config():
    """Generation-aware tiling / VMEM config."""
    vmem_phys = None
    try:
        vmem_phys = getattr(pltpu.get_tpu_info(), "vmem_capacity_bytes", None)
    except Exception:
        vmem_phys = None
    if vmem_phys is None:
        # Unknown generation: conservative settings that are safe everywhere.
        return {"vmem_limit": 32 << 20, "multi_core": True, "max_tile": 256}
    if vmem_phys <= (80 << 20):
        # v7x: 64 MiB VMEM per TensorCore, 2 TensorCores per chip.
        return {"vmem_limit": 44 << 20, "multi_core": True, "max_tile": 256}
    # v5e / v6e: 128 MiB VMEM, single TensorCore -> bigger tiles, no forced grid split.
    return {"vmem_limit": 80 << 20, "multi_core": False, "max_tile": 512}


def _cfg():
    global _CFG
    if _CFG is None:
        _CFG = _chip_config()
    return _CFG


def _params():
    return pltpu.CompilerParams(dimension_semantics=("parallel",),
                                vmem_limit_bytes=_cfg()["vmem_limit"])


# ----------------------------------------------------------------------------- helpers
def _round_up(x, m):
    return ((x + m - 1) // m) * m


def _pick_row_tile(M, max_tile, multi_core):
    """Multiple-of-8 row tile. Prefers an exact divisor of M (no padding); otherwise a
    near-divisor so padding waste stays < ~1 tile-row-of-8 per grid step. On multi-core
    chips (v7x) keeps >=2 grid steps whenever there is enough work."""
    if M <= 8:
        return 8
    if M % 8 == 0:
        lo = 2 if (multi_core and M >= 16) else 1
        d = min(max_tile, M // lo)
        d -= d % 8
        while d >= 8:
            if M % d == 0:
                return d
            d -= 8
    n = pl.cdiv(M, max_tile)
    if multi_core and M >= 16:
        n = max(n, 2)
    return _round_up(pl.cdiv(M, n), 8)


def _prep_rows(x, tm):
    """Pad rows of a 2-D slab to a multiple of tm (no-op when already aligned)."""
    M = x.shape[0]
    Mp = _round_up(M, tm)
    if Mp != M:
        x = jnp.pad(x, ((0, Mp - M), (0, 0)))
    return x, M, Mp


def _ffn_chunk(F):
    """FFN-dim chunk width: <=512 lanes, multiple of 128, dividing F."""
    if F <= 512:
        return F
    for fc in (512, 384, 256, 128):
        if F % fc == 0:
            return fc
    return F


# ----------------------------------------------------------------------------- linear kernel
def _linear_kernel(x_ref, w_ref, b_ref, o_ref, *, activation):
    x = x_ref[...].astype(jnp.bfloat16)
    w = w_ref[...].astype(jnp.bfloat16)
    acc = jnp.dot(x, w, preferred_element_type=jnp.float32) + b_ref[...]
    if activation == "relu":
        acc = jnp.maximum(acc, 0.0)
    elif activation == "tanh":
        acc = jnp.tanh(acc)
    o_ref[...] = acc.astype(o_ref.dtype)


def linear_pallas(x, w, b, activation=None, tm=None, min_out_lanes=None,
                  out_dtype=jnp.float32):
    """x:(M,K), w:(K,N) bf16/f32, b:(N,) -> (M,N) out_dtype (+ optional relu/tanh)."""
    cfg = _cfg()
    K = x.shape[1]
    N = w.shape[1]
    Np = N
    if min_out_lanes is not None and N < min_out_lanes:      # lane-dense output stores
        Np = min_out_lanes
        w = jnp.pad(w, ((0, 0), (0, Np - N)))
        b = jnp.pad(b, (0, Np - N))
    if tm is None:
        tm = _pick_row_tile(x.shape[0], cfg["max_tile"], cfg["multi_core"])
    xp, M, Mp = _prep_rows(x, tm)
    out = pl.pallas_call(
        partial(_linear_kernel, activation=activation),
        out_shape=jax.ShapeDtypeStruct((Mp, Np), out_dtype),
        grid=(Mp // tm,),
        in_specs=[
            pl.BlockSpec((tm, K), lambda i: (i, 0)),
            pl.BlockSpec((K, Np), lambda i: (0, 0)),
            pl.BlockSpec((1, Np), lambda i: (0, 0)),
        ],
        out_specs=pl.BlockSpec((tm, Np), lambda i: (i, 0)),
        compiler_params=_params(),
        cost_estimate=pl.CostEstimate(
            flops=int(2 * Mp * K * Np),
            transcendentals=int(Mp * Np) if activation == "tanh" else 0,
            bytes_accessed=int(4 * Mp * K + 2 * Mp * Np + 2 * K * Np)),
    )(xp, w, b.reshape(1, Np).astype(jnp.float32))
    if Mp != M or Np != N:
        out = out[:M, :N]
    return out


# ----------------------------------------------------------------------------- linear + residual + LayerNorm
def _linear_res_ln_kernel(x_ref, w_ref, b_ref, res_ref, g_ref, bb_ref, o_ref):
    y = jnp.dot(x_ref[...].astype(jnp.bfloat16), w_ref[...].astype(jnp.bfloat16),
                preferred_element_type=jnp.float32)
    y = y + b_ref[...] + res_ref[...]
    mu = jnp.mean(y, axis=-1, keepdims=True)
    var = jnp.mean(jnp.square(y - mu), axis=-1, keepdims=True)
    o_ref[...] = ((y - mu) * lax.rsqrt(var + 1e-5) * g_ref[...] + bb_ref[...]
                  ).astype(o_ref.dtype)


def linear_res_ln_pallas(x, w, b, res, g, beta, tm=None):
    """LN(res + x @ w + b); bf16 matmul, f32 residual + LayerNorm."""
    cfg = _cfg()
    K = x.shape[1]
    H = w.shape[1]
    if tm is None:
        tm = _pick_row_tile(x.shape[0], cfg["max_tile"], cfg["multi_core"])
    xp, M, Mp = _prep_rows(x, tm)
    resp = res if res.shape[0] == Mp else jnp.pad(res, ((0, Mp - res.shape[0]), (0, 0)))
    out = pl.pallas_call(
        _linear_res_ln_kernel,
        out_shape=jax.ShapeDtypeStruct((Mp, H), jnp.float32),
        grid=(Mp // tm,),
        in_specs=[
            pl.BlockSpec((tm, K), lambda i: (i, 0)),
            pl.BlockSpec((K, H), lambda i: (0, 0)),
            pl.BlockSpec((1, H), lambda i: (0, 0)),
            pl.BlockSpec((tm, H), lambda i: (i, 0)),
            pl.BlockSpec((1, H), lambda i: (0, 0)),
            pl.BlockSpec((1, H), lambda i: (0, 0)),
        ],
        out_specs=pl.BlockSpec((tm, H), lambda i: (i, 0)),
        compiler_params=_params(),
        cost_estimate=pl.CostEstimate(
            flops=int(2 * Mp * K * H), transcendentals=0,
            bytes_accessed=int(2 * Mp * K + 8 * Mp * H + 2 * K * H)),
    )(xp, w, b.reshape(1, H), resp, g.reshape(1, H), beta.reshape(1, H))
    return out if Mp == M else out[:M]


# ----------------------------------------------------------------------------- fused FFN + residual + LayerNorm
def _ffn_ln_kernel(x_ref, w1_ref, b1_ref, w2_ref, b2_ref, g_ref, bb_ref, o_ref, *, fc):
    x = x_ref[...]                                          # f32 residual
    xb = x.astype(jnp.bfloat16)
    F = w1_ref.shape[1]
    y = x + b2_ref[...]
    # F-chunked: the (tm, fc) hidden lives only in registers/compiler-managed VMEM,
    # never an explicit f32 round-trip (static slices -> zero-cost ref views).
    for off in range(0, F, fc):
        w1c = w1_ref[:, off:off + fc].astype(jnp.bfloat16)
        b1c = b1_ref[:, off:off + fc]
        w2c = w2_ref[off:off + fc, :].astype(jnp.bfloat16)
        h = jnp.maximum(jnp.dot(xb, w1c, preferred_element_type=jnp.float32) + b1c, 0.0)
        y = y + jnp.dot(h.astype(jnp.bfloat16), w2c, preferred_element_type=jnp.float32)
    mu = jnp.mean(y, axis=-1, keepdims=True)
    var = jnp.mean(jnp.square(y - mu), axis=-1, keepdims=True)
    o_ref[...] = ((y - mu) * lax.rsqrt(var + 1e-5) * g_ref[...] + bb_ref[...]
                  ).astype(o_ref.dtype)


def ffn_ln_pallas(x, w1, b1, w2, b2, g, beta, tm=None):
    """LN(x + relu(x@w1+b1)@w2 + b2) in a single kernel."""
    cfg = _cfg()
    H = x.shape[1]
    F = w1.shape[1]
    fc = _ffn_chunk(F)
    if tm is None:
        tm = _pick_row_tile(x.shape[0], cfg["max_tile"], cfg["multi_core"])
    xp, M, Mp = _prep_rows(x, tm)
    out = pl.pallas_call(
        partial(_ffn_ln_kernel, fc=fc),
        out_shape=jax.ShapeDtypeStruct((Mp, H), jnp.float32),
        grid=(Mp // tm,),
        in_specs=[
            pl.BlockSpec((tm, H), lambda i: (i, 0)),
            pl.BlockSpec((H, F), lambda i: (0, 0)),
            pl.BlockSpec((1, F), lambda i: (0, 0)),
            pl.BlockSpec((F, H), lambda i: (0, 0)),
            pl.BlockSpec((1, H), lambda i: (0, 0)),
            pl.BlockSpec((1, H), lambda i: (0, 0)),
            pl.BlockSpec((1, H), lambda i: (0, 0)),
        ],
        out_specs=pl.BlockSpec((tm, H), lambda i: (i, 0)),
        compiler_params=_params(),
        cost_estimate=pl.CostEstimate(
            flops=int(4 * Mp * H * F), transcendentals=0,
            bytes_accessed=int(8 * Mp * H + 4 * H * F)),
    )(xp, w1, b1.reshape(1, F), w2, b2.reshape(1, H), g.reshape(1, H), beta.reshape(1, H))
    return out if Mp == M else out[:M]


# ----------------------------------------------------------------------------- AvgPoolSequence kernel
def _avgpool_kernel(m_ref, x_ref, o_ref):
    m = m_ref[...]                                   # (tr, T)     1.0 = keep
    x = x_ref[...]                                   # (tr, T, H)
    cnt = jnp.sum(m, axis=-1, keepdims=True)         # (tr, 1)
    s = jnp.sum(x * m[:, :, None], axis=1)           # (tr, H)
    # NOTE: fully-masked rows give cnt=0 -> ~0 output (PyTorch would give nan/inf);
    # such rows are always masked downstream in this model.
    o_ref[...] = s * pl.reciprocal(cnt + 1e-12, approx=True)


def masked_avgpool_pallas(feats, mask):
    """feats: (R, T, H) f32, mask: (R, T) bool -> (R, H) masked mean over T."""
    R, T, H = feats.shape
    budget = 8 << 20
    cap = max(8, ((budget // max(T * H * 4, 1)) // 8) * 8)
    tr = max(8, min(cap, 64, _round_up(R, 8)))
    Rp = _round_up(R, tr)
    fp = feats if Rp == R else jnp.pad(feats, ((0, Rp - R), (0, 0), (0, 0)))
    m = mask.astype(jnp.float32)
    mp = m if Rp == R else jnp.pad(m, ((0, Rp - R), (0, 0)))
    out = pl.pallas_call(
        _avgpool_kernel,
        out_shape=jax.ShapeDtypeStruct((Rp, H), jnp.float32),
        grid=(Rp // tr,),
        in_specs=[
            pl.BlockSpec((tr, T), lambda i: (i, 0)),
            pl.BlockSpec((tr, T, H), lambda i: (i, 0, 0)),
        ],
        out_specs=pl.BlockSpec((tr, H), lambda i: (i, 0)),
        compiler_params=_params(),
    )(mp, fp)
    return out if Rp == R else out[:R]


# ----------------------------------------------------------------------------- MHA kernel (key padding mask)
def _mha_kernel(m_ref, q_ref, k_ref, v_ref, o_ref, *, scale):
    Bt, nh, Ns, dh = q_ref.shape
    # heads folded into the batch dim -> one batched MXU push per matmul,
    # no per-head lane-unaligned slices, no concat.
    q = q_ref[...].reshape(Bt * nh, Ns, dh)
    k = k_ref[...].reshape(Bt * nh, Ns, dh)
    v = v_ref[...].reshape(Bt * nh, Ns, dh)
    s = jnp.einsum("bqd,bkd->bqk", q, k, preferred_element_type=jnp.float32) * scale
    s = s.reshape(Bt, nh, Ns, Ns) + (1.0 - m_ref[...]) * (-1e9)       # mask padded keys
    s = s - jnp.max(s, axis=-1, keepdims=True)
    p = jnp.exp(s)
    p = p * pl.reciprocal(jnp.sum(p, axis=-1, keepdims=True), approx=True)
    p = p.reshape(Bt * nh, Ns, Ns).astype(jnp.bfloat16)
    o = jnp.einsum("bqk,bkd->bqd", p, v, preferred_element_type=jnp.float32)
    o_ref[...] = o.reshape(Bt, nh, Ns, dh).astype(o_ref.dtype)


def _mha_batch_tile(B, Ns, H, n_heads, multi_core):
    """Batch tile sized from a VMEM budget; divides B; >=2 grid steps only on v7x."""
    per_b = 4 * Ns * H * 2 + n_heads * Ns * Ns * 4          # q,k,v,o bf16 + scores f32
    cap = max(1, min(64, (6 << 20) // max(per_b, 1)))
    bt = min(B, cap)
    while bt > 1 and B % bt:
        bt -= 1
    if multi_core and bt == B and B >= 2:
        bt = max(1, B // 2)
        while bt > 1 and B % bt:
            bt -= 1
    return bt


def mha_pallas(qkv, key_mask4, n_heads):
    """qkv: (B, Ns, 3H) bf16 packed [q|k|v]; key_mask4: (B,1,1,Ns) f32 (1=valid key)
    -> (B, Ns, H) bf16. Head split/merge is done as cheap XLA layout plumbing."""
    cfg = _cfg()
    B, Ns, H3 = qkv.shape
    H = H3 // 3
    dh = H // n_heads
    scale = float(dh) ** -0.5
    qkv5 = qkv.reshape(B, Ns, 3, n_heads, dh)
    q = qkv5[:, :, 0].transpose(0, 2, 1, 3)                 # (B, nh, Ns, dh) bf16
    k = qkv5[:, :, 1].transpose(0, 2, 1, 3)
    v = qkv5[:, :, 2].transpose(0, 2, 1, 3)
    Bt = _mha_batch_tile(B, Ns, H, n_heads, cfg["multi_core"])
    out = pl.pallas_call(
        partial(_mha_kernel, scale=scale),
        out_shape=jax.ShapeDtypeStruct((B, n_heads, Ns, dh), jnp.bfloat16),
        grid=(B // Bt,),
        in_specs=[
            pl.BlockSpec((Bt, 1, 1, Ns), lambda b: (b, 0, 0, 0)),
            pl.BlockSpec((Bt, n_heads, Ns, dh), lambda b: (b, 0, 0, 0)),
            pl.BlockSpec((Bt, n_heads, Ns, dh), lambda b: (b, 0, 0, 0)),
            pl.BlockSpec((Bt, n_heads, Ns, dh), lambda b: (b, 0, 0, 0)),
        ],
        out_specs=pl.BlockSpec((Bt, n_heads, Ns, dh), lambda b: (b, 0, 0, 0)),
        compiler_params=_params(),
        cost_estimate=pl.CostEstimate(
            flops=int(4 * B * n_heads * Ns * Ns * dh),
            transcendentals=int(B * n_heads * Ns * Ns),
            bytes_accessed=int(2 * B * Ns * (H3 + H) + 4 * B * Ns)),
    )(key_mask4, q, k, v)
    return out.transpose(0, 2, 1, 3).reshape(B, Ns, H)       # bf16 (B, Ns, H)


# ----------------------------------------------------------------------------- model pieces
MAX_LEN = 77


def preprocess(x, max_len=MAX_LEN):
    """RecipeEncoder.preprocss: pad-with-zeros / truncate last axis to 77."""
    if x.ndim == 2:
        B, L = x.shape
        if L < max_len:
            return jnp.concatenate(
                [x, jnp.zeros((B, max_len - L), dtype=jnp.int32)], axis=1)
        return x[:, :max_len]
    B, N, L = x.shape
    if L < max_len:
        return jnp.concatenate(
            [x, jnp.zeros((B, N, max_len - L), dtype=jnp.int32)], axis=2)
    return x[:, :, :max_len]


def sinusoidal_pe(T, H):
    # TODO(synk): SingleTransformerEncoder's positional-encoding internals are not in the
    # spec; sinusoidal PE assumed. Requires even H.
    pos = jnp.arange(T, dtype=jnp.float32)[:, None]
    div = jnp.exp(jnp.arange(0, H, 2, dtype=jnp.float32) * (-math.log(10000.0) / H))
    pe = jnp.zeros((T, H), jnp.float32)
    pe = pe.at[:, 0::2].set(jnp.sin(pos * div))
    pe = pe.at[:, 1::2].set(jnp.cos(pos * div))
    return pe


def clip_text_encoder(p, tokens):
    # TODO(synk): ClipLoraTextEncoder internals (pretrained CLIP text tower + LoRA adapters)
    # are not available; this is a synthetic embedding + residual-MLP encoder with the same
    # contract: int tokens (R, 77) -> features (R, 77, H).
    R, T = tokens.shape
    H = p["embed"].shape[1]
    x = (p["embed"][tokens] + p["pos"][None, :T]).reshape(R * T, H)   # gather + add (glue)
    # Single fused kernel: LN(x + MLP(x)); the MLP hidden never leaves the core.
    out = ffn_ln_pallas(x, p["w1"], p["b1"], p["w2"], p["b2"], p["ln_g"], p["ln_b"])
    return out.reshape(R, T, H)


def transformer_encoder_layer(lp, x2, key_mask4, B, Ns, H, n_heads, tm):
    """Post-norm nn.TransformerEncoderLayer (dropout = identity at inference).
    x2 is the canonical (B*Ns, H) f32 row slab; tm divides B*Ns so NO pad/slice happens
    anywhere inside the layer chain."""
    M = B * Ns
    # qkv projection -> bf16 slab (all consumers cast to bf16 anyway)
    qkv = linear_pallas(x2, lp["w_in"], lp["b_in"], tm=tm, out_dtype=jnp.bfloat16)
    attn = mha_pallas(qkv.reshape(B, Ns, 3 * H), key_mask4, n_heads)   # (B,Ns,H) bf16
    # out-projection + residual + LayerNorm fused
    y = linear_res_ln_pallas(attn.reshape(M, H), lp["w_out"], lp["b_out"], x2,
                             lp["ln1_g"], lp["ln1_b"], tm=tm)
    # FFN pair + residual + LayerNorm fused (F-chunked hidden, stays on-core)
    return ffn_ln_pallas(y, lp["w_ff1"], lp["b_ff1"], lp["w_ff2"], lp["b_ff2"],
                         lp["ln2_g"], lp["ln2_b"], tm=tm)


def single_transformer_encoder(p, feats, ignore_mask, n_heads):
    """SingleTransformerEncoder: PE + transformer layers + masked average pool."""
    cfg = _cfg()
    B, N, H = feats.shape
    x = feats + sinusoidal_pe(N, H)[None]
    # Pad the chunk axis ONCE (sublane-aligned key axis); padded chunks are ignored keys
    # and excluded from the final pool -> one canonical layout for the whole stack.
    Ns = _round_up(N, 8)
    if Ns != N:
        x = jnp.pad(x, ((0, 0), (0, Ns - N), (0, 0)))
        ignore_mask = jnp.pad(ignore_mask, ((0, 0), (0, Ns - N)), constant_values=True)
    key_mask4 = jnp.logical_not(ignore_mask).astype(jnp.float32).reshape(B, 1, 1, Ns)
    M = B * Ns
    tm = _pick_row_tile(M, cfg["max_tile"], cfg["multi_core"])     # exact divisor of M
    x2 = x.reshape(M, H)
    for lp in p["layers"]:
        x2 = transformer_encoder_layer(lp, x2, key_mask4, B, Ns, H, n_heads, tm)
    return masked_avgpool_pallas(x2.reshape(B, Ns, H), jnp.logical_not(ignore_mask))


def recipe_encoder_forward(params, title, ingrs, instrs, n_heads):
    feats = []

    # ---- title: 2-D path ----
    t = preprocess(title)                                             # (B, 77)
    enc = clip_text_encoder(params["tfs"]["title"], t)                # (B, 77, H)
    feats.append(masked_avgpool_pallas(enc, t != 0))                  # (B, H)

    # ---- ingredients / instructions: 3-D path ----
    for name, inp in (("ingredients", ingrs), ("instructions", instrs)):
        x = preprocess(inp)                                           # (B, N, 77)
        B, N, T = x.shape
        xr = x.reshape(B * N, T)
        ign = (xr == 0)
        ign = ign.at[:, 0].set(False)                                 # first token never ignored
        enc = clip_text_encoder(params["tfs"][name], xr)              # (B*N, 77, H)
        pooled = masked_avgpool_pallas(enc, jnp.logical_not(ign))
        pooled = pooled.reshape(B, N, -1)
        mask_list = jnp.sum(x > 0, axis=-1) > 0                       # (B, N) True = valid chunk
        feats.append(single_transformer_encoder(
            params["merger"][name], pooled, jnp.logical_not(mask_list), n_heads))

    cat = jnp.concatenate(feats, axis=1)                              # (B, 3H)
    # final Linear + Tanh; output padded to 128 lanes inside the kernel (lane-dense stores)
    return linear_pallas(cat, params["merger_recipe"]["w"],
                         params["merger_recipe"]["b"], activation="tanh",
                         min_out_lanes=128)


# ----------------------------------------------------------------------------- params
def init_params(key, vocab, H, n_layers, output_size, ffn_dim=2048, max_len=MAX_LEN):
    keys = iter(jax.random.split(key, 256))

    def nrm(shape, scale=0.02, dtype=jnp.float32):
        return (scale * jax.random.normal(next(keys), shape)).astype(dtype)

    bf = jnp.bfloat16  # matmul weights stored bf16 (halves weight DMA, MXU bf16 path)
    params = {"tfs": {}, "merger": {}}
    for name in ["title", "ingredients", "instructions"]:
        params["tfs"][name] = {
            "embed": nrm((vocab, H)),
            "pos": nrm((max_len, H)),
            "w1": nrm((H, 4 * H), dtype=bf), "b1": jnp.zeros((4 * H,), jnp.float32),
            "w2": nrm((4 * H, H), dtype=bf), "b2": jnp.zeros((H,), jnp.float32),
            "ln_g": jnp.ones((H,), jnp.float32), "ln_b": jnp.zeros((H,), jnp.float32),
        }
    for name in ["ingredients", "instructions"]:
        layers = []
        for _ in range(n_layers):
            layers.append({
                "w_in": nrm((H, 3 * H), dtype=bf), "b_in": jnp.zeros((3 * H,), jnp.float32),
                "w_out": nrm((H, H), dtype=bf), "b_out": jnp.zeros((H,), jnp.float32),
                "ln1_g": jnp.ones((H,), jnp.float32), "ln1_b": jnp.zeros((H,), jnp.float32),
                "w_ff1": nrm((H, ffn_dim), dtype=bf), "b_ff1": jnp.zeros((ffn_dim,), jnp.float32),
                "w_ff2": nrm((ffn_dim, H), dtype=bf), "b_ff2": jnp.zeros((H,), jnp.float32),
                "ln2_g": jnp.ones((H,), jnp.float32), "ln2_b": jnp.zeros((H,), jnp.float32),
            })
        params["merger"][name] = {"layers": layers}
    params["merger_recipe"] = {
        "w": nrm((3 * H, output_size), dtype=bf),
        "b": jnp.zeros((output_size,), jnp.float32),
    }
    return params


# ----------------------------------------------------------------------------- main
if __name__ == "__main__":
    key = jax.random.PRNGKey(0)
    kp, k1, k2, k3 = jax.random.split(key, 4)

    hidden_size, n_heads, n_layers, output_size, vocab = 32, 4, 1, 48, 64
    B, n_chunks, L_title, L_chunk = 2, 4, 12, 20

    params = init_params(kp, vocab, hidden_size, n_layers, output_size)

    title = jax.random.randint(k1, (B, L_title), 0, vocab, dtype=jnp.int32)
    ingrs = jax.random.randint(k2, (B, n_chunks, L_chunk), 0, vocab, dtype=jnp.int32)
    instrs = jax.random.randint(k3, (B, n_chunks, L_chunk), 0, vocab, dtype=jnp.int32)
    # one fully-empty ingredient chunk to exercise the chunk-level padding mask
    ingrs = ingrs.at[1, n_chunks - 1].set(0)

    fwd = jax.jit(partial(recipe_encoder_forward, n_heads=n_heads))
    out = fwd(params, title, ingrs, instrs)
    out = jax.block_until_ready(out)

    assert out.shape == (B, output_size), out.shape
    assert bool(jnp.all(jnp.isfinite(out)))
    print("KERNEL_OK")
</pallas_src>

<mosaic_0001>
module attributes {stable_mosaic.version = 11 : i64} {
  func.func @_ffn_ln_kernel(%arg0: i32, %arg1: memref<88x32xf32, #tpu.memory_space<vmem>>, %arg2: memref<32x128xbf16, #tpu.memory_space<vmem>>, %arg3: memref<1x128xf32, #tpu.memory_space<vmem>>, %arg4: memref<128x32xbf16, #tpu.memory_space<vmem>>, %arg5: memref<1x32xf32, #tpu.memory_space<vmem>>, %arg6: memref<1x32xf32, #tpu.memory_space<vmem>>, %arg7: memref<1x32xf32, #tpu.memory_space<vmem>>, %arg8: memref<88x32xf32, #tpu.memory_space<vmem>>) attributes {dimension_semantics = [#tpu.dimension_semantics<parallel>], iteration_bounds = array<i64: 7>, scalar_prefetch = 0 : i64, scratch_operands = 0 : i64, tpu.core_type = #tpu.core_type<tc>, window_params = [{transform_indices = @transform_0, window_bounds = array<i64: 88, 32>}, {pipeline_mode = #tpu.pipeline_mode<synchronous>, transform_indices = @transform_1, window_bounds = array<i64: 32, 128>}, {pipeline_mode = #tpu.pipeline_mode<synchronous>, transform_indices = @transform_2, window_bounds = array<i64: 1, 128>}, {pipeline_mode = #tpu.pipeline_mode<synchronous>, transform_indices = @transform_3, window_bounds = array<i64: 128, 32>}, {pipeline_mode = #tpu.pipeline_mode<synchronous>, transform_indices = @transform_4, window_bounds = array<i64: 1, 32>}, {pipeline_mode = #tpu.pipeline_mode<synchronous>, transform_indices = @transform_5, window_bounds = array<i64: 1, 32>}, {pipeline_mode = #tpu.pipeline_mode<synchronous>, transform_indices = @transform_6, window_bounds = array<i64: 1, 32>}, {transform_indices = @transform_7, window_bounds = array<i64: 88, 32>}]} {
    %c0 = arith.constant 0 : index
    %c0_0 = arith.constant 0 : index
    %0 = vector.load %arg1[%c0, %c0_0] : memref<88x32xf32, #tpu.memory_space<vmem>>, vector<88x32xf32>
    %1 = arith.truncf %0 : vector<88x32xf32> to vector<88x32xbf16>
    %c0_1 = arith.constant 0 : index
    %c0_2 = arith.constant 0 : index
    %2 = vector.load %arg5[%c0_1, %c0_2] : memref<1x32xf32, #tpu.memory_space<vmem>>, vector<1x32xf32>
    %3 = vector.broadcast %2 : vector<1x32xf32> to vector<88x32xf32>
    %4 = arith.addf %0, %3 : vector<88x32xf32>
    %c0_3 = arith.constant 0 : index
    %c0_4 = arith.constant 0 : index
    %5 = vector.load %arg2[%c0_3, %c0_4] : memref<32x128xbf16, #tpu.memory_space<vmem>>, vector<32x128xbf16>
    %c0_5 = arith.constant 0 : index
    %c0_6 = arith.constant 0 : index
    %6 = vector.load %arg3[%c0_5, %c0_6] : memref<1x128xf32, #tpu.memory_space<vmem>>, vector<1x128xf32>
    %c0_7 = arith.constant 0 : index
    %c0_8 = arith.constant 0 : index
    %7 = vector.load %arg4[%c0_7, %c0_8] : memref<128x32xbf16, #tpu.memory_space<vmem>>, vector<128x32xbf16>
    %cst = arith.constant dense<0.000000e+00> : vector<88x128xf32>
    %8 = tpu.matmul %1, %5, %cst {dimension_numbers = #tpu.dot_dimension_numbers<[1], [0], [0], [1], [0, 0, 1, 1], [], []>} : vector<88x32xbf16>, vector<32x128xbf16>, vector<88x128xf32> -> vector<88x128xf32>
    %9 = vector.broadcast %6 : vector<1x128xf32> to vector<88x128xf32>
    %10 = arith.addf %8, %9 : vector<88x128xf32>
    %cst_9 = arith.constant 0.000000e+00 : f32
    %11 = vector.broadcast %cst_9 : f32 to vector<88x128xf32>
    %12 = arith.maximumf %10, %11 : vector<88x128xf32>
    %13 = arith.truncf %12 : vector<88x128xf32> to vector<88x128xbf16>
    %cst_10 = arith.constant dense<0.000000e+00> : vector<88x32xf32>
    %14 = tpu.matmul %13, %7, %cst_10 {dimension_numbers = #tpu.dot_dimension_numbers<[1], [0], [0], [1], [0, 0, 1, 1], [], []>} : vector<88x128xbf16>, vector<128x32xbf16>, vector<88x32xf32> -> vector<88x32xf32>
    %15 = arith.addf %4, %14 : vector<88x32xf32>
    %cst_11 = arith.constant dense<0.000000e+00> : vector<88xf32>
    %16 = vector.multi_reduction <add>, %15, %cst_11 [1] : vector<88x32xf32> to vector<88xf32>
    %17 = vector.shape_cast %16 : vector<88xf32> to vector<88x1xf32>
    %cst_12 = arith.constant 3.200000e+01 : f32
    %18 = vector.broadcast %cst_12 : f32 to vector<88x1xf32>
    %19 = arith.divf %17, %18 : vector<88x1xf32>
    %20 = vector.broadcast %19 : vector<88x1xf32> to vector<88x32xf32>
    %21 = arith.subf %15, %20 : vector<88x32xf32>
    %22 = arith.mulf %21, %21 : vector<88x32xf32>
    %cst_13 = arith.constant dense<0.000000e+00> : vector<88xf32>
    %23 = vector.multi_reduction <add>, %22, %cst_13 [1] : vector<88x32xf32> to vector<88xf32>
    %24 = vector.shape_cast %23 : vector<88xf32> to vector<88x1xf32>
    %cst_14 = arith.constant 3.200000e+01 : f32
    %25 = vector.broadcast %cst_14 : f32 to vector<88x1xf32>
    %26 = arith.divf %24, %25 : vector<88x1xf32>
    %27 = vector.broadcast %19 : vector<88x1xf32> to vector<88x32xf32>
    %28 = arith.subf %15, %27 : vector<88x32xf32>
    %cst_15 = arith.constant 9.99999974E-6 : f32
    %29 = vector.broadcast %cst_15 : f32 to vector<88x1xf32>
    %30 = arith.addf %26, %29 : vector<88x1xf32>
    %31 = math.rsqrt %30 : vector<88x1xf32>
    %32 = vector.broadcast %31 : vector<88x1xf32> to vector<88x32xf32>
    %33 = arith.mulf %28, %32 : vector<88x32xf32>
    %c0_16 = arith.constant 0 : index
    %c0_17 = arith.constant 0 : index
    %34 = vector.load %arg6[%c0_16, %c0_17] : memref<1x32xf32, #tpu.memory_space<vmem>>, vector<1x32xf32>
    %35 = vector.broadcast %34 : vector<1x32xf32> to vector<88x32xf32>
    %36 = arith.mulf %33, %35 : vector<88x32xf32>
    %c0_18 = arith.constant 0 : index
    %c0_19 = arith.constant 0 : index
    %37 = vector.load %arg7[%c0_18, %c0_19] : memref<1x32xf32, #tpu.memory_space<vmem>>, vector<1x32xf32>
    %38 = vector.broadcast %37 : vector<1x32xf32> to vector<88x32xf32>
    %39 = arith.addf %36, %38 : vector<88x32xf32>
    %c0_20 = arith.constant 0 : index
    %c0_21 = arith.constant 0 : index
    %40 = vector.load %arg8[%c0_20, %c0_21] : memref<88x32xf32, #tpu.memory_space<vmem>>, vector<88x32xf32>
    tpu.vector_store %arg8[%c0_20, %c0_21], %39 {strides = array<i32>} : memref<88x32xf32, #tpu.memory_space<vmem>>, vector<88x32xf32>,
    return
  }
  func.func @transform_0(%arg0: i32) -> (i32, i32) {
    %c0_i32 = arith.constant 0 : i32
    %c0_i32_0 = arith.constant 0 : i32
    return %arg0, %c0_i32 : i32, i32
  }
  func.func @transform_1(%arg0: i32) -> (i32, i32) {
    %c0_i32 = arith.constant 0 : i32
    %c0_i32_0 = arith.constant 0 : i32
    %c0_i32_1 = arith.constant 0 : i32
    return %c0_i32, %c0_i32_0 : i32, i32
  }
  func.func @transform_2(%arg0: i32) -> (i32, i32) {
    %c0_i32 = arith.constant 0 : i32
    %c0_i32_0 = arith.constant 0 : i32
    %c0_i32_1 = arith.constant 0 : i32
    return %c0_i32, %c0_i32_0 : i32, i32
  }
  func.func @transform_3(%arg0: i32) -> (i32, i32) {
    %c0_i32 = arith.constant 0 : i32
    %c0_i32_0 = arith.constant 0 : i32
    %c0_i32_1 = arith.constant 0 : i32
    return %c0_i32, %c0_i32_0 : i32, i32
  }
  func.func @transform_4(%arg0: i32) -> (i32, i32) {
    %c0_i32 = arith.constant 0 : i32
    %c0_i32_0 = arith.constant 0 : i32
    %c0_i32_1 = arith.constant 0 : i32
    return %c0_i32, %c0_i32_0 : i32, i32
  }
  func.func @transform_5(%arg0: i32) -> (i32, i32) {
    %c0_i32 = arith.constant 0 : i32
    %c0_i32_0 = arith.constant 0 : i32
    %c0_i32_1 = arith.constant 0 : i32
    return %c0_i32, %c0_i32_0 : i32, i32
  }
  func.func @transform_6(%arg0: i32) -> (i32, i32) {
    %c0_i32 = arith.constant 0 : i32
    %c0_i32_0 = arith.constant 0 : i32
    %c0_i32_1 = arith.constant 0 : i32
    return %c0_i32, %c0_i32_0 : i32, i32
  }
  func.func @transform_7(%arg0: i32) -> (i32, i32) {
    %c0_i32 = arith.constant 0 : i32
    %c0_i32_0 = arith.constant 0 : i32
    return %arg0, %c0_i32 : i32, i32
  }
}

module attributes {stable_mosaic.version = 11 : i64} {
  func.func @_avgpool_kernel(%arg0: i32, %arg1: memref<8x77xf32, #tpu.memory_space<vmem>>, %arg2: memref<8x77x32xf32, #tpu.memory_space<vmem>>, %arg3: memref<8x32xf32, #tpu.memory_space<vmem>>) attributes {dimension_semantics = [#tpu.dimension_semantics<parallel>], iteration_bounds = array<i64: 1>, scalar_prefetch = 0 : i64, scratch_operands = 0 : i64, tpu.core_type = #tpu.core_type<tc>, window_params = [{transform_indices = @transform_0, window_bounds = array<i64: 8, 77>}, {transform_indices = @transform_1, window_bounds = array<i64: 8, 77, 32>}, {transform_indices = @transform_2, window_bounds = array<i64: 8, 32>}]} {
    %c0 = arith.constant 0 : index
    %c0_0 = arith.constant 0 : index
    %0 = vector.load %arg1[%c0, %c0_0] : memref<8x77xf32, #tpu.memory_space<vmem>>, vector<8x77xf32>
    %c0_1 = arith.constant 0 : index
    %c0_2 = arith.constant 0 : index
    %c0_3 = arith.constant 0 : index
    %1 = vector.load %arg2[%c0_1, %c0_2, %c0_3] : memref<8x77x32xf32, #tpu.memory_space<vmem>>, vector<8x77x32xf32>
    %cst = arith.constant dense<0.000000e+00> : vector<8xf32>
    %2 = vector.multi_reduction <add>, %0, %cst [1] : vector<8x77xf32> to vector<8xf32>
    %3 = vector.shape_cast %2 : vector<8xf32> to vector<8x1xf32>
    %4 = vector.shape_cast %0 : vector<8x77xf32> to vector<8x77x1xf32>
    %5 = vector.broadcast %4 : vector<8x77x1xf32> to vector<8x77x32xf32>
    %6 = arith.mulf %1, %5 : vector<8x77x32xf32>
    %cst_4 = arith.constant dense<0.000000e+00> : vector<8x32xf32>
    %7 = vector.multi_reduction <add>, %6, %cst_4 [1] : vector<8x77x32xf32> to vector<8x32xf32>
    %cst_5 = arith.constant 9.99999996E-13 : f32
    %8 = vector.broadcast %cst_5 : f32 to vector<8x1xf32>
    %9 = arith.addf %3, %8 : vector<8x1xf32>
    %10 = tpu.reciprocal %9 {approx = true} : vector<8x1xf32> -> vector<8x1xf32>
    %11 = vector.broadcast %10 : vector<8x1xf32> to vector<8x32xf32>
    %12 = arith.mulf %7, %11 : vector<8x32xf32>
    %c0_6 = arith.constant 0 : index
    %c0_7 = arith.constant 0 : index
    %13 = vector.load %arg3[%c0_6, %c0_7] : memref<8x32xf32, #tpu.memory_space<vmem>>, vector<8x32xf32>
    tpu.vector_store %arg3[%c0_6, %c0_7], %12 {strides = array<i32>} : memref<8x32xf32, #tpu.memory_space<vmem>>, vector<8x32xf32>,
    return
  }
  func.func @transform_0(%arg0: i32) -> (i32, i32) {
    %c0_i32 = arith.constant 0 : i32
    %c0_i32_0 = arith.constant 0 : i32
    return %arg0, %c0_i32 : i32, i32
  }
  func.func @transform_1(%arg0: i32) -> (i32, i32, i32) {
    %c0_i32 = arith.constant 0 : i32
    %c0_i32_0 = arith.constant 0 : i32
    %c0_i32_1 = arith.constant 0 : i32
    return %arg0, %c0_i32, %c0_i32_0 : i32, i32, i32
  }
  func.func @transform_2(%arg0: i32) -> (i32, i32) {
    %c0_i32 = arith.constant 0 : i32
    %c0_i32_0 = arith.constant 0 : i32
    return %arg0, %c0_i32 : i32, i32
  }
}

module attributes {stable_mosaic.version = 11 : i64} {
  func.func @_linear_kernel(%arg0: i32, %arg1: memref<8x32xf32, #tpu.memory_space<vmem>>, %arg2: memref<32x96xbf16, #tpu.memory_space<vmem>>, %arg3: memref<1x96xf32, #tpu.memory_space<vmem>>, %arg4: memref<8x96xbf16, #tpu.memory_space<vmem>>) attributes {dimension_semantics = [#tpu.dimension_semantics<parallel>], iteration_bounds = array<i64: 2>, scalar_prefetch = 0 : i64, scratch_operands = 0 : i64, tpu.core_type = #tpu.core_type<tc>, window_params = [{transform_indices = @transform_0, window_bounds = array<i64: 8, 32>}, {pipeline_mode = #tpu.pipeline_mode<synchronous>, transform_indices = @transform_1, window_bounds = array<i64: 32, 96>}, {pipeline_mode = #tpu.pipeline_mode<synchronous>, transform_indices = @transform_2, window_bounds = array<i64: 1, 96>}, {transform_indices = @transform_3, window_bounds = array<i64: 8, 96>}]} {
    %c0 = arith.constant 0 : index
    %c0_0 = arith.constant 0 : index
    %0 = vector.load %arg1[%c0, %c0_0] : memref<8x32xf32, #tpu.memory_space<vmem>>, vector<8x32xf32>
    %1 = arith.truncf %0 : vector<8x32xf32> to vector<8x32xbf16>
    %c0_1 = arith.constant 0 : index
    %c0_2 = arith.constant 0 : index
    %2 = vector.load %arg2[%c0_1, %c0_2] : memref<32x96xbf16, #tpu.memory_space<vmem>>, vector<32x96xbf16>
    %cst = arith.constant dense<0.000000e+00> : vector<8x96xf32>
    %3 = tpu.matmul %1, %2, %cst {dimension_numbers = #tpu.dot_dimension_numbers<[1], [0], [0], [1], [0, 0, 1, 1], [], []>} : vector<8x32xbf16>, vector<32x96xbf16>, vector<8x96xf32> -> vector<8x96xf32>
    %c0_3 = arith.constant 0 : index
    %c0_4 = arith.constant 0 : index
    %4 = vector.load %arg3[%c0_3, %c0_4] : memref<1x96xf32, #tpu.memory_space<vmem>>, vector<1x96xf32>
    %5 = vector.broadcast %4 : vector<1x96xf32> to vector<8x96xf32>
    %6 = arith.addf %3, %5 : vector<8x96xf32>
    %7 = arith.truncf %6 : vector<8x96xf32> to vector<8x96xbf16>
    %c0_5 = arith.constant 0 : index
    %c0_6 = arith.constant 0 : index
    %8 = vector.load %arg4[%c0_5, %c0_6] : memref<8x96xbf16, #tpu.memory_space<vmem>>, vector<8x96xbf16>
    tpu.vector_store %arg4[%c0_5, %c0_6], %7 {strides = array<i32>} : memref<8x96xbf16, #tpu.memory_space<vmem>>, vector<8x96xbf16>,
    return
  }
  func.func @transform_0(%arg0: i32) -> (i32, i32) {
    %c0_i32 = arith.constant 0 : i32
    %c0_i32_0 = arith.constant 0 : i32
    return %arg0, %c0_i32 : i32, i32
  }
  func.func @transform_1(%arg0: i32) -> (i32, i32) {
    %c0_i32 = arith.constant 0 : i32
    %c0_i32_0 = arith.constant 0 : i32
    %c0_i32_1 = arith.constant 0 : i32
    return %c0_i32, %c0_i32_0 : i32, i32
  }
  func.func @transform_2(%arg0: i32) -> (i32, i32) {
    %c0_i32 = arith.constant 0 : i32
    %c0_i32_0 = arith.constant 0 : i32
    %c0_i32_1 = arith.constant 0 : i32
    return %c0_i32, %c0_i32_0 : i32, i32
  }
  func.func @transform_3(%arg0: i32) -> (i32, i32) {
    %c0_i32 = arith.constant 0 : i32
    %c0_i32_0 = arith.constant 0 : i32
    return %arg0, %c0_i32 : i32, i32
  }
}

module attributes {stable_mosaic.version = 11 : i64} {
  func.func @_mha_kernel(%arg0: i32, %arg1: memref<1x1x1x8xf32, #tpu.memory_space<vmem>>, %arg2: memref<1x4x8x8xbf16, #tpu.memory_space<vmem>>, %arg3: memref<1x4x8x8xbf16, #tpu.memory_space<vmem>>, %arg4: memref<1x4x8x8xbf16, #tpu.memory_space<vmem>>, %arg5: memref<1x4x8x8xbf16, #tpu.memory_space<vmem>>) attributes {dimension_semantics = [#tpu.dimension_semantics<parallel>], iteration_bounds = array<i64: 2>, scalar_prefetch = 0 : i64, scratch_operands = 0 : i64, tpu.core_type = #tpu.core_type<tc>, window_params = [{transform_indices = @transform_0, window_bounds = array<i64: 1, 1, 1, 8>}, {transform_indices = @transform_1, window_bounds = array<i64: 1, 4, 8, 8>}, {transform_indices = @transform_2, window_bounds = array<i64: 1, 4, 8, 8>}, {transform_indices = @transform_3, window_bounds = array<i64: 1, 4, 8, 8>}, {transform_indices = @transform_4, window_bounds = array<i64: 1, 4, 8, 8>}]} {
    %c0 = arith.constant 0 : index
    %c0_0 = arith.constant 0 : index
    %c0_1 = arith.constant 0 : index
    %c0_2 = arith.constant 0 : index
    %0 = vector.load %arg2[%c0, %c0_0, %c0_1, %c0_2] : memref<1x4x8x8xbf16, #tpu.memory_space<vmem>>, vector<1x4x8x8xbf16>
    %1 = vector.shape_cast %0 : vector<1x4x8x8xbf16> to vector<4x8x8xbf16>
    %c0_3 = arith.constant 0 : index
    %c0_4 = arith.constant 0 : index
    %c0_5 = arith.constant 0 : index
    %c0_6 = arith.constant 0 : index
    %2 = vector.load %arg3[%c0_3, %c0_4, %c0_5, %c0_6] : memref<1x4x8x8xbf16, #tpu.memory_space<vmem>>, vector<1x4x8x8xbf16>
    %3 = vector.shape_cast %2 : vector<1x4x8x8xbf16> to vector<4x8x8xbf16>
    %c0_7 = arith.constant 0 : index
    %c0_8 = arith.constant 0 : index
    %c0_9 = arith.constant 0 : index
    %c0_10 = arith.constant 0 : index
    %4 = vector.load %arg4[%c0_7, %c0_8, %c0_9, %c0_10] : memref<1x4x8x8xbf16, #tpu.memory_space<vmem>>, vector<1x4x8x8xbf16>
    %5 = vector.shape_cast %4 : vector<1x4x8x8xbf16> to vector<4x8x8xbf16>
    "tpu.trace_start"() <{level = 10 : i32, message = "bqd,bkd->bqk"}> : () -> ()
    %cst = arith.constant dense<0.000000e+00> : vector<4x8x8xf32>
    %6 = tpu.matmul %1, %3, %cst {dimension_numbers = #tpu.dot_dimension_numbers<[2], [2], [1], [1], [0, 0, 0, 1, 1, 1], [0], [0]>} : vector<4x8x8xbf16>, vector<4x8x8xbf16>, vector<4x8x8xf32> -> vector<4x8x8xf32>
    "tpu.trace_stop"() : () -> ()
    %cst_11 = arith.constant 0.353553385 : f32
    %7 = vector.broadcast %cst_11 : f32 to vector<4x8x8xf32>
    %8 = arith.mulf %6, %7 : vector<4x8x8xf32>
    %9 = vector.shape_cast %8 : vector<4x8x8xf32> to vector<1x4x8x8xf32>
    %c0_12 = arith.constant 0 : index
    %c0_13 = arith.constant 0 : index
    %c0_14 = arith.constant 0 : index
    %c0_15 = arith.constant 0 : index
    %10 = vector.load %arg1[%c0_12, %c0_13, %c0_14, %c0_15] : memref<1x1x1x8xf32, #tpu.memory_space<vmem>>, vector<1x1x1x8xf32>
    %cst_16 = arith.constant 1.000000e+00 : f32
    %11 = vector.broadcast %cst_16 : f32 to vector<1x1x1x8xf32>
    %12 = arith.subf %11, %10 : vector<1x1x1x8xf32>
    %cst_17 = arith.constant -1.000000e+09 : f32
    %13 = vector.broadcast %cst_17 : f32 to vector<1x1x1x8xf32>
    %14 = arith.mulf %12, %13 : vector<1x1x1x8xf32>
    %15 = vector.broadcast %14 : vector<1x1x1x8xf32> to vector<1x4x8x8xf32>
    %16 = arith.addf %9, %15 : vector<1x4x8x8xf32>
    %cst_18 = arith.constant dense<0xFF800000> : vector<1x4x8xf32>
    %17 = vector.multi_reduction <maximumf>, %16, %cst_18 [3] : vector<1x4x8x8xf32> to vector<1x4x8xf32>
    %18 = vector.shape_cast %17 : vector<1x4x8xf32> to vector<1x4x8x1xf32>
    %19 = vector.broadcast %18 : vector<1x4x8x1xf32> to vector<1x4x8x8xf32>
    %20 = arith.subf %16, %19 : vector<1x4x8x8xf32>
    %21 = math.exp %20 : vector<1x4x8x8xf32>
    %cst_19 = arith.constant dense<0.000000e+00> : vector<1x4x8xf32>
    %22 = vector.multi_reduction <add>, %21, %cst_19 [3] : vector<1x4x8x8xf32> to vector<1x4x8xf32>
    %23 = vector.shape_cast %22 : vector<1x4x8xf32> to vector<1x4x8x1xf32>
    %24 = tpu.reciprocal %23 {approx = true} : vector<1x4x8x1xf32> -> vector<1x4x8x1xf32>
    %25 = vector.broadcast %24 : vector<1x4x8x1xf32> to vector<1x4x8x8xf32>
    %26 = arith.mulf %21, %25 : vector<1x4x8x8xf32>
    %27 = vector.shape_cast %26 : vector<1x4x8x8xf32> to vector<4x8x8xf32>
    %28 = arith.truncf %27 : vector<4x8x8xf32> to vector<4x8x8xbf16>
    "tpu.trace_start"() <{level = 10 : i32, message = "bqk,bkd->bqd"}> : () -> ()
    %cst_20 = arith.constant dense<0.000000e+00> : vector<4x8x8xf32>
    %29 = tpu.matmul %28, %5, %cst_20 {dimension_numbers = #tpu.dot_dimension_numbers<[2], [1], [1], [2], [0, 0, 0, 1, 1, 2], [0], [0]>} : vector<4x8x8xbf16>, vector<4x8x8xbf16>, vector<4x8x8xf32> -> vector<4x8x8xf32>
    "tpu.trace_stop"() : () -> ()
    %30 = vector.shape_cast %29 : vector<4x8x8xf32> to vector<1x4x8x8xf32>
    %31 = arith.truncf %30 : vector<1x4x8x8xf32> to vector<1x4x8x8xbf16>
    %c0_21 = arith.constant 0 : index
    %c0_22 = arith.constant 0 : index
    %c0_23 = arith.constant 0 : index
    %c0_24 = arith.constant 0 : index
    %32 = vector.load %arg5[%c0_21, %c0_22, %c0_23, %c0_24] : memref<1x4x8x8xbf16, #tpu.memory_space<vmem>>, vector<1x4x8x8xbf16>
    tpu.vector_store %arg5[%c0_21, %c0_22, %c0_23, %c0_24], %31 {strides = array<i32>} : memref<1x4x8x8xbf16, #tpu.memory_space<vmem>>, vector<1x4x8x8xbf16>,
    return
  }
  func.func @transform_0(%arg0: i32) -> (i32, i32, i32, i32) {
    %c0_i32 = arith.constant 0 : i32
    %c0_i32_0 = arith.constant 0 : i32
    %c0_i32_1 = arith.constant 0 : i32
    %c0_i32_2 = arith.constant 0 : i32
    return %arg0, %c0_i32, %c0_i32_0, %c0_i32_1 : i32, i32, i32, i32
  }
  func.func @transform_1(%arg0: i32) -> (i32, i32, i32, i32) {
    %c0_i32 = arith.constant 0 : i32
    %c0_i32_0 = arith.constant 0 : i32
    %c0_i32_1 = arith.constant 0 : i32
    %c0_i32_2 = arith.constant 0 : i32
    return %arg0, %c0_i32, %c0_i32_0, %c0_i32_1 : i32, i32, i32, i32
  }
  func.func @transform_2(%arg0: i32) -> (i32, i32, i32, i32) {
    %c0_i32 = arith.constant 0 : i32
    %c0_i32_0 = arith.constant 0 : i32
    %c0_i32_1 = arith.constant 0 : i32
    %c0_i32_2 = arith.constant 0 : i32
    return %arg0, %c0_i32, %c0_i32_0, %c0_i32_1 : i32, i32, i32, i32
  }
  func.func @transform_3(%arg0: i32) -> (i32, i32, i32, i32) {
    %c0_i32 = arith.constant 0 : i32
    %c0_i32_0 = arith.constant 0 : i32
    %c0_i32_1 = arith.constant 0 : i32
    %c0_i32_2 = arith.constant 0 : i32
    return %arg0, %c0_i32, %c0_i32_0, %c0_i32_1 : i32, i32, i32, i32
  }
  func.func @transform_4(%arg0: i32) -> (i32, i32, i32, i32) {
    %c0_i32 = arith.constant 0 : i32
    %c0_i32_0 = arith.constant 0 : i32
    %c0_i32_1 = arith.constant 0 : i32
    %c0_i32_2 = arith.constant 0 : i32
    return %arg0, %c0_i32, %c0_i32_0, %c0_i32_1 : i32, i32, i32, i32
  }
}

module attributes {stable_mosaic.version = 11 : i64} {
  func.func @_ffn_ln_kernel(%arg0: i32, %arg1: memref<8x32xf32, #tpu.memory_space<vmem>>, %arg2: memref<32x2048xbf16, #tpu.memory_space<vmem>>, %arg3: memref<1x2048xf32, #tpu.memory_space<vmem>>, %arg4: memref<2048x32xbf16, #tpu.memory_space<vmem>>, %arg5: memref<1x32xf32, #tpu.memory_space<vmem>>, %arg6: memref<1x32xf32, #tpu.memory_space<vmem>>, %arg7: memref<1x32xf32, #tpu.memory_space<vmem>>, %arg8: memref<8x32xf32, #tpu.memory_space<vmem>>) attributes {dimension_semantics = [#tpu.dimension_semantics<parallel>], iteration_bounds = array<i64: 2>, scalar_prefetch = 0 : i64, scratch_operands = 0 : i64, tpu.core_type = #tpu.core_type<tc>, window_params = [{transform_indices = @transform_0, window_bounds = array<i64: 8, 32>}, {pipeline_mode = #tpu.pipeline_mode<synchronous>, transform_indices = @transform_1, window_bounds = array<i64: 32, 2048>}, {pipeline_mode = #tpu.pipeline_mode<synchronous>, transform_indices = @transform_2, window_bounds = array<i64: 1, 2048>}, {pipeline_mode = #tpu.pipeline_mode<synchronous>, transform_indices = @transform_3, window_bounds = array<i64: 2048, 32>}, {pipeline_mode = #tpu.pipeline_mode<synchronous>, transform_indices = @transform_4, window_bounds = array<i64: 1, 32>}, {pipeline_mode = #tpu.pipeline_mode<synchronous>, transform_indices = @transform_5, window_bounds = array<i64: 1, 32>}, {pipeline_mode = #tpu.pipeline_mode<synchronous>, transform_indices = @transform_6, window_bounds = array<i64: 1, 32>}, {transform_indices = @transform_7, window_bounds = array<i64: 8, 32>}]} {
    %c0 = arith.constant 0 : index
    %c0_0 = arith.constant 0 : index
    %0 = vector.load %arg1[%c0, %c0_0] : memref<8x32xf32, #tpu.memory_space<vmem>>, vector<8x32xf32>
    %1 = arith.truncf %0 : vector<8x32xf32> to vector<8x32xbf16>
    %c0_1 = arith.constant 0 : index
    %c0_2 = arith.constant 0 : index
    %2 = vector.load %arg5[%c0_1, %c0_2] : memref<1x32xf32, #tpu.memory_space<vmem>>, vector<1x32xf32>
    %3 = vector.broadcast %2 : vector<1x32xf32> to vector<8x32xf32>
    %4 = arith.addf %0, %3 : vector<8x32xf32>
    %c0_3 = arith.constant 0 : index
    %c0_4 = arith.constant 0 : index
    %5 = vector.load %arg2[%c0_3, %c0_4] : memref<32x2048xbf16, #tpu.memory_space<vmem>>, vector<32x512xbf16>
    %c0_5 = arith.constant 0 : index
    %c0_6 = arith.constant 0 : index
    %6 = vector.load %arg3[%c0_5, %c0_6] : memref<1x2048xf32, #tpu.memory_space<vmem>>, vector<1x512xf32>
    %c0_7 = arith.constant 0 : index
    %c0_8 = arith.constant 0 : index
    %7 = vector.load %arg4[%c0_7, %c0_8] : memref<2048x32xbf16, #tpu.memory_space<vmem>>, vector<512x32xbf16>
    %cst = arith.constant dense<0.000000e+00> : vector<8x512xf32>
    %8 = tpu.matmul %1, %5, %cst {dimension_numbers = #tpu.dot_dimension_numbers<[1], [0], [0], [1], [0, 0, 1, 1], [], []>} : vector<8x32xbf16>, vector<32x512xbf16>, vector<8x512xf32> -> vector<8x512xf32>
    %9 = vector.broadcast %6 : vector<1x512xf32> to vector<8x512xf32>
    %10 = arith.addf %8, %9 : vector<8x512xf32>
    %cst_9 = arith.constant 0.000000e+00 : f32
    %11 = vector.broadcast %cst_9 : f32 to vector<8x512xf32>
    %12 = arith.maximumf %10, %11 : vector<8x512xf32>
    %13 = arith.truncf %12 : vector<8x512xf32> to vector<8x512xbf16>
    %cst_10 = arith.constant dense<0.000000e+00> : vector<8x32xf32>
    %14 = tpu.matmul %13, %7, %cst_10 {dimension_numbers = #tpu.dot_dimension_numbers<[1], [0], [0], [1], [0, 0, 1, 1], [], []>} : vector<8x512xbf16>, vector<512x32xbf16>, vector<8x32xf32> -> vector<8x32xf32>
    %15 = arith.addf %4, %14 : vector<8x32xf32>
    %c0_11 = arith.constant 0 : index
    %c512 = arith.constant 512 : index
    %16 = vector.load %arg2[%c0_11, %c512] : memref<32x2048xbf16, #tpu.memory_space<vmem>>, vector<32x512xbf16>
    %c0_12 = arith.constant 0 : index
    %c512_13 = arith.constant 512 : index
    %17 = vector.load %arg3[%c0_12, %c512_13] : memref<1x2048xf32, #tpu.memory_space<vmem>>, vector<1x512xf32>
    %c512_14 = arith.constant 512 : index
    %c0_15 = arith.constant 0 : index
    %18 = vector.load %arg4[%c512_14, %c0_15] : memref<2048x32xbf16, #tpu.memory_space<vmem>>, vector<512x32xbf16>
    %cst_16 = arith.constant dense<0.000000e+00> : vector<8x512xf32>
    %19 = tpu.matmul %1, %16, %cst_16 {dimension_numbers = #tpu.dot_dimension_numbers<[1], [0], [0], [1], [0, 0, 1, 1], [], []>} : vector<8x32xbf16>, vector<32x512xbf16>, vector<8x512xf32> -> vector<8x512xf32>
    %20 = vector.broadcast %17 : vector<1x512xf32> to vector<8x512xf32>
    %21 = arith.addf %19, %20 : vector<8x512xf32>
    %cst_17 = arith.constant 0.000000e+00 : f32
    %22 = vector.broadcast %cst_17 : f32 to vector<8x512xf32>
    %23 = arith.maximumf %21, %22 : vector<8x512xf32>
    %24 = arith.truncf %23 : vector<8x512xf32> to vector<8x512xbf16>
    %cst_18 = arith.constant dense<0.000000e+00> : vector<8x32xf32>
    %25 = tpu.matmul %24, %18, %cst_18 {dimension_numbers = #tpu.dot_dimension_numbers<[1], [0], [0], [1], [0, 0, 1, 1], [], []>} : vector<8x512xbf16>, vector<512x32xbf16>, vector<8x32xf32> -> vector<8x32xf32>
    %26 = arith.addf %15, %25 : vector<8x32xf32>
    %c0_19 = arith.constant 0 : index
    %c1024 = arith.constant 1024 : index
    %27 = vector.load %arg2[%c0_19, %c1024] : memref<32x2048xbf16, #tpu.memory_space<vmem>>, vector<32x512xbf16>
    %c0_20 = arith.constant 0 : index
    %c1024_21 = arith.constant 1024 : index
    %28 = vector.load %arg3[%c0_20, %c1024_21] : memref<1x2048xf32, #tpu.memory_space<vmem>>, vector<1x512xf32>
    %c1024_22 = arith.constant 1024 : index
    %c0_23 = arith.constant 0 : index
    %29 = vector.load %arg4[%c1024_22, %c0_23] : memref<2048x32xbf16, #tpu.memory_space<vmem>>, vector<512x32xbf16>
    %cst_24 = arith.constant dense<0.000000e+00> : vector<8x512xf32>
    %30 = tpu.matmul %1, %27, %cst_24 {dimension_numbers = #tpu.dot_dimension_numbers<[1], [0], [0], [1], [0, 0, 1, 1], [], []>} : vector<8x32xbf16>, vector<32x512xbf16>, vector<8x512xf32> -> vector<8x512xf32>
    %31 = vector.broadcast %28 : vector<1x512xf32> to vector<8x512xf32>
    %32 = arith.addf %30, %31 : vector<8x512xf32>
    %cst_25 = arith.constant 0.000000e+00 : f32
    %33 = vector.broadcast %cst_25 : f32 to vector<8x512xf32>
    %34 = arith.maximumf %32, %33 : vector<8x512xf32>
    %35 = arith.truncf %34 : vector<8x512xf32> to vector<8x512xbf16>
    %cst_26 = arith.constant dense<0.000000e+00> : vector<8x32xf32>
    %36 = tpu.matmul %35, %29, %cst_26 {dimension_numbers = #tpu.dot_dimension_numbers<[1], [0], [0], [1], [0, 0, 1, 1], [], []>} : vector<8x512xbf16>, vector<512x32xbf16>, vector<8x32xf32> -> vector<8x32xf32>
    %37 = arith.addf %26, %36 : vector<8x32xf32>
    %c0_27 = arith.constant 0 : index
    %c1536 = arith.constant 1536 : index
    %38 = vector.load %arg2[%c0_27, %c1536] : memref<32x2048xbf16, #tpu.memory_space<vmem>>, vector<32x512xbf16>
    %c0_28 = arith.constant 0 : index
    %c1536_29 = arith.constant 1536 : index
    %39 = vector.load %arg3[%c0_28, %c1536_29] : memref<1x2048xf32, #tpu.memory_space<vmem>>, vector<1x512xf32>
    %c1536_30 = arith.constant 1536 : index
    %c0_31 = arith.constant 0 : index
    %40 = vector.load %arg4[%c1536_30, %c0_31] : memref<2048x32xbf16, #tpu.memory_space<vmem>>, vector<512x32xbf16>
    %cst_32 = arith.constant dense<0.000000e+00> : vector<8x512xf32>
    %41 = tpu.matmul %1, %38, %cst_32 {dimension_numbers = #tpu.dot_dimension_numbers<[1], [0], [0], [1], [0, 0, 1, 1], [], []>} : vector<8x32xbf16>, vector<32x512xbf16>, vector<8x512xf32> -> vector<8x512xf32>
    %42 = vector.broadcast %39 : vector<1x512xf32> to vector<8x512xf32>
    %43 = arith.addf %41, %42 : vector<8x512xf32>
    %cst_33 = arith.constant 0.000000e+00 : f32
    %44 = vector.broadcast %cst_33 : f32 to vector<8x512xf32>
    %45 = arith.maximumf %43, %44 : vector<8x512xf32>
    %46 = arith.truncf %45 : vector<8x512xf32> to vector<8x512xbf16>
    %cst_34 = arith.constant dense<0.000000e+00> : vector<8x32xf32>
    %47 = tpu.matmul %46, %40, %cst_34 {dimension_numbers = #tpu.dot_dimension_numbers<[1], [0], [0], [1], [0, 0, 1, 1], [], []>} : vector<8x512xbf16>, vector<512x32xbf16>, vector<8x32xf32> -> vector<8x32xf32>
    %48 = arith.addf %37, %47 : vector<8x32xf32>
    %cst_35 = arith.constant dense<0.000000e+00> : vector<8xf32>
    %49 = vector.multi_reduction <add>, %48, %cst_35 [1] : vector<8x32xf32> to vector<8xf32>
    %50 = vector.shape_cast %49 : vector<8xf32> to vector<8x1xf32>
    %cst_36 = arith.constant 3.200000e+01 : f32
    %51 = vector.broadcast %cst_36 : f32 to vector<8x1xf32>
    %52 = arith.divf %50, %51 : vector<8x1xf32>
    %53 = vector.broadcast %52 : vector<8x1xf32> to vector<8x32xf32>
    %54 = arith.subf %48, %53 : vector<8x32xf32>
    %55 = arith.mulf %54, %54 : vector<8x32xf32>
    %cst_37 = arith.constant dense<0.000000e+00> : vector<8xf32>
    %56 = vector.multi_reduction <add>, %55, %cst_37 [1] : vector<8x32xf32> to vector<8xf32>
    %57 = vector.shape_cast %56 : vector<8xf32> to vector<8x1xf32>
    %cst_38 = arith.constant 3.200000e+01 : f32
    %58 = vector.broadcast %cst_38 : f32 to vector<8x1xf32>
    %59 = arith.divf %57, %58 : vector<8x1xf32>
    %60 = vector.broadcast %52 : vector<8x1xf32> to vector<8x32xf32>
    %61 = arith.subf %48, %60 : vector<8x32xf32>
    %cst_39 = arith.constant 9.99999974E-6 : f32
    %62 = vector.broadcast %cst_39 : f32 to vector<8x1xf32>
    %63 = arith.addf %59, %62 : vector<8x1xf32>
    %64 = math.rsqrt %63 : vector<8x1xf32>
    %65 = vector.broadcast %64 : vector<8x1xf32> to vector<8x32xf32>
    %66 = arith.mulf %61, %65 : vector<8x32xf32>
    %c0_40 = arith.constant 0 : index
    %c0_41 = arith.constant 0 : index
    %67 = vector.load %arg6[%c0_40, %c0_41] : memref<1x32xf32, #tpu.memory_space<vmem>>, vector<1x32xf32>
    %68 = vector.broadcast %67 : vector<1x32xf32> to vector<8x32xf32>
    %69 = arith.mulf %66, %68 : vector<8x32xf32>
    %c0_42 = arith.constant 0 : index
    %c0_43 = arith.constant 0 : index
    %70 = vector.load %arg7[%c0_42, %c0_43] : memref<1x32xf32, #tpu.memory_space<vmem>>, vector<1x32xf32>
    %71 = vector.broadcast %70 : vector<1x32xf32> to vector<8x32xf32>
    %72 = arith.addf %69, %71 : vector<8x32xf32>
    %c0_44 = arith.constant 0 : index
    %c0_45 = arith.constant 0 : index
    %73 = vector.load %arg8[%c0_44, %c0_45] : memref<8x32xf32, #tpu.memory_space<vmem>>, vector<8x32xf32>
    tpu.vector_store %arg8[%c0_44, %c0_45], %72 {strides = array<i32>} : memref<8x32xf32, #tpu.memory_space<vmem>>, vector<8x32xf32>,
    return
  }
  func.func @transform_0(%arg0: i32) -> (i32, i32) {
    %c0_i32 = arith.constant 0 : i32
    %c0_i32_0 = arith.constant 0 : i32
    return %arg0, %c0_i32 : i32, i32
  }
  func.func @transform_1(%arg0: i32) -> (i32, i32) {
    %c0_i32 = arith.constant 0 : i32
    %c0_i32_0 = arith.constant 0 : i32
    %c0_i32_1 = arith.constant 0 : i32
    return %c0_i32, %c0_i32_0 : i32, i32
  }
  func.func @transform_2(%arg0: i32) -> (i32, i32) {
    %c0_i32 = arith.constant 0 : i32
    %c0_i32_0 = arith.constant 0 : i32
    %c0_i32_1 = arith.constant 0 : i32
    return %c0_i32, %c0_i32_0 : i32, i32
  }
  func.func @transform_3(%arg0: i32) -> (i32, i32) {
    %c0_i32 = arith.constant 0 : i32
    %c0_i32_0 = arith.constant 0 : i32
    %c0_i32_1 = arith.constant 0 : i32
    return %c0_i32, %c0_i32_0 : i32, i32
  }
  func.func @transform_4(%arg0: i32) -> (i32, i32) {
    %c0_i32 = arith.constant 0 : i32
    %c0_i32_0 = arith.constant 0 : i32
    %c0_i32_1 = arith.constant 0 : i32
    return %c0_i32, %c0_i32_0 : i32, i32
  }
  func.func @transform_5(%arg0: i32) -> (i32, i32) {
    %c0_i32 = arith.constant 0 : i32
    %c0_i32_0 = arith.constant 0 : i32
    %c0_i32_1 = arith.constant 0 : i32
    return %c0_i32, %c0_i32_0 : i32, i32
  }
  func.func @transform_6(%arg0: i32) -> (i32, i32) {
    %c0_i32 = arith.constant 0 : i32
    %c0_i32_0 = arith.constant 0 : i32
    %c0_i32_1 = arith.constant 0 : i32
    return %c0_i32, %c0_i32_0 : i32, i32
  }
  func.func @transform_7(%arg0: i32) -> (i32, i32) {
    %c0_i32 = arith.constant 0 : i32
    %c0_i32_0 = arith.constant 0 : i32
    return %arg0, %c0_i32 : i32, i32
  }
}

module attributes {stable_mosaic.version = 11 : i64} {
  func.func @_linear_res_ln_kernel(%arg0: i32, %arg1: memref<8x32xbf16, #tpu.memory_space<vmem>>, %arg2: memref<32x32xbf16, #tpu.memory_space<vmem>>, %arg3: memref<1x32xf32, #tpu.memory_space<vmem>>, %arg4: memref<8x32xf32, #tpu.memory_space<vmem>>, %arg5: memref<1x32xf32, #tpu.memory_space<vmem>>, %arg6: memref<1x32xf32, #tpu.memory_space<vmem>>, %arg7: memref<8x32xf32, #tpu.memory_space<vmem>>) attributes {dimension_semantics = [#tpu.dimension_semantics<parallel>], iteration_bounds = array<i64: 2>, scalar_prefetch = 0 : i64, scratch_operands = 0 : i64, tpu.core_type = #tpu.core_type<tc>, window_params = [{transform_indices = @transform_0, window_bounds = array<i64: 8, 32>}, {pipeline_mode = #tpu.pipeline_mode<synchronous>, transform_indices = @transform_1, window_bounds = array<i64: 32, 32>}, {pipeline_mode = #tpu.pipeline_mode<synchronous>, transform_indices = @transform_2, window_bounds = array<i64: 1, 32>}, {transform_indices = @transform_3, window_bounds = array<i64: 8, 32>}, {pipeline_mode = #tpu.pipeline_mode<synchronous>, transform_indices = @transform_4, window_bounds = array<i64: 1, 32>}, {pipeline_mode = #tpu.pipeline_mode<synchronous>, transform_indices = @transform_5, window_bounds = array<i64: 1, 32>}, {transform_indices = @transform_6, window_bounds = array<i64: 8, 32>}]} {
    %c0 = arith.constant 0 : index
    %c0_0 = arith.constant 0 : index
    %0 = vector.load %arg1[%c0, %c0_0] : memref<8x32xbf16, #tpu.memory_space<vmem>>, vector<8x32xbf16>
    %c0_1 = arith.constant 0 : index
    %c0_2 = arith.constant 0 : index
    %1 = vector.load %arg2[%c0_1, %c0_2] : memref<32x32xbf16, #tpu.memory_space<vmem>>, vector<32x32xbf16>
    %cst = arith.constant dense<0.000000e+00> : vector<8x32xf32>
    %2 = tpu.matmul %0, %1, %cst {dimension_numbers = #tpu.dot_dimension_numbers<[1], [0], [0], [1], [0, 0, 1, 1], [], []>} : vector<8x32xbf16>, vector<32x32xbf16>, vector<8x32xf32> -> vector<8x32xf32>
    %c0_3 = arith.constant 0 : index
    %c0_4 = arith.constant 0 : index
    %3 = vector.load %arg3[%c0_3, %c0_4] : memref<1x32xf32, #tpu.memory_space<vmem>>, vector<1x32xf32>
    %4 = vector.broadcast %3 : vector<1x32xf32> to vector<8x32xf32>
    %5 = arith.addf %2, %4 : vector<8x32xf32>
    %c0_5 = arith.constant 0 : index
    %c0_6 = arith.constant 0 : index
    %6 = vector.load %arg4[%c0_5, %c0_6] : memref<8x32xf32, #tpu.memory_space<vmem>>, vector<8x32xf32>
    %7 = arith.addf %5, %6 : vector<8x32xf32>
    %cst_7 = arith.constant dense<0.000000e+00> : vector<8xf32>
    %8 = vector.multi_reduction <add>, %7, %cst_7 [1] : vector<8x32xf32> to vector<8xf32>
    %9 = vector.shape_cast %8 : vector<8xf32> to vector<8x1xf32>
    %cst_8 = arith.constant 3.200000e+01 : f32
    %10 = vector.broadcast %cst_8 : f32 to vector<8x1xf32>
    %11 = arith.divf %9, %10 : vector<8x1xf32>
    %12 = vector.broadcast %11 : vector<8x1xf32> to vector<8x32xf32>
    %13 = arith.subf %7, %12 : vector<8x32xf32>
    %14 = arith.mulf %13, %13 : vector<8x32xf32>
    %cst_9 = arith.constant dense<0.000000e+00> : vector<8xf32>
    %15 = vector.multi_reduction <add>, %14, %cst_9 [1] : vector<8x32xf32> to vector<8xf32>
    %16 = vector.shape_cast %15 : vector<8xf32> to vector<8x1xf32>
    %cst_10 = arith.constant 3.200000e+01 : f32
    %17 = vector.broadcast %cst_10 : f32 to vector<8x1xf32>
    %18 = arith.divf %16, %17 : vector<8x1xf32>
    %19 = vector.broadcast %11 : vector<8x1xf32> to vector<8x32xf32>
    %20 = arith.subf %7, %19 : vector<8x32xf32>
    %cst_11 = arith.constant 9.99999974E-6 : f32
    %21 = vector.broadcast %cst_11 : f32 to vector<8x1xf32>
    %22 = arith.addf %18, %21 : vector<8x1xf32>
    %23 = math.rsqrt %22 : vector<8x1xf32>
    %24 = vector.broadcast %23 : vector<8x1xf32> to vector<8x32xf32>
    %25 = arith.mulf %20, %24 : vector<8x32xf32>
    %c0_12 = arith.constant 0 : index
    %c0_13 = arith.constant 0 : index
    %26 = vector.load %arg5[%c0_12, %c0_13] : memref<1x32xf32, #tpu.memory_space<vmem>>, vector<1x32xf32>
    %27 = vector.broadcast %26 : vector<1x32xf32> to vector<8x32xf32>
    %28 = arith.mulf %25, %27 : vector<8x32xf32>
    %c0_14 = arith.constant 0 : index
    %c0_15 = arith.constant 0 : index
    %29 = vector.load %arg6[%c0_14, %c0_15] : memref<1x32xf32, #tpu.memory_space<vmem>>, vector<1x32xf32>
    %30 = vector.broadcast %29 : vector<1x32xf32> to vector<8x32xf32>
    %31 = arith.addf %28, %30 : vector<8x32xf32>
    %c0_16 = arith.constant 0 : index
    %c0_17 = arith.constant 0 : index
    %32 = vector.load %arg7[%c0_16, %c0_17] : memref<8x32xf32, #tpu.memory_space<vmem>>, vector<8x32xf32>
    tpu.vector_store %arg7[%c0_16, %c0_17], %31 {strides = array<i32>} : memref<8x32xf32, #tpu.memory_space<vmem>>, vector<8x32xf32>,
    return
  }
  func.func @transform_0(%arg0: i32) -> (i32, i32) {
    %c0_i32 = arith.constant 0 : i32
    %c0_i32_0 = arith.constant 0 : i32
    return %arg0, %c0_i32 : i32, i32
  }
  func.func @transform_1(%arg0: i32) -> (i32, i32) {
    %c0_i32 = arith.constant 0 : i32
    %c0_i32_0 = arith.constant 0 : i32
    %c0_i32_1 = arith.constant 0 : i32
    return %c0_i32, %c0_i32_0 : i32, i32
  }
  func.func @transform_2(%arg0: i32) -> (i32, i32) {
    %c0_i32 = arith.constant 0 : i32
    %c0_i32_0 = arith.constant 0 : i32
    %c0_i32_1 = arith.constant 0 : i32
    return %c0_i32, %c0_i32_0 : i32, i32
  }
  func.func @transform_3(%arg0: i32) -> (i32, i32) {
    %c0_i32 = arith.constant 0 : i32
    %c0_i32_0 = arith.constant 0 : i32
    return %arg0, %c0_i32 : i32, i32
  }
  func.func @transform_4(%arg0: i32) -> (i32, i32) {
    %c0_i32 = arith.constant 0 : i32
    %c0_i32_0 = arith.constant 0 : i32
    %c0_i32_1 = arith.constant 0 : i32
    return %c0_i32, %c0_i32_0 : i32, i32
  }
  func.func @transform_5(%arg0: i32) -> (i32, i32) {
    %c0_i32 = arith.constant 0 : i32
    %c0_i32_0 = arith.constant 0 : i32
    %c0_i32_1 = arith.constant 0 : i32
    return %c0_i32, %c0_i32_0 : i32, i32
  }
  func.func @transform_6(%arg0: i32) -> (i32, i32) {
    %c0_i32 = arith.constant 0 : i32
    %c0_i32_0 = arith.constant 0 : i32
    return %arg0, %c0_i32 : i32, i32
  }
}

module attributes {stable_mosaic.version = 11 : i64} {
  func.func @_avgpool_kernel(%arg0: i32, %arg1: memref<8x8xf32, #tpu.memory_space<vmem>>, %arg2: memref<8x8x32xf32, #tpu.memory_space<vmem>>, %arg3: memref<8x32xf32, #tpu.memory_space<vmem>>) attributes {dimension_semantics = [#tpu.dimension_semantics<parallel>], iteration_bounds = array<i64: 1>, scalar_prefetch = 0 : i64, scratch_operands = 0 : i64, tpu.core_type = #tpu.core_type<tc>, window_params = [{transform_indices = @transform_0, window_bounds = array<i64: 8, 8>}, {transform_indices = @transform_1, window_bounds = array<i64: 8, 8, 32>}, {transform_indices = @transform_2, window_bounds = array<i64: 8, 32>}]} {
    %c0 = arith.constant 0 : index
    %c0_0 = arith.constant 0 : index
    %0 = vector.load %arg1[%c0, %c0_0] : memref<8x8xf32, #tpu.memory_space<vmem>>, vector<8x8xf32>
    %c0_1 = arith.constant 0 : index
    %c0_2 = arith.constant 0 : index
    %c0_3 = arith.constant 0 : index
    %1 = vector.load %arg2[%c0_1, %c0_2, %c0_3] : memref<8x8x32xf32, #tpu.memory_space<vmem>>, vector<8x8x32xf32>
    %cst = arith.constant dense<0.000000e+00> : vector<8xf32>
    %2 = vector.multi_reduction <add>, %0, %cst [1] : vector<8x8xf32> to vector<8xf32>
    %3 = vector.shape_cast %2 : vector<8xf32> to vector<8x1xf32>
    %4 = vector.shape_cast %0 : vector<8x8xf32> to vector<8x8x1xf32>
    %5 = vector.broadcast %4 : vector<8x8x1xf32> to vector<8x8x32xf32>
    %6 = arith.mulf %1, %5 : vector<8x8x32xf32>
    %cst_4 = arith.constant dense<0.000000e+00> : vector<8x32xf32>
    %7 = vector.multi_reduction <add>, %6, %cst_4 [1] : vector<8x8x32xf32> to vector<8x32xf32>
    %cst_5 = arith.constant 9.99999996E-13 : f32
    %8 = vector.broadcast %cst_5 : f32 to vector<8x1xf32>
    %9 = arith.addf %3, %8 : vector<8x1xf32>
    %10 = tpu.reciprocal %9 {approx = true} : vector<8x1xf32> -> vector<8x1xf32>
    %11 = vector.broadcast %10 : vector<8x1xf32> to vector<8x32xf32>
    %12 = arith.mulf %7, %11 : vector<8x32xf32>
    %c0_6 = arith.constant 0 : index
    %c0_7 = arith.constant 0 : index
    %13 = vector.load %arg3[%c0_6, %c0_7] : memref<8x32xf32, #tpu.memory_space<vmem>>, vector<8x32xf32>
    tpu.vector_store %arg3[%c0_6, %c0_7], %12 {strides = array<i32>} : memref<8x32xf32, #tpu.memory_space<vmem>>, vector<8x32xf32>,
    return
  }
  func.func @transform_0(%arg0: i32) -> (i32, i32) {
    %c0_i32 = arith.constant 0 : i32
    %c0_i32_0 = arith.constant 0 : i32
    return %arg0, %c0_i32 : i32, i32
  }
  func.func @transform_1(%arg0: i32) -> (i32, i32, i32) {
    %c0_i32 = arith.constant 0 : i32
    %c0_i32_0 = arith.constant 0 : i32
    %c0_i32_1 = arith.constant 0 : i32
    return %arg0, %c0_i32, %c0_i32_0 : i32, i32, i32
  }
  func.func @transform_2(%arg0: i32) -> (i32, i32) {
    %c0_i32 = arith.constant 0 : i32
    %c0_i32_0 = arith.constant 0 : i32
    return %arg0, %c0_i32 : i32, i32
  }
}

module attributes {stable_mosaic.version = 11 : i64} {
  func.func @_ffn_ln_kernel(%arg0: i32, %arg1: memref<80x32xf32, #tpu.memory_space<vmem>>, %arg2: memref<32x128xbf16, #tpu.memory_space<vmem>>, %arg3: memref<1x128xf32, #tpu.memory_space<vmem>>, %arg4: memref<128x32xbf16, #tpu.memory_space<vmem>>, %arg5: memref<1x32xf32, #tpu.memory_space<vmem>>, %arg6: memref<1x32xf32, #tpu.memory_space<vmem>>, %arg7: memref<1x32xf32, #tpu.memory_space<vmem>>, %arg8: memref<80x32xf32, #tpu.memory_space<vmem>>) attributes {dimension_semantics = [#tpu.dimension_semantics<parallel>], iteration_bounds = array<i64: 2>, scalar_prefetch = 0 : i64, scratch_operands = 0 : i64, tpu.core_type = #tpu.core_type<tc>, window_params = [{transform_indices = @transform_0, window_bounds = array<i64: 80, 32>}, {pipeline_mode = #tpu.pipeline_mode<synchronous>, transform_indices = @transform_1, window_bounds = array<i64: 32, 128>}, {pipeline_mode = #tpu.pipeline_mode<synchronous>, transform_indices = @transform_2, window_bounds = array<i64: 1, 128>}, {pipeline_mode = #tpu.pipeline_mode<synchronous>, transform_indices = @transform_3, window_bounds = array<i64: 128, 32>}, {pipeline_mode = #tpu.pipeline_mode<synchronous>, transform_indices = @transform_4, window_bounds = array<i64: 1, 32>}, {pipeline_mode = #tpu.pipeline_mode<synchronous>, transform_indices = @transform_5, window_bounds = array<i64: 1, 32>}, {pipeline_mode = #tpu.pipeline_mode<synchronous>, transform_indices = @transform_6, window_bounds = array<i64: 1, 32>}, {transform_indices = @transform_7, window_bounds = array<i64: 80, 32>}]} {
    %c0 = arith.constant 0 : index
    %c0_0 = arith.constant 0 : index
    %0 = vector.load %arg1[%c0, %c0_0] : memref<80x32xf32, #tpu.memory_space<vmem>>, vector<80x32xf32>
    %1 = arith.truncf %0 : vector<80x32xf32> to vector<80x32xbf16>
    %c0_1 = arith.constant 0 : index
    %c0_2 = arith.constant 0 : index
    %2 = vector.load %arg5[%c0_1, %c0_2] : memref<1x32xf32, #tpu.memory_space<vmem>>, vector<1x32xf32>
    %3 = vector.broadcast %2 : vector<1x32xf32> to vector<80x32xf32>
    %4 = arith.addf %0, %3 : vector<80x32xf32>
    %c0_3 = arith.constant 0 : index
    %c0_4 = arith.constant 0 : index
    %5 = vector.load %arg2[%c0_3, %c0_4] : memref<32x128xbf16, #tpu.memory_space<vmem>>, vector<32x128xbf16>
    %c0_5 = arith.constant 0 : index
    %c0_6 = arith.constant 0 : index
    %6 = vector.load %arg3[%c0_5, %c0_6] : memref<1x128xf32, #tpu.memory_space<vmem>>, vector<1x128xf32>
    %c0_7 = arith.constant 0 : index
    %c0_8 = arith.constant 0 : index
    %7 = vector.load %arg4[%c0_7, %c0_8] : memref<128x32xbf16, #tpu.memory_space<vmem>>, vector<128x32xbf16>
    %cst = arith.constant dense<0.000000e+00> : vector<80x128xf32>
    %8 = tpu.matmul %1, %5, %cst {dimension_numbers = #tpu.dot_dimension_numbers<[1], [0], [0], [1], [0, 0, 1, 1], [], []>} : vector<80x32xbf16>, vector<32x128xbf16>, vector<80x128xf32> -> vector<80x128xf32>
    %9 = vector.broadcast %6 : vector<1x128xf32> to vector<80x128xf32>
    %10 = arith.addf %8, %9 : vector<80x128xf32>
    %cst_9 = arith.constant 0.000000e+00 : f32
    %11 = vector.broadcast %cst_9 : f32 to vector<80x128xf32>
    %12 = arith.maximumf %10, %11 : vector<80x128xf32>
    %13 = arith.truncf %12 : vector<80x128xf32> to vector<80x128xbf16>
    %cst_10 = arith.constant dense<0.000000e+00> : vector<80x32xf32>
    %14 = tpu.matmul %13, %7, %cst_10 {dimension_numbers = #tpu.dot_dimension_numbers<[1], [0], [0], [1], [0, 0, 1, 1], [], []>} : vector<80x128xbf16>, vector<128x32xbf16>, vector<80x32xf32> -> vector<80x32xf32>
    %15 = arith.addf %4, %14 : vector<80x32xf32>
    %cst_11 = arith.constant dense<0.000000e+00> : vector<80xf32>
    %16 = vector.multi_reduction <add>, %15, %cst_11 [1] : vector<80x32xf32> to vector<80xf32>
    %17 = vector.shape_cast %16 : vector<80xf32> to vector<80x1xf32>
    %cst_12 = arith.constant 3.200000e+01 : f32
    %18 = vector.broadcast %cst_12 : f32 to vector<80x1xf32>
    %19 = arith.divf %17, %18 : vector<80x1xf32>
    %20 = vector.broadcast %19 : vector<80x1xf32> to vector<80x32xf32>
    %21 = arith.subf %15, %20 : vector<80x32xf32>
    %22 = arith.mulf %21, %21 : vector<80x32xf32>
    %cst_13 = arith.constant dense<0.000000e+00> : vector<80xf32>
    %23 = vector.multi_reduction <add>, %22, %cst_13 [1] : vector<80x32xf32> to vector<80xf32>
    %24 = vector.shape_cast %23 : vector<80xf32> to vector<80x1xf32>
    %cst_14 = arith.constant 3.200000e+01 : f32
    %25 = vector.broadcast %cst_14 : f32 to vector<80x1xf32>
    %26 = arith.divf %24, %25 : vector<80x1xf32>
    %27 = vector.broadcast %19 : vector<80x1xf32> to vector<80x32xf32>
    %28 = arith.subf %15, %27 : vector<80x32xf32>
    %cst_15 = arith.constant 9.99999974E-6 : f32
    %29 = vector.broadcast %cst_15 : f32 to vector<80x1xf32>
    %30 = arith.addf %26, %29 : vector<80x1xf32>
    %31 = math.rsqrt %30 : vector<80x1xf32>
    %32 = vector.broadcast %31 : vector<80x1xf32> to vector<80x32xf32>
    %33 = arith.mulf %28, %32 : vector<80x32xf32>
    %c0_16 = arith.constant 0 : index
    %c0_17 = arith.constant 0 : index
    %34 = vector.load %arg6[%c0_16, %c0_17] : memref<1x32xf32, #tpu.memory_space<vmem>>, vector<1x32xf32>
    %35 = vector.broadcast %34 : vector<1x32xf32> to vector<80x32xf32>
    %36 = arith.mulf %33, %35 : vector<80x32xf32>
    %c0_18 = arith.constant 0 : index
    %c0_19 = arith.constant 0 : index
    %37 = vector.load %arg7[%c0_18, %c0_19] : memref<1x32xf32, #tpu.memory_space<vmem>>, vector<1x32xf32>
    %38 = vector.broadcast %37 : vector<1x32xf32> to vector<80x32xf32>
    %39 = arith.addf %36, %38 : vector<80x32xf32>
    %c0_20 = arith.constant 0 : index
    %c0_21 = arith.constant 0 : index
    %40 = vector.load %arg8[%c0_20, %c0_21] : memref<80x32xf32, #tpu.memory_space<vmem>>, vector<80x32xf32>
    tpu.vector_store %arg8[%c0_20, %c0_21], %39 {strides = array<i32>} : memref<80x32xf32, #tpu.memory_space<vmem>>, vector<80x32xf32>,
    return
  }
  func.func @transform_0(%arg0: i32) -> (i32, i32) {
    %c0_i32 = arith.constant 0 : i32
    %c0_i32_0 = arith.constant 0 : i32
    return %arg0, %c0_i32 : i32, i32
  }
  func.func @transform_1(%arg0: i32) -> (i32, i32) {
    %c0_i32 = arith.constant 0 : i32
    %c0_i32_0 = arith.constant 0 : i32
    %c0_i32_1 = arith.constant 0 : i32
    return %c0_i32, %c0_i32_0 : i32, i32
  }
  func.func @transform_2(%arg0: i32) -> (i32, i32) {
    %c0_i32 = arith.constant 0 : i32
    %c0_i32_0 = arith.constant 0 : i32
    %c0_i32_1 = arith.constant 0 : i32
    return %c0_i32, %c0_i32_0 : i32, i32
  }
  func.func @transform_3(%arg0: i32) -> (i32, i32) {
    %c0_i32 = arith.constant 0 : i32
    %c0_i32_0 = arith.constant 0 : i32
    %c0_i32_1 = arith.constant 0 : i32
    return %c0_i32, %c0_i32_0 : i32, i32
  }
  func.func @transform_4(%arg0: i32) -> (i32, i32) {
    %c0_i32 = arith.constant 0 : i32
    %c0_i32_0 = arith.constant 0 : i32
    %c0_i32_1 = arith.constant 0 : i32
    return %c0_i32, %c0_i32_0 : i32, i32
  }
  func.func @transform_5(%arg0: i32) -> (i32, i32) {
    %c0_i32 = arith.constant 0 : i32
    %c0_i32_0 = arith.constant 0 : i32
    %c0_i32_1 = arith.constant 0 : i32
    return %c0_i32, %c0_i32_0 : i32, i32
  }
  func.func @transform_6(%arg0: i32) -> (i32, i32) {
    %c0_i32 = arith.constant 0 : i32
    %c0_i32_0 = arith.constant 0 : i32
    %c0_i32_1 = arith.constant 0 : i32
    return %c0_i32, %c0_i32_0 : i32, i32
  }
  func.func @transform_7(%arg0: i32) -> (i32, i32) {
    %c0_i32 = arith.constant 0 : i32
    %c0_i32_0 = arith.constant 0 : i32
    return %arg0, %c0_i32 : i32, i32
  }
}

module attributes {stable_mosaic.version = 11 : i64} {
  func.func @_linear_kernel(%arg0: i32, %arg1: memref<8x96xf32, #tpu.memory_space<vmem>>, %arg2: memref<96x128xbf16, #tpu.memory_space<vmem>>, %arg3: memref<1x128xf32, #tpu.memory_space<vmem>>, %arg4: memref<8x128xf32, #tpu.memory_space<vmem>>) attributes {dimension_semantics = [#tpu.dimension_semantics<parallel>], iteration_bounds = array<i64: 1>, scalar_prefetch = 0 : i64, scratch_operands = 0 : i64, tpu.core_type = #tpu.core_type<tc>, window_params = [{transform_indices = @transform_0, window_bounds = array<i64: 8, 96>}, {pipeline_mode = #tpu.pipeline_mode<synchronous>, transform_indices = @transform_1, window_bounds = array<i64: 96, 128>}, {pipeline_mode = #tpu.pipeline_mode<synchronous>, transform_indices = @transform_2, window_bounds = array<i64: 1, 128>}, {transform_indices = @transform_3, window_bounds = array<i64: 8, 128>}]} {
    %c0 = arith.constant 0 : index
    %c0_0 = arith.constant 0 : index
    %0 = vector.load %arg1[%c0, %c0_0] : memref<8x96xf32, #tpu.memory_space<vmem>>, vector<8x96xf32>
    %1 = arith.truncf %0 : vector<8x96xf32> to vector<8x96xbf16>
    %c0_1 = arith.constant 0 : index
    %c0_2 = arith.constant 0 : index
    %2 = vector.load %arg2[%c0_1, %c0_2] : memref<96x128xbf16, #tpu.memory_space<vmem>>, vector<96x128xbf16>
    %cst = arith.constant dense<0.000000e+00> : vector<8x128xf32>
    %3 = tpu.matmul %1, %2, %cst {dimension_numbers = #tpu.dot_dimension_numbers<[1], [0], [0], [1], [0, 0, 1, 1], [], []>} : vector<8x96xbf16>, vector<96x128xbf16>, vector<8x128xf32> -> vector<8x128xf32>
    %c0_3 = arith.constant 0 : index
    %c0_4 = arith.constant 0 : index
    %4 = vector.load %arg3[%c0_3, %c0_4] : memref<1x128xf32, #tpu.memory_space<vmem>>, vector<1x128xf32>
    %5 = vector.broadcast %4 : vector<1x128xf32> to vector<8x128xf32>
    %6 = arith.addf %3, %5 : vector<8x128xf32>
    %7 = math.tanh %6 : vector<8x128xf32>
    %c0_5 = arith.constant 0 : index
    %c0_6 = arith.constant 0 : index
    %8 = vector.load %arg4[%c0_5, %c0_6] : memref<8x128xf32, #tpu.memory_space<vmem>>, vector<8x128xf32>
    tpu.vector_store %arg4[%c0_5, %c0_6], %7 {strides = array<i32>} : memref<8x128xf32, #tpu.memory_space<vmem>>, vector<8x128xf32>,
    return
  }
  func.func @transform_0(%arg0: i32) -> (i32, i32) {
    %c0_i32 = arith.constant 0 : i32
    %c0_i32_0 = arith.constant 0 : i32
    return %arg0, %c0_i32 : i32, i32
  }
  func.func @transform_1(%arg0: i32) -> (i32, i32) {
    %c0_i32 = arith.constant 0 : i32
    %c0_i32_0 = arith.constant 0 : i32
    %c0_i32_1 = arith.constant 0 : i32
    return %c0_i32, %c0_i32_0 : i32, i32
  }
  func.func @transform_2(%arg0: i32) -> (i32, i32) {
    %c0_i32 = arith.constant 0 : i32
    %c0_i32_0 = arith.constant 0 : i32
    %c0_i32_1 = arith.constant 0 : i32
    return %c0_i32, %c0_i32_0 : i32, i32
  }
  func.func @transform_3(%arg0: i32) -> (i32, i32) {
    %c0_i32 = arith.constant 0 : i32
    %c0_i32_0 = arith.constant 0 : i32
    return %arg0, %c0_i32 : i32, i32
  }
}

</mosaic_0001>

<bundles_post_ra>
// kernel: recipe_encoder_forward.19
= control target key start
LH: loop header
LB: loop body
LE: loop exit
PB: predicated region body
PF: predicated region fallthrough
CT: control target
= control target key end

     0   :  { %s1058_s24 = smov 0   ;;  %s1319_s0 = inlined_call_operand.vmem [shape: f32[616,32], index: 0, kind: input, shape index: {}]   ;;  %s1320_s1 = inlined_call_operand.vmem [shape: bf16[32,128], index: 1, kind: input, shape index: {}]   ;;  %s1321_s2 = inlined_call_operand.vmem [shape: f32[1,128], index: 2, kind: input, shape index: {}]   ;;  %s1322_s3 = inlined_call_operand.vmem [shape: bf16[128,32], index: 3, kind: input, shape index: {}]   ;;  %s1323_s4 = inlined_call_operand.vmem [shape: f32[1,32], index: 4, kind: input, shape index: {}]   ;;  %s1324_s5 = inlined_call_operand.vmem [shape: f32[1,32], index: 5, kind: input, shape index: {}]   ;;  %s1325_s6 = inlined_call_operand.vmem [shape: f32[1,32], index: 6, kind: input, shape index: {}]   ;;  %s1326_s7 = inlined_call_operand.vmem [shape: f32[616,32], index: 7, kind: output, shape index: {}]  }
   0x1 LB: > { %s859_s25 = sadd.s32 4294967295, %s1016_s24   ;;  %p863_p0 = scmp.ge.s32.totalorder %s1016_s24, 1  ;;  %s1016_s24 = sphi %s1058_s24, %s17_s24  }
   0x2   : > { %p238_p1 = scmp.lt.s32.totalorder %s1016_s24, 8 }
   0x4   : > { %p239_p2 = pnand %p863_p0, %p238_p1 }
   0x5   : > { %v978_v0 = vld [vmem:[%s1320_s1] sm:$0xff] (!%p239_p2)   ;;  %s270_s28 = smul.u32 (!%p239_p2), 11, %s859_s25  ;;  %v979_v1 = vld [vmem:[%s1320_s1 + $0x8] sm:$0xff] (!%p239_p2)   ;;  %v982_v4 = vld [vmem:[%s1322_s3 + $0x10] sm:$0xff] (!%p239_p2)   ;;  %vm357_vm0 = vcmask (!%p239_p2), 261120  }
   0x6   : > { %242 = sbr.rel (%p239_p2) target bundleno = 791 (0x317), region = 48  ;;  %910 = vmatprep.subr.bf16.mxu0 (!%p239_p2), %v978_v0  ;;  %v980_v2 = vld [vmem:[%s1322_s3] sm:$0xff] (!%p239_p2)   ;;  %v981_v3 = vld [vmem:[%s1322_s3 + $0x8] sm:$0xff] (!%p239_p2)   ;;  %v983_v16 = vld [vmem:[%s1322_s3 + $0x18] sm:$0xff] (!%p239_p2)  }
   0x7   : > { %p271_p3 = scmp.lt.s32.totalorder (!%p239_p2), %s270_s28, 76  ;;  %911 = vmatpush3.bf16.msra.mxu0 (!%p239_p2), %v978_v0  ;;  %954 = vmatprep.subr.bf16.mxu1 (!%p239_p2), %v980_v2  ;;  %v984_v21 = vld [vmem:[%s1322_s3 + $0x20] sm:$0xff] (!%p239_p2)   ;;  %v985_v23 = vld [vmem:[%s1322_s3 + $0x28] sm:$0xff] (!%p239_p2)   ;;  %v986_v25 = vld [vmem:[%s1322_s3 + $0x30] sm:$0xff] (!%p239_p2)  }
   0x8   : > { %912 = vmatprep.subr.bf16.mxu0 (!%p239_p2), %v979_v1  ;;  %962 = vmatpush3.bf16.msra.mxu1 (!%p239_p2), %v980_v2  ;;  %v987_v26 = vld [vmem:[%s1322_s3 + $0x38] sm:$0xff] (!%p239_p2)   ;;  %v867_v27 = vld [vmem:[%s1321_s2] ss:$0 sm:$0xff] (!%p239_p2) }
   0x9   : > { %955 = vmatprep.subr.bf16.mxu1 (!%p239_p2), %v981_v3 }
   0xb   : > { %913 = vmatpush3.bf16.msra.mxu0 (!%p239_p2), %v979_v1 }
   0xc   : > { %926 = vmatprep.subr.bf16.mxu0 (!%p239_p2), %v980_v2  ;;  %963 = vmatpush3.bf16.msra.mxu1 (!%p239_p2), %v981_v3 }
   0xd   : > { %s1328_s28 = smov (!%p271_p3, %s270_s28), 76  ;;  %956 = vmatprep.subr.bf16.mxu1 %v982_v4 }
   0xe   : > { %s864_s12 = sshll.u32 %s1328_s28, 3 }
   0xf   : > { %s1086_s15 = scalar_lea.vmem %s1319_s0, %s864_s12  ;;  %s1261_s18 = scalar_lea.vmem %s1326_s7, %s864_s12 }
  0x10   : > { %v1092_v5 = vld [vmem:[%s1086_s15] sm:$0xff]  ;;  %v1095_v6 = vld [vmem:[%s1086_s15 + $0x8] sm:$0xff]  ;;  %v1098_v7 = vld [vmem:[%s1086_s15 + $0x10] sm:$0xff]  ;;  %964 = vmatpush3.bf16.msra.mxu1 %v982_v4 }
  0x11   : > { %v294_v8 = vpack.c.bf16 %v1095_v6, %v1092_v5  ;;  %v1103_v9 = vld [vmem:[%s1086_s15 + $0x18] sm:$0xff]  ;;  %v1106_v10 = vld [vmem:[%s1086_s15 + $0x20] sm:$0xff]  ;;  %v1109_v11 = vld [vmem:[%s1086_s15 + $0x28] sm:$0xff]  ;;  %957 = vmatprep.subr.bf16.mxu1 %v983_v16 }
  0x12   : > { %v295_v12 = vpack.c.bf16 %v1103_v9, %v1098_v7  ;;  %v296_v13 = vpack.c.bf16 %v1109_v11, %v1106_v10  ;;  %v1119_v14 = vld [vmem:[%s1086_s15 + $0x30] sm:$0xff]  ;;  %v1122_v15 = vld [vmem:[%s1086_s15 + $0x38] sm:$0xff]  ;;  %v1128_v17 = vld [vmem:[%s1086_s15 + $0x40] sm:$0xff] }
  0x13   : > { %914 = vmatprep.mubr.msk.bf16.mxu0 %vm357_vm0, %v294_v8  ;;  %v1131_v18 = vld [vmem:[%s1086_s15 + $0x48] sm:$0xff]  ;;  %v297_v19 = vpack.c.bf16 %v1122_v15, %v1119_v14  ;;  %v1143_v22 = vld [vmem:[%s1086_s15 + $0x50] sm:$0xff] }
  0x14   : > { %915 = vmatmul.mubr.msk.bf16.vlgmr.msra.gmra.mrb[0].mxu0 %vm357_vm0, %v295_v12  ;;  %v298_v20 = vpack.c.bf16 %v1131_v18, %v1128_v17  ;;  %965 = vmatpush3.bf16.msra.mxu1 %v983_v16  ;;  %v299_v24 = vpack.c.bf16 %v1143_v22, %v1143_v22 }
  0x15   : > { %918 = vmatprep.mubr.msk.bf16.mxu0 %vm357_vm0, %v296_v13  ;;  %927 = vmatpush3.bf16.msra.mxu0 %v980_v2 }
  0x16   : > { %928 = vmatprep.subr.bf16.mxu0 %v981_v3  ;;  %958 = vmatprep.subr.bf16.mxu1 %v984_v21 }
  0x18   : > { %966 = vmatpush3.bf16.msra.mxu1 %v984_v21 }
  0x19   : > { %929 = vmatpush3.bf16.msra.mxu0 %v981_v3  ;;  %959 = vmatprep.subr.bf16.mxu1 %v985_v23 }
  0x1a   : > { %930 = vmatprep.subr.bf16.mxu0 %v982_v4 }
  0x1c   : > { %919 = vmatmul.mubr.msk.bf16.gmra.mrb[4].mxu0 %vm357_vm0, %v297_v19  ;;  %967 = vmatpush3.bf16.msra.mxu1 %v985_v23 }
  0x1d   : > { %922 = vmatprep.mubr.msk.bf16.mxu0 %vm357_vm0, %v298_v20  ;;  %931 = vmatpush3.bf16.msra.mxu0 %v982_v4  ;;  %v866_v4 = vld [vmem:[%s1323_s4] ss:$0 sm:$0xff] }
  0x1e   : > { %932 = vmatprep.subr.bf16.mxu0 %v983_v16  ;;  %960 = vmatprep.subr.bf16.mxu1 %v986_v25  ;;  %v309_v8 = vadd.f32 %v866_v4, %v1098_v7  ;;  %v307_v12 = vadd.f32 %v866_v4, %v1092_v5  ;;  %v310_v13 = vadd.f32 %v866_v4, %v1103_v9 }
  0x1f   : > { %v308_v19 = vadd.f32 %v866_v4, %v1095_v6  ;;  %v313_v5 = vadd.f32 %v866_v4, %v1119_v14  ;;  %v314_v9 = vadd.f32 %v866_v4, %v1122_v15 }
  0x20   : > { %968 = vmatpush3.bf16.msra.mxu1 %v986_v25 }
  0x21   : > { %933 = vmatpush3.bf16.msra.mxu0 %v983_v16  ;;  %961 = vmatprep.subr.bf16.mxu1 %v987_v26 }
  0x22   : > { %934 = vmatprep.subr.bf16.mxu0 %v984_v21 }
  0x24   : > { %923 = vmatmul.mubr.msk.bf16.gmra.mrb[8].mxu0 %vm357_vm0, %v299_v24  ;;  %969 = vmatpush3.bf16.msra.mxu1 %v987_v26 }
  0x25   : > { %935 = vmatpush3.bf16.msra.mxu0 %v984_v21 }
  0x26   : > { %936 = vmatprep.subr.bf16.mxu0 %v985_v23 }
  0x29   : > { %937 = vmatpush3.bf16.msra.mxu0 %v985_v23 }
  0x2a   : > { %938 = vmatprep.subr.bf16.mxu0 %v986_v25 }
  0x2d   : > { %939 = vmatpush3.bf16.msra.mxu0 %v986_v25 }
  0x2e   : > { %940 = vmatprep.subr.bf16.mxu0 %v987_v26 }
  0x31   : > { %941 = vmatpush3.bf16.msra.mxu0 %v987_v26 }
  0xe7   : > { %v916_v28 = vpop.f32.mrb[0].mxu0 }
  0xe8   : > { %v419_v29 = vadd.f32 %v916_v28, %v867_v27  ;;  %v410_v30 = vpop.f32.mrb[1].mxu0 }
  0xe9   : > { %v411_v31 = vadd.f32 %v867_v27, %v410_v30  ;;  %v917_v32 = vpop.f32.mrb[2].mxu0  ;;  %v311_v30 = vadd.f32 %v866_v4, %v1106_v10  ;;  %v315_v10 = vadd.f32 %v866_v4, %v1128_v17 }
  0xea   : > { %v422_v33 = vadd.f32 %v917_v32, %v867_v27  ;;  %v413_v34 = vpop.f32.mrb[3].mxu0  ;;  %v458_v36 = vmax.f32 %v419_v29, 0.0 }
  0xeb   : > { %v414_v35 = vadd.f32 %v867_v27, %v413_v34  ;;  %v456_v38 = vmax.f32 %v411_v31, 0.0  ;;  %v312_v34 = vadd.f32 %v866_v4, %v1109_v11  ;;  %v316_v11 = vadd.f32 %v866_v4, %v1131_v18 }
  0xec   : > { %v459_v37 = vmax.f32 %v422_v33, 0.0 }
  0xed   : > { %v457_v39 = vmax.f32 %v414_v35, 0.0 }
  0xee   : > { %v468_v40 = vpack.c.bf16 %v459_v37, %v458_v36 }
  0xef   : > { %v467_v41 = vpack.c.bf16 %v457_v39, %v456_v38  ;;  %v920_v42 = vpop.f32.mrb[4].mxu0 }
  0xf0   : > { %v435_v43 = vadd.f32 %v920_v42, %v867_v27  ;;  %v426_v44 = vpop.f32.mrb[5].mxu0 }
  0xf1   : > { %v427_v45 = vadd.f32 %v867_v27, %v426_v44  ;;  %v921_v46 = vpop.f32.mrb[6].mxu0  ;;  %942 = vmatprep.mubr.bf16.mxu0 %v467_v41 }
  0xf2   : > { %v438_v47 = vadd.f32 %v921_v46, %v867_v27  ;;  %v429_v48 = vpop.f32.mrb[7].mxu0  ;;  %943 = vmatmul.mubr.bf16.vlgmr.msra.gmra.mrb[12].mxu0 %v468_v40  ;;  %v462_v50 = vmax.f32 %v435_v43, 0.0  ;;  %v317_v40 = vadd.f32 %v866_v4, %v1143_v22 }
  0xf3   : > { %v430_v49 = vadd.f32 %v867_v27, %v429_v48  ;;  %v460_v52 = vmax.f32 %v427_v45, 0.0 }
  0xf4   : > { %v463_v51 = vmax.f32 %v438_v47, 0.0 }
  0xf5   : > { %v461_v53 = vmax.f32 %v430_v49, 0.0 }
  0xf6   : > { %v470_v54 = vpack.c.bf16 %v463_v51, %v462_v50 }
  0xf7   : > { %v924_v55 = vpop.f32.mrb[8].mxu0  ;;  %v469_v56 = vpack.c.bf16 %v461_v53, %v460_v52 }
  0xf8   : > { %v451_v57 = vadd.f32 %v924_v55, %v867_v27  ;;  %v442_v58 = vpop.f32.mrb[9].mxu0 }
  0xf9   : > { %v443_v59 = vadd.f32 %v867_v27, %v442_v58  ;;  %v925_v60 = vpop.f32.mrb[10].mxu0  ;;  %946 = vmatprep.mubr.bf16.mxu1 %v469_v56 }
  0xfa   : > { %v445_v61 = vpop.f32.mrb[11].mxu0  ;;  %947 = vmatmul.mubr.bf16.vlgmr.msra.gmra.mrb[0].mxu1 %v470_v54  ;;  %v466_v63 = vmax.f32 %v451_v57, 0.0 }
  0xfb   : > { %v446_v62 = vadd.f32 %v867_v27, %v445_v61  ;;  %v464_v0 = vmax.f32 %v443_v59, 0.0 }
  0xfc   : > { %v472_v3 = vpack.c.bf16 %v466_v63, %v466_v63 }
  0xfd   : > { %v465_v1 = vmax.f32 %v446_v62, 0.0 }
  0xff   : > { %v471_v2 = vpack.c.bf16 %v465_v1, %v464_v0 }
 0x101   : > { %950 = vmatprep.mubr.bf16.mxu1 %v471_v2 }
 0x102   : > { %951 = vmatmul.mubr.bf16.gmra.mrb[4].mxu1 %v472_v3 }
 0x1c5   : > { %v944_v16 = vpop.f32.mrb[12].mxu0 }
 0x1c6   : > { %v603_v20 = vadd.f32 %v944_v16, %v309_v8  ;;  %v555_v21 = vpop.f32.mrb[13].mxu0 }
 0x1c7   : > { %v601_v23 = vadd.f32 %v555_v21, %v307_v12  ;;  %v945_v24 = vpop.f32.mrb[14].mxu0 }
 0x1c8   : > { %v604_v25 = vadd.f32 %v945_v24, %v310_v13  ;;  %v558_v26 = vpop.f32.mrb[15].mxu0  ;;  %v618_v27 = vsel %vm357_vm0, %v603_v20, 0.0 }
 0x1c9   : > { %v602_v28 = vadd.f32 %v558_v26, %v308_v19  ;;  %619 = vadd.xlane.f32.xlu1 %v618_v27  ;;  %v612_v29 = vsel %vm357_vm0, %v601_v23, 0.0 }
 0x1ca   : > { %613 = vadd.xlane.f32.xlu0 %v612_v29  ;;  %v621_v7 = vsel %vm357_vm0, %v604_v25, 0.0 }
 0x1cb   : > { %v615_v31 = vsel %vm357_vm0, %v602_v28, 0.0 }
 0x1cd   : > { %v948_v6 = vpop.f32.mrb[0].mxu1  ;;  %622 = vadd.xlane.f32.xlu1 %v621_v7 }
 0x1ce   : > { %v607_v32 = vadd.f32 %v948_v6, %v313_v5  ;;  %v571_v33 = vpop.f32.mrb[1].mxu1  ;;  %616 = vadd.xlane.f32.xlu0 %v615_v31 }
 0x1cf   : > { %v949_v35 = vpop.f32.mrb[2].mxu1  ;;  %v605_v38 = vadd.f32 %v571_v33, %v311_v30 }
 0x1d0   : > { %v608_v36 = vadd.f32 %v949_v35, %v314_v9  ;;  %v574_v37 = vpop.f32.mrb[3].mxu1  ;;  %v630_v14 = vsel %vm357_vm0, %v607_v32, 0.0 }
 0x1d1   : > { %v606_v39 = vadd.f32 %v574_v37, %v312_v34  ;;  %v624_v42 = vsel %vm357_vm0, %v605_v38, 0.0 }
 0x1d2   : > { %631 = vadd.xlane.f32.xlu0 %v630_v14  ;;  %v633_v15 = vsel %vm357_vm0, %v608_v36, 0.0 }
 0x1d3   : > { %634 = vadd.xlane.f32.xlu1 %v633_v15  ;;  %v627_v44 = vsel %vm357_vm0, %v606_v39, 0.0 }
 0x1d5   : > { %v952_v41 = vpop.f32.mrb[4].mxu1 }
 0x1d6   : > { %v587_v43 = vpop.f32.mrb[5].mxu1  ;;  %625 = vadd.xlane.f32.xlu0 %v624_v42  ;;  %v1182_v48 = vadd.f32 %v952_v41, %v317_v40 }
 0x1d7   : > { %v609_v45 = vadd.f32 %v587_v43, %v315_v10  ;;  %v953_v46 = vpop.f32.mrb[6].mxu1  ;;  %628 = vadd.xlane.f32.xlu1 %v627_v44 }
 0x1d8   : > { %v590_v47 = vpop.f32.mrb[7].mxu1  ;;  %v642_v18 = vsel %vm357_vm0, %v1182_v48, 0.0 }
 0x1d9   : > { %v610_v49 = vadd.f32 %v590_v47, %v316_v11  ;;  %v636_v17 = vsel %vm357_vm0, %v609_v45, 0.0 }
 0x1da   : > { %637 = vadd.xlane.f32.xlu0 %v636_v17 }
 0x1db   : > { %v639_v22 = vsel %vm357_vm0, %v610_v49, 0.0 }
 0x1dc   : > { %640 = vadd.xlane.f32.xlu1 %v639_v22 }
 0x1de   : > { %643 = vadd.xlane.f32.xlu0 %v642_v18 }
 0x256   : > { %v620_v50 = vpop.xlane.xlu1 %619 }
 0x257   : > { %v648_v51 = vmul.f32 0.03125, %v620_v50  ;;  %v614_v52 = vpop.xlane.xlu0 %613 }
 0x258   : > { %v646_v53 = vmul.f32 0.03125, %v614_v52 }
 0x259   : > { %v1188_v54 = vsub.f32 %v603_v20, %v648_v51 }
 0x25a   : > { %v1190_v55 = vsub.f32 %v601_v23, %v646_v53  ;;  %v623_v56 = vpop.xlane.xlu1 %622 }
 0x25b   : > { %v649_v57 = vmul.f32 0.03125, %v623_v56  ;;  %v617_v58 = vpop.xlane.xlu0 %616  ;;  %v670_v59 = vmul.f32 %v1188_v54, %v1188_v54 }
 0x25c   : > { %v647_v60 = vmul.f32 0.03125, %v617_v58  ;;  %v668_v63 = vmul.f32 %v1190_v55, %v1190_v55 }
 0x25d   : > { %v1194_v61 = vsub.f32 %v604_v25, %v649_v57  ;;  %v685_v62 = vsel %vm357_vm0, %v670_v59, 0.0 }
 0x25e   : > { %v1199_v0 = vsub.f32 %v602_v28, %v647_v60  ;;  %686 = vadd.xlane.f32.xlu1 %v685_v62  ;;  %v679_v12 = vsel %vm357_vm0, %v668_v63, 0.0 }
 0x25f   : > { %v632_v1 = vpop.xlane.xlu0 %631  ;;  %v671_v2 = vmul.f32 %v1194_v61, %v1194_v61 }
 0x260   : > { %v652_v3 = vmul.f32 0.03125, %v632_v1  ;;  %v635_v4 = vpop.xlane.xlu1 %634  ;;  %v669_v16 = vmul.f32 %v1199_v0, %v1199_v0  ;;  %v1247_v1 = vld [vmem:[%s1324_s5] ss:$0 sm:$0xff] }
 0x261   : > { %v653_v8 = vmul.f32 0.03125, %v635_v4  ;;  %v688_v13 = vsel %vm357_vm0, %v671_v2, 0.0 }
 0x262   : > { %v1207_v19 = vsub.f32 %v607_v32, %v652_v3  ;;  %680 = vadd.xlane.f32.xlu1 %v679_v12  ;;  %689 = vadd.xlane.f32.xlu0 %v688_v13  ;;  %v682_v27 = vsel %vm357_vm0, %v669_v16, 0.0  ;;  %v1253_v12 = vld [vmem:[%s1325_s6] ss:$0 sm:$0xff] }
 0x263   : > { %v1209_v20 = vsub.f32 %v608_v36, %v653_v8  ;;  %v626_v21 = vpop.xlane.xlu0 %625 }
 0x264   : > { %v650_v23 = vmul.f32 0.03125, %v626_v21  ;;  %v629_v24 = vpop.xlane.xlu1 %628  ;;  %v674_v25 = vmul.f32 %v1207_v19, %v1207_v19 }
 0x265   : > { %v651_v26 = vmul.f32 0.03125, %v629_v24  ;;  %v675_v28 = vmul.f32 %v1209_v20, %v1209_v20 }
 0x266   : > { %v1216_v29 = vsub.f32 %v605_v38, %v650_v23  ;;  %683 = vadd.xlane.f32.xlu0 %v682_v27  ;;  %v697_v5 = vsel %vm357_vm0, %v674_v25, 0.0 }
 0x267   : > { %v1219_v7 = vsub.f32 %v606_v39, %v651_v26  ;;  %698 = vadd.xlane.f32.xlu1 %v697_v5  ;;  %v638_v9 = vpop.xlane.xlu0 %637  ;;  %v700_v32 = vsel %vm357_vm0, %v675_v28, 0.0 }
 0x268   : > { %v654_v6 = vmul.f32 0.03125, %v638_v9  ;;  %v672_v30 = vmul.f32 %v1216_v29, %v1216_v29 }
 0x269   : > { %v641_v31 = vpop.xlane.xlu1 %640  ;;  %v673_v33 = vmul.f32 %v1219_v7, %v1219_v7 }
 0x26a   : > { %v1226_v34 = vsub.f32 %v609_v45, %v654_v6  ;;  %v655_v35 = vmul.f32 0.03125, %v641_v31  ;;  %701 = vadd.xlane.f32.xlu0 %v700_v32  ;;  %v691_v36 = vsel %vm357_vm0, %v672_v30, 0.0 }
 0x26b   : > { %692 = vadd.xlane.f32.xlu1 %v691_v36  ;;  %v644_v37 = vpop.xlane.xlu0 %643  ;;  %v694_v15 = vsel %vm357_vm0, %v673_v33, 0.0 }
 0x26c   : > { %v1229_v14 = vsub.f32 %v610_v49, %v655_v35  ;;  %v656_v38 = vmul.f32 0.03125, %v644_v37  ;;  %v676_v39 = vmul.f32 %v1226_v34, %v1226_v34 }
 0x26e   : > { %v1235_v10 = vsub.f32 %v1182_v48, %v656_v38  ;;  %695 = vadd.xlane.f32.xlu0 %v694_v15  ;;  %v703_v40 = vsel %vm357_vm0, %v676_v39, 0.0  ;;  %v677_v41 = vmul.f32 %v1229_v14, %v1229_v14 }
 0x26f   : > { %704 = vadd.xlane.f32.xlu1 %v703_v40 }
 0x270   : > { %v706_v42 = vsel %vm357_vm0, %v677_v41, 0.0  ;;  %v678_v11 = vmul.f32 %v1235_v10, %v1235_v10 }
 0x272   : > { %707 = vadd.xlane.f32.xlu0 %v706_v42  ;;  %v709_v43 = vsel %vm357_vm0, %v678_v11, 0.0 }
 0x273   : > { %710 = vadd.xlane.f32.xlu1 %v709_v43 }
 0x2eb   : > { %v687_v44 = vpop.xlane.xlu1 %686 }
 0x2ec   : > { %v714_v45 = vmul.f32 0.03125, %v687_v44 }
 0x2ee   : > { %v725_v46 = vadd.f32 1e-05, %v714_v45 }
 0x2ef   : > { %v681_v47 = vpop.xlane.xlu1 %680  ;;  %v690_v48 = vpop.xlane.xlu0 %689 }
 0x2f0   : > { %988 = vrsqrt.f32 %v725_v46  ;;  %v712_v49 = vmul.f32 0.03125, %v681_v47  ;;  %v715_v17 = vmul.f32 0.03125, %v690_v48 }
 0x2f2   : > { %v723_v22 = vadd.f32 1e-05, %v712_v49  ;;  %v726_v18 = vadd.f32 1e-05, %v715_v17 }
 0x2f3   : > { %v684_v50 = vpop.xlane.xlu0 %683 }
 0x2f4   : > { %990 = vrsqrt.f32 %v723_v22  ;;  %v713_v51 = vmul.f32 0.03125, %v684_v50  ;;  %v699_v52 = vpop.xlane.xlu1 %698 }
 0x2f5   : > { %992 = vrsqrt.f32 %v726_v18  ;;  %v718_v53 = vmul.f32 0.03125, %v699_v52 }
 0x2f6   : > { %v724_v56 = vadd.f32 1e-05, %v713_v51 }
 0x2f7   : > { %v729_v57 = vadd.f32 1e-05, %v718_v53  ;;  %v702_v58 = vpop.xlane.xlu0 %701 }
 0x2f8   : > { %994 = vrsqrt.f32 %v724_v56  ;;  %v719_v59 = vmul.f32 0.03125, %v702_v58  ;;  %v693_v60 = vpop.xlane.xlu1 %692 }
 0x2f9   : > { %996 = vrsqrt.f32 %v729_v57  ;;  %v716_v62 = vmul.f32 0.03125, %v693_v60 }
 0x2fa   : > { %v989_v63 = vpop.eup %988  ;;  %v730_v2 = vadd.f32 1e-05, %v719_v59 }
 0x2fb   : > { %v747_v3 = vmul.f32 %v989_v63, %v1188_v54  ;;  %v727_v4 = vadd.f32 1e-05, %v716_v62  ;;  %v696_v8 = vpop.xlane.xlu0 %695 }
 0x2fc   : > { %998 = vrsqrt.f32 %v730_v2  ;;  %v717_v13 = vmul.f32 0.03125, %v696_v8  ;;  %v705_v16 = vpop.xlane.xlu1 %704 }
 0x2fd   : > { %v765_v21 = vmul.f32 %v1247_v1, %v747_v3  ;;  %1000 = vrsqrt.f32 %v727_v4  ;;  %v720_v23 = vmul.f32 0.03125, %v705_v16 }
 0x2fe   : > { %v991_v24 = vpop.eup %990  ;;  %v728_v54 = vadd.f32 1e-05, %v717_v13 }
 0x2ff   : > { %v993_v25 = vpop.eup %992  ;;  %v783_v26 = vadd.f32 %v1253_v12, %v765_v21  ;;  %v745_v27 = vmul.f32 %v991_v24, %v1190_v55  ;;  %v731_v28 = vadd.f32 1e-05, %v720_v23  ;;  %v708_v5 = vpop.xlane.xlu0 %707 }
 0x300   : > { %v748_v9 = vmul.f32 %v993_v25, %v1194_v61  ;;  %1002 = vrsqrt.f32 %v728_v54  ;;  %v721_v6 = vmul.f32 0.03125, %v708_v5  ;;  %v711_v30 = vpop.xlane.xlu1 %710 }
 0x301   : > { %794 = vst.msk [vmem:[%s1261_s18 + $0x10] sm:$0xff] %vm357_vm0, %v783_v26  ;;  %v763_v31 = vmul.f32 %v1247_v1, %v745_v27  ;;  %1004 = vrsqrt.f32 %v731_v28  ;;  %v722_v32 = vmul.f32 0.03125, %v711_v30 }
 0x302   : > { %v995_v33 = vpop.eup %994  ;;  %v766_v35 = vmul.f32 %v1247_v1, %v748_v9  ;;  %v732_v36 = vadd.f32 1e-05, %v721_v6 }
 0x303   : > { %v997_v55 = vpop.eup %996  ;;  %v781_v37 = vadd.f32 %v1253_v12, %v763_v31  ;;  %v746_v61 = vmul.f32 %v995_v33, %v1199_v0  ;;  %v733_v38 = vadd.f32 1e-05, %v722_v32 }
 0x304   : > { %v784_v39 = vadd.f32 %v1253_v12, %v766_v35  ;;  %v751_v15 = vmul.f32 %v997_v55, %v1207_v19  ;;  %1006 = vrsqrt.f32 %v732_v36 }
 0x305   : > { %792 = vst.msk [vmem:[%s1261_s18] sm:$0xff] %vm357_vm0, %v781_v37  ;;  %v764_v40 = vmul.f32 %v1247_v1, %v746_v61  ;;  %1008 = vrsqrt.f32 %v733_v38 }
 0x306   : > { %v999_v41 = vpop.eup %998  ;;  %795 = vst.msk [vmem:[%s1261_s18 + $0x18] sm:$0xff] %vm357_vm0, %v784_v39  ;;  %v769_v42 = vmul.f32 %v1247_v1, %v751_v15 }
 0x307   : > { %v1001_v0 = vpop.eup %1000  ;;  %v782_v11 = vadd.f32 %v1253_v12, %v764_v40  ;;  %v752_v43 = vmul.f32 %v999_v41, %v1209_v20 }
 0x308   : > { %v787_v19 = vadd.f32 %v1253_v12, %v769_v42  ;;  %v749_v44 = vmul.f32 %v1001_v0, %v1216_v29 }
 0x309   : > { %793 = vst.msk [vmem:[%s1261_s18 + $0x8] sm:$0xff] %vm357_vm0, %v782_v11  ;;  %v770_v45 = vmul.f32 %v1247_v1, %v752_v43 }
 0x30a   : > { %v1003_v46 = vpop.eup %1002  ;;  %798 = vst.msk [vmem:[%s1261_s18 + $0x30] sm:$0xff] %vm357_vm0, %v787_v19  ;;  %v767_v47 = vmul.f32 %v1247_v1, %v749_v44 }
 0x30b   : > { %v1005_v48 = vpop.eup %1004  ;;  %v788_v49 = vadd.f32 %v1253_v12, %v770_v45  ;;  %v750_v20 = vmul.f32 %v1003_v46, %v1219_v7 }
 0x30c   : > { %v785_v17 = vadd.f32 %v1253_v12, %v767_v47  ;;  %v753_v29 = vmul.f32 %v1005_v48, %v1226_v34 }
 0x30d   : > { %799 = vst.msk [vmem:[%s1261_s18 + $0x38] sm:$0xff] %vm357_vm0, %v788_v49  ;;  %v768_v22 = vmul.f32 %v1247_v1, %v750_v20 }
 0x30e   : > { %v1007_v18 = vpop.eup %1006  ;;  %796 = vst.msk [vmem:[%s1261_s18 + $0x20] sm:$0xff] %vm357_vm0, %v785_v17  ;;  %v771_v50 = vmul.f32 %v1247_v1, %v753_v29 }
 0x30f   : > { %v1009_v51 = vpop.eup %1008  ;;  %v786_v52 = vadd.f32 %v1253_v12, %v768_v22  ;;  %v754_v7 = vmul.f32 %v1007_v18, %v1229_v14 }
 0x310   : > { %v789_v53 = vadd.f32 %v1253_v12, %v771_v50  ;;  %v755_v34 = vmul.f32 %v1009_v51, %v1235_v10 }
 0x311   : > { %797 = vst.msk [vmem:[%s1261_s18 + $0x28] sm:$0xff] %vm357_vm0, %v786_v52  ;;  %v772_v56 = vmul.f32 %v1247_v1, %v754_v7 }
 0x312   : > { %800 = vst.msk [vmem:[%s1261_s18 + $0x40] sm:$0xff] %vm357_vm0, %v789_v53  ;;  %v773_v57 = vmul.f32 %v1247_v1, %v755_v34 }
 0x313   : > { %v790_v58 = vadd.f32 %v1253_v12, %v772_v56 }
 0x314   : > { %v791_v59 = vadd.f32 %v1253_v12, %v773_v57 }
 0x315   : > { %801 = vst.msk [vmem:[%s1261_s18 + $0x48] sm:$0xff] %vm357_vm0, %v790_v58 }
 0x316   : > { %802 = vst.msk [vmem:[%s1261_s18 + $0x50] sm:$0xff] %vm357_vm0, %v791_v59 }
 0x317 PF: > { %s17_s24 = sadd.s32 1, %s1016_s24  }
 0x318   : > { %p14_p4 = scmp.ge.s32.totalorder %s17_s24, 9  }
 0x31a   :  { %16 = sbr.rel (!%p14_p4) target bundleno = 1 (0x1), region = 78 }

// kernel: recipe_encoder_forward.20
= control target key start
LH: loop header
LB: loop body
LE: loop exit
PB: predicated region body
PF: predicated region fallthrough
CT: control target
= control target key end

     0   :  { %vm92_vm0 = vcmask 629760   ;;  %v96_v0 = vlaneseq  ;;  %vm520_vm1 = vcmask 261120   ;;  %vm538_vm2 = vcmask 258048   ;;  %s1256_s0 = inlined_call_operand.vmem [shape: f32[8,77], index: 0, kind: input, shape index: {}]   ;;  %s1257_s1 = inlined_call_operand.vmem [shape: f32[8,77,32], index: 1, kind: input, shape index: {}]   ;;  %s1258_s2 = inlined_call_operand.vmem [shape: f32[8,32], index: 2, kind: output, shape index: {}]  }
   0x1   :  { %v11_v1 = vld [vmem:[%s1256_s0] sm:$0xff]  ;;  %v13_v26 = vld [vmem:[%s1257_s1 + $0x8] sm:$0xff]  ;;  %v14_v28 = vld [vmem:[%s1257_s1 + $0x10] sm:$0xff]  ;;  %vm757_vm3 = vcmask 1041409   ;;  %vm760_vm4 = vcmask 1042434   ;;  %vm763_vm5 = vcmask 1043459  }
   0x2   :  { %v93_v2 = vsel %vm92_vm0, %v11_v1, 0.0  ;;  %v97_v3 = vshrl.u32 %v96_v0, 7  ;;  %v12_v30 = vld [vmem:[%s1257_s1] sm:$0xff]  ;;  %v15_v32 = vld [vmem:[%s1257_s1 + $0x18] sm:$0xff]  ;;  %v17_v41 = vld [vmem:[%s1257_s1 + $0x28] sm:$0xff]  ;;  %vm766_vm6 = vcmask 1044484  }
   0x3   :  { %94 = vadd.xlane.f32.xlu0 %v93_v2  ;;  %v16_v36 = vld [vmem:[%s1257_s1 + $0x20] sm:$0xff]  ;;  %v23_v44 = vld [vmem:[%s1257_s1 + $0x58] sm:$0xff]  ;;  %v18_v47 = vld [vmem:[%s1257_s1 + $0x30] sm:$0xff]  ;;  %vm769_vm7 = vcmask 1045509   ;;  %vm772_vm8 = vcmask 1046534   ;;  %vm775_vm9 = vcmask 1047559  }
   0x4   :  { %v98_v4 = vsub.s32 0, %v97_v3  ;;  %v227_v5 = vsub.s32 3, %v97_v3  ;;  %v270_v6 = vsub.s32 4, %v97_v3  ;;  %v313_v7 = vsub.s32 5, %v97_v3  ;;  %v22_v50 = vld [vmem:[%s1257_s1 + $0x50] sm:$0xff]  ;;  %v19_v53 = vld [vmem:[%s1257_s1 + $0x38] sm:$0xff] }
   0x5   :  { %v356_v8 = vsub.s32 6, %v97_v3  ;;  %v399_v9 = vsub.s32 7, %v97_v3  ;;  %v141_v16 = vsub.s32 1, %v97_v3  ;;  %v184_v18 = vsub.s32 2, %v97_v3  ;;  %v25_v57 = vld [vmem:[%s1257_s1 + $0x68] sm:$0xff]  ;;  %v20_v0 = vld [vmem:[%s1257_s1 + $0x40] sm:$0xff] }
   0x6   :  { %v99_v10 = vrot.slane %v11_v1, %v98_v4  ;;  %v803_v11 = vrot.slane %v11_v1, %v227_v5  ;;  %v805_v12 = vrot.slane %v11_v1, %v270_v6  ;;  %v807_v13 = vrot.slane %v11_v1, %v313_v7  ;;  %v24_v2 = vld [vmem:[%s1257_s1 + $0x60] sm:$0xff]  ;;  %v21_v6 = vld [vmem:[%s1257_s1 + $0x48] sm:$0x1f] }
   0x7   :  { %v809_v14 = vrot.slane %v11_v1, %v356_v8  ;;  %v811_v15 = vrot.slane %v11_v1, %v399_v9  ;;  %v142_v17 = vrot.slane %v11_v1, %v141_v16  ;;  %v185_v19 = vrot.slane %v11_v1, %v184_v18 }
   0x8   :  { %105 = vbcast.lane.b32.xlu1 %v99_v10, 264 }
   0xc   :  { %109 = vbcast.lane.b32.xlu1 %v99_v10, 272 }
  0x10   :  { %113 = vbcast.lane.b32.xlu1 %v99_v10, 280 }
  0x14   :  { %117 = vbcast.lane.b32.xlu1 %v99_v10, 288 }
  0x18   :  { %121 = vbcast.lane.b32.xlu1 %v99_v10, 296 }
  0x19   :  { %101 = vbcast.lane.b32.xlu0 %v99_v10, 256 }
  0x1c   :  { %125 = vbcast.lane.b32.xlu1 %v99_v10, 304 }
  0x1d   :  { %133 = vbcast.lane.b32.xlu0 %v99_v10, 320 }
  0x20   :  { %129 = vbcast.lane.b32.xlu1 %v99_v10, 312 }
  0x21   :  { %144 = vbcast.lane.b32.xlu0 %v142_v17, 256 }
  0x24   :  { %137 = vbcast.lane.b32.xlu1 %v99_v10, 328  ;;  %v27_v10 = vld [vmem:[%s1257_s1 + $0x78] sm:$0xff] }
  0x25   :  { %152 = vbcast.lane.b32.xlu0 %v142_v17, 272 }
  0x28   :  { %148 = vbcast.lane.b32.xlu1 %v142_v17, 264 }
  0x29   :  { %160 = vbcast.lane.b32.xlu0 %v142_v17, 288 }
  0x2c   :  { %156 = vbcast.lane.b32.xlu1 %v142_v17, 280 }
  0x2d   :  { %168 = vbcast.lane.b32.xlu0 %v142_v17, 304 }
  0x30   :  { %164 = vbcast.lane.b32.xlu1 %v142_v17, 296 }
  0x31   :  { %176 = vbcast.lane.b32.xlu0 %v142_v17, 320 }
  0x34   :  { %172 = vbcast.lane.b32.xlu1 %v142_v17, 312 }
  0x35   :  { %187 = vbcast.lane.b32.xlu0 %v185_v19, 256 }
  0x38   :  { %180 = vbcast.lane.b32.xlu1 %v142_v17, 328 }
  0x39   :  { %195 = vbcast.lane.b32.xlu0 %v185_v19, 272 }
  0x3c   :  { %191 = vbcast.lane.b32.xlu1 %v185_v19, 264 }
  0x3d   :  { %203 = vbcast.lane.b32.xlu0 %v185_v19, 288 }
  0x40   :  { %199 = vbcast.lane.b32.xlu1 %v185_v19, 280 }
  0x41   :  { %211 = vbcast.lane.b32.xlu0 %v185_v19, 304 }
  0x44   :  { %207 = vbcast.lane.b32.xlu1 %v185_v19, 296 }
  0x45   :  { %219 = vbcast.lane.b32.xlu0 %v185_v19, 320 }
  0x48   :  { %215 = vbcast.lane.b32.xlu1 %v185_v19, 312 }
  0x49   :  { %230 = vbcast.lane.b32.xlu0 %v803_v11, 256 }
  0x4c   :  { %223 = vbcast.lane.b32.xlu1 %v185_v19, 328 }
  0x4d   :  { %273 = vbcast.lane.b32.xlu0 %v805_v12, 256 }
  0x50   :  { %234 = vbcast.lane.b32.xlu1 %v803_v11, 264 }
  0x51   :  { %238 = vbcast.lane.b32.xlu0 %v803_v11, 272 }
  0x54   :  { %277 = vbcast.lane.b32.xlu1 %v805_v12, 264 }
  0x55   :  { %320 = vbcast.lane.b32.xlu0 %v807_v13, 264 }
  0x58   :  { %316 = vbcast.lane.b32.xlu1 %v807_v13, 256 }
  0x59   :  { %359 = vbcast.lane.b32.xlu0 %v809_v14, 256 }
  0x5c   :  { %281 = vbcast.lane.b32.xlu1 %v805_v12, 272 }
  0x5d   :  { %242 = vbcast.lane.b32.xlu0 %v803_v11, 280 }
  0x60   :  { %363 = vbcast.lane.b32.xlu1 %v809_v14, 264 }
  0x61   :  { %402 = vbcast.lane.b32.xlu0 %v811_v15, 256 }
  0x64   :  { %324 = vbcast.lane.b32.xlu1 %v807_v13, 272 }
  0x65   :  { %285 = vbcast.lane.b32.xlu0 %v805_v12, 280 }
  0x68   :  { %406 = vbcast.lane.b32.xlu1 %v811_v15, 264 }
  0x69   :  { %246 = vbcast.lane.b32.xlu0 %v803_v11, 288 }
  0x6c   :  { %367 = vbcast.lane.b32.xlu1 %v809_v14, 272 }
  0x6d   :  { %410 = vbcast.lane.b32.xlu0 %v811_v15, 272 }
  0x70   :  { %328 = vbcast.lane.b32.xlu1 %v807_v13, 280 }
  0x71   :  { %371 = vbcast.lane.b32.xlu0 %v809_v14, 280 }
  0x74   :  { %289 = vbcast.lane.b32.xlu1 %v805_v12, 288 }
  0x75   :  { %332 = vbcast.lane.b32.xlu0 %v807_v13, 288 }
  0x78   :  { %250 = vbcast.lane.b32.xlu1 %v803_v11, 296 }
  0x79   :  { %293 = vbcast.lane.b32.xlu0 %v805_v12, 296 }
  0x7a   :  { %v106_v20 = vpop.permute.xlu1 %105 }
  0x7b   :  { %v441_v31 = vmul.f32 %v106_v20, %v13_v26 }
  0x7c   :  { %414 = vbcast.lane.b32.xlu1 %v811_v15, 280 }
  0x7d   :  { %254 = vbcast.lane.b32.xlu0 %v803_v11, 304  ;;  %v522_v38 = vsel %vm520_vm1, %v441_v31, 0.0 }
  0x7e   :  { %v110_v21 = vpop.permute.xlu1 %109 }
  0x7f   :  { %v442_v34 = vmul.f32 %v110_v21, %v14_v28 }
  0x80   :  { %375 = vbcast.lane.b32.xlu1 %v809_v14, 288 }
  0x81   :  { %418 = vbcast.lane.b32.xlu0 %v811_v15, 288  ;;  %v524_v45 = vsel %vm520_vm1, %v442_v34, 0.0 }
  0x82   :  { %v114_v22 = vpop.permute.xlu1 %113 }
  0x83   :  { %v443_v39 = vmul.f32 %v114_v22, %v15_v32  ;;  %v26_v22 = vld [vmem:[%s1257_s1 + $0x70] sm:$0xff] }
  0x84   :  { %336 = vbcast.lane.b32.xlu1 %v807_v13, 296 }
  0x85   :  { %379 = vbcast.lane.b32.xlu0 %v809_v14, 296  ;;  %v526_v51 = vsel %vm520_vm1, %v443_v39, 0.0 }
  0x86   :  { %v118_v23 = vpop.permute.xlu1 %117 }
  0x87   :  { %v444_v46 = vmul.f32 %v118_v23, %v16_v36  ;;  %v28_v36 = vld [vmem:[%s1257_s1 + $0x80] sm:$0xff] }
  0x88   :  { %297 = vbcast.lane.b32.xlu1 %v805_v12, 304 }
  0x89   :  { %340 = vbcast.lane.b32.xlu0 %v807_v13, 304  ;;  %v528_v58 = vsel %vm520_vm1, %v444_v46, 0.0 }
  0x8a   :  { %v122_v24 = vpop.permute.xlu1 %121 }
  0x8b   :  { %v445_v52 = vmul.f32 %v122_v24, %v17_v41 }
  0x8c   :  { %258 = vbcast.lane.b32.xlu1 %v803_v11, 312 }
  0x8d   :  { %301 = vbcast.lane.b32.xlu0 %v805_v12, 312  ;;  %v530_v3 = vsel %vm520_vm1, %v445_v52, 0.0 }
  0x8e   :  { %v126_v25 = vpop.permute.xlu1 %125 }
  0x8f   :  { %v446_v59 = vmul.f32 %v126_v25, %v18_v47  ;;  %v30_v47 = vld [vmem:[%s1257_s1 + $0x90] sm:$0xff] }
  0x90   :  { %422 = vbcast.lane.b32.xlu1 %v811_v15, 296  ;;  %v851_v27 = vpop.xlane.xlu0 %94 }
  0x91   :  { %262 = vbcast.lane.b32.xlu0 %v803_v11, 320  ;;  %v532_v16 = vsel %vm520_vm1, %v446_v59, 0.0  ;;  %v722_v32 = vadd.f32 1e-12, %v851_v27  ;;  %v31_v27 = vld [vmem:[%s1257_s1 + $0x98] sm:$0x1f] }
  0x92   :  { %v130_v29 = vpop.permute.xlu1 %129 }
  0x93   :  { %v447_v62 = vmul.f32 %v130_v29, %v19_v53  ;;  %v29_v29 = vld [vmem:[%s1257_s1 + $0x88] sm:$0xff]  ;;  %783 = vrcp.f32 %v722_v32 }
  0x94   :  { %383 = vbcast.lane.b32.xlu1 %v809_v14, 304  ;;  %v102_v33 = vpop.permute.xlu0 %101 }
  0x95   :  { %v440_v35 = vmul.f32 %v102_v33, %v12_v30  ;;  %426 = vbcast.lane.b32.xlu0 %v811_v15, 304  ;;  %v534_v19 = vsel %vm520_vm1, %v447_v62, 0.0 }
  0x96   :  { %v138_v37 = vpop.permute.xlu1 %137 }
  0x97   :  { %v521_v40 = vsel %vm520_vm1, %v440_v35, 0.0 }
  0x98   :  { %v523_v42 = vadd.f32 %v522_v38, %v521_v40  ;;  %344 = vbcast.lane.b32.xlu1 %v807_v13, 312  ;;  %v134_v43 = vpop.permute.xlu0 %133 }
  0x99   :  { %387 = vbcast.lane.b32.xlu0 %v809_v14, 312  ;;  %v448_v17 = vmul.f32 %v134_v43, %v20_v0 }
  0x9a   :  { %v525_v48 = vadd.f32 %v524_v45, %v523_v42  ;;  %v149_v49 = vpop.permute.xlu1 %148 }
  0x9b   :  { %v451_v54 = vmul.f32 %v149_v49, %v23_v44  ;;  %v536_v30 = vsel %vm520_vm1, %v448_v17, 0.0 }
  0x9c   :  { %v527_v55 = vadd.f32 %v526_v51, %v525_v48  ;;  %305 = vbcast.lane.b32.xlu1 %v805_v12, 320  ;;  %v145_v56 = vpop.permute.xlu0 %144 }
  0x9d   :  { %v548_v60 = vsel %vm520_vm1, %v451_v54, 0.0  ;;  %v450_v61 = vmul.f32 %v145_v56, %v22_v50  ;;  %348 = vbcast.lane.b32.xlu0 %v807_v13, 320 }
  0x9e   :  { %v529_v63 = vadd.f32 %v528_v58, %v527_v55  ;;  %v157_v1 = vpop.permute.xlu1 %156  ;;  %v32_v58 = vld [vmem:[%s1257_s1 + $0xa0] sm:$0xff] }
  0x9f   :  { %v547_v4 = vsel %vm520_vm1, %v450_v61, 0.0  ;;  %v453_v5 = vmul.f32 %v157_v1, %v25_v57  ;;  %v35_v1 = vld [vmem:[%s1257_s1 + $0xb8] sm:$0xff] }
  0xa0   :  { %v531_v7 = vadd.f32 %v530_v3, %v529_v63  ;;  %v549_v8 = vadd.f32 %v548_v60, %v547_v4  ;;  %266 = vbcast.lane.b32.xlu1 %v803_v11, 328  ;;  %v153_v9 = vpop.permute.xlu0 %152  ;;  %v449_v11 = vmul.f32 %v138_v37, %v21_v6 }
  0xa1   :  { %v452_v18 = vmul.f32 %v153_v9, %v24_v2  ;;  %309 = vbcast.lane.b32.xlu0 %v805_v12, 328  ;;  %v552_v23 = vsel %vm520_vm1, %v453_v5, 0.0 }
  0xa2   :  { %v533_v20 = vadd.f32 %v532_v16, %v531_v7  ;;  %v165_v21 = vpop.permute.xlu1 %164  ;;  %v539_v37 = vsel %vm538_vm2, %v449_v11, 0.0  ;;  %v34_v7 = vld [vmem:[%s1257_s1 + $0xb0] sm:$0xff] }
  0xa3   :  { %v550_v24 = vsel %vm520_vm1, %v452_v18, 0.0  ;;  %v455_v25 = vmul.f32 %v165_v21, %v27_v10  ;;  %v37_v18 = vld [vmem:[%s1257_s1 + $0xc8] sm:$0xff] }
  0xa4   :  { %v535_v26 = vadd.f32 %v534_v19, %v533_v20  ;;  %v551_v28 = vadd.f32 %v550_v24, %v549_v8  ;;  %430 = vbcast.lane.b32.xlu1 %v811_v15, 312  ;;  %v161_v12 = vpop.permute.xlu0 %160  ;;  %v963_v19 = vpop.eup %783 }
  0xa5   :  { %v454_v31 = vmul.f32 %v161_v12, %v26_v22  ;;  %352 = vbcast.lane.b32.xlu0 %v807_v13, 328  ;;  %v556_v38 = vsel %vm520_vm1, %v455_v25, 0.0 }
  0xa6   :  { %v537_v33 = vadd.f32 %v536_v30, %v535_v26  ;;  %v553_v34 = vadd.f32 %v552_v23, %v551_v28  ;;  %v173_v35 = vpop.permute.xlu1 %172  ;;  %v36_v23 = vld [vmem:[%s1257_s1 + $0xc0] sm:$0xff]  ;;  %v39_v30 = vld [vmem:[%s1257_s1 + $0xd8] sm:$0xff] }
  0xa7   :  { %v554_v39 = vsel %vm520_vm1, %v454_v31, 0.0  ;;  %v457_v40 = vmul.f32 %v173_v35, %v29_v29  ;;  %v38_v35 = vld [vmem:[%s1257_s1 + $0xd0] sm:$0xff] }
  0xa8   :  { %v540_v41 = vadd.f32 %v539_v37, %v537_v33  ;;  %v555_v42 = vadd.f32 %v554_v39, %v553_v34  ;;  %391 = vbcast.lane.b32.xlu1 %v809_v14, 320  ;;  %v169_v13 = vpop.permute.xlu0 %168 }
  0xa9   :  { %v456_v43 = vmul.f32 %v169_v13, %v28_v36  ;;  %395 = vbcast.lane.b32.xlu0 %v809_v14, 328  ;;  %v560_v48 = vsel %vm520_vm1, %v457_v40, 0.0  ;;  %v33_v14 = vld [vmem:[%s1257_s1 + $0xa8] sm:$0xff] }
  0xaa   :  { %v541_v44 = vrot.slane %v540_v41, 4  ;;  %v557_v45 = vadd.f32 %v556_v38, %v555_v42  ;;  %v181_v46 = vpop.permute.xlu1 %180  ;;  %v41_v42 = vld [vmem:[%s1257_s1 + $0xe8] sm:$0x1f] }
  0xab   :  { %v558_v49 = vsel %vm520_vm1, %v456_v43, 0.0  ;;  %v459_v50 = vmul.f32 %v181_v46, %v31_v27  ;;  %v725_v27 = vrot.slane %v963_v19, 1  ;;  %v40_v46 = vld [vmem:[%s1257_s1 + $0xe0] sm:$0xff] }
  0xac   :  { %v542_v51 = vadd.f32 %v541_v44, %v540_v41  ;;  %v559_v52 = vadd.f32 %v558_v49, %v557_v45  ;;  %434 = vbcast.lane.b32.xlu1 %v811_v15, 320  ;;  %v177_v53 = vpop.permute.xlu0 %176 }
  0xad   :  { %v458_v54 = vmul.f32 %v177_v53, %v30_v47  ;;  %v564_v59 = vsel %vm538_vm2, %v459_v50, 0.0  ;;  %v43_v53 = vld [vmem:[%s1257_s1 + $0xf8] sm:$0xff] }
  0xae   :  { %v543_v55 = vrot.slane %v542_v51, 2  ;;  %v561_v56 = vadd.f32 %v560_v48, %v559_v52  ;;  %v192_v57 = vpop.permute.xlu1 %191 }
  0xaf   :  { %v562_v60 = vsel %vm520_vm1, %v458_v54, 0.0  ;;  %v461_v61 = vmul.f32 %v192_v57, %v33_v14  ;;  %v42_v57 = vld [vmem:[%s1257_s1 + $0xf0] sm:$0xff] }
  0xb0   :  { %v544_v62 = vadd.f32 %v543_v55, %v542_v51  ;;  %v563_v63 = vadd.f32 %v562_v60, %v561_v56  ;;  %438 = vbcast.lane.b32.xlu1 %v811_v15, 328  ;;  %v188_v0 = vpop.permute.xlu0 %187 }
  0xb1   :  { %v573_v2 = vsel %vm520_vm1, %v461_v61, 0.0  ;;  %v460_v3 = vmul.f32 %v188_v0, %v32_v58  ;;  %v53_v0 = vld [vmem:[%s1257_s1 + $0x148] sm:$0xff] }
  0xb2   :  { %v545_v4 = vrot.slane %v544_v62, 1  ;;  %v565_v5 = vadd.f32 %v564_v59, %v563_v63  ;;  %v200_v6 = vpop.permute.xlu1 %199 }
  0xb3   :  { %v572_v8 = vsel %vm520_vm1, %v460_v3, 0.0  ;;  %v463_v9 = vmul.f32 %v200_v6, %v35_v1 }
  0xb4   :  { %v546_v10 = vadd.f32 %v545_v4, %v544_v62  ;;  %v566_v15 = vrot.slane %v565_v5, 4  ;;  %v574_v16 = vadd.f32 %v573_v2, %v572_v8  ;;  %v196_v17 = vpop.permute.xlu0 %195 }
  0xb5   :  { %v462_v20 = vmul.f32 %v196_v17, %v34_v7  ;;  %v577_v24 = vsel %vm520_vm1, %v463_v9, 0.0 }
  0xb6   :  { %v740_v21 = vmul.f32 %v963_v19, %v546_v10  ;;  %v567_v22 = vadd.f32 %v566_v15, %v565_v5  ;;  %v208_v11 = vpop.permute.xlu1 %207  ;;  %v52_v5 = vld [vmem:[%s1257_s1 + $0x140] sm:$0xff] }
  0xb7   :  { %v575_v25 = vsel %vm520_vm1, %v462_v20, 0.0  ;;  %v465_v26 = vmul.f32 %v208_v11, %v37_v18  ;;  %v44_v20 = vld [vmem:[%s1257_s1 + $0x100] sm:$0xff] }
  0xb8   :  { %v568_v28 = vrot.slane %v567_v22, 2  ;;  %v576_v12 = vadd.f32 %v575_v25, %v574_v16  ;;  %v204_v29 = vpop.permute.xlu0 %203  ;;  %v54_v25 = vld [vmem:[%s1257_s1 + $0x150] sm:$0xff] }
  0xb9   :  { %v464_v31 = vmul.f32 %v204_v29, %v36_v23  ;;  %v581_v36 = vsel %vm520_vm1, %v465_v26, 0.0  ;;  %v62_v23 = vld [vmem:[%s1257_s1 + $0x190] sm:$0xff]  ;;  %v63_v29 = vld [vmem:[%s1257_s1 + $0x198] sm:$0xff] }
  0xba   :  { %v569_v32 = vadd.f32 %v568_v28, %v567_v22  ;;  %v578_v33 = vadd.f32 %v577_v24, %v576_v12  ;;  %v216_v34 = vpop.permute.xlu1 %215 }
  0xbb   :  { %v579_v37 = vsel %vm520_vm1, %v464_v31, 0.0  ;;  %v467_v38 = vmul.f32 %v216_v34, %v39_v30 }
  0xbc   :  { %v570_v39 = vrot.slane %v569_v32, 1  ;;  %v580_v40 = vadd.f32 %v579_v37, %v578_v33  ;;  %v212_v41 = vpop.permute.xlu0 %211 }
  0xbd   :  { %v466_v13 = vmul.f32 %v212_v41, %v38_v35  ;;  %v585_v47 = vsel %vm520_vm1, %v467_v38, 0.0  ;;  %v726_v38 = vrot.slane %v963_v19, 2 }
  0xbe   :  { %v571_v43 = vadd.f32 %v570_v39, %v569_v32  ;;  %v582_v44 = vadd.f32 %v581_v36, %v580_v40  ;;  %v224_v45 = vpop.permute.xlu1 %223 }
  0xbf   :  { %v583_v48 = vsel %vm520_vm1, %v466_v13, 0.0  ;;  %v469_v49 = vmul.f32 %v224_v45, %v41_v42 }
  0xc0   :  { %v741_v50 = vmul.f32 %v725_v27, %v571_v43  ;;  %v584_v51 = vadd.f32 %v583_v48, %v582_v44  ;;  %v220_v52 = vpop.permute.xlu0 %219 }
  0xc1   :  { %v468_v14 = vmul.f32 %v220_v52, %v40_v46  ;;  %v589_v58 = vsel %vm538_vm2, %v469_v49, 0.0 }
  0xc2   :  { %v756_v54 = vrot.slane %v741_v50, 7  ;;  %v586_v55 = vadd.f32 %v585_v47, %v584_v51  ;;  %v235_v56 = vpop.permute.xlu1 %234 }
  0xc3   :  { %v587_v59 = vsel %vm520_vm1, %v468_v14, 0.0  ;;  %v471_v60 = vmul.f32 %v235_v56, %v43_v53 }
  0xc4   :  { %v758_v61 = vsel %vm757_vm3, %v756_v54, %v740_v21  ;;  %v588_v62 = vadd.f32 %v587_v59, %v586_v55  ;;  %v231_v63 = vpop.permute.xlu0 %230 }
  0xc5   :  { %v598_v1 = vsel %vm520_vm1, %v471_v60, 0.0  ;;  %v470_v2 = vmul.f32 %v231_v63, %v42_v57 }
  0xc6   :  { %v590_v3 = vadd.f32 %v589_v58, %v588_v62  ;;  %v278_v4 = vpop.permute.xlu1 %277 }
  0xc7   :  { %v597_v6 = vsel %vm520_vm1, %v470_v2, 0.0  ;;  %v481_v7 = vmul.f32 %v278_v4, %v53_v0  ;;  %v72_v4 = vld [vmem:[%s1257_s1 + $0x1e0] sm:$0xff] }
  0xc8   :  { %v591_v8 = vrot.slane %v590_v3, 4  ;;  %v599_v9 = vadd.f32 %v598_v1, %v597_v6  ;;  %v274_v10 = vpop.permute.xlu0 %273 }
  0xc9   :  { %v623_v15 = vsel %vm520_vm1, %v481_v7, 0.0  ;;  %v480_v16 = vmul.f32 %v274_v10, %v52_v5  ;;  %v45_v5 = vld [vmem:[%s1257_s1 + $0x108] sm:$0xff]  ;;  %v64_v7 = vld [vmem:[%s1257_s1 + $0x1a0] sm:$0xff]  ;;  %v46_v10 = vld [vmem:[%s1257_s1 + $0x110] sm:$0xff] }
  0xca   :  { %v592_v17 = vadd.f32 %v591_v8, %v590_v3  ;;  %v317_v18 = vpop.permute.xlu1 %316  ;;  %v73_v3 = vld [vmem:[%s1257_s1 + $0x1e8] sm:$0xff]  ;;  %v83_v8 = vld [vmem:[%s1257_s1 + $0x238] sm:$0xff] }
  0xcb   :  { %v622_v21 = vsel %vm520_vm1, %v480_v16, 0.0  ;;  %v490_v30 = vmul.f32 %v317_v18, %v62_v23 }
  0xcc   :  { %v593_v22 = vrot.slane %v592_v17, 2  ;;  %v624_v11 = vadd.f32 %v623_v15, %v622_v21  ;;  %v239_v24 = vpop.permute.xlu0 %238 }
  0xcd   :  { %v472_v26 = vmul.f32 %v239_v24, %v44_v20  ;;  %v647_v42 = vsel %vm520_vm1, %v490_v30, 0.0  ;;  %v74_v24 = vld [vmem:[%s1257_s1 + $0x1f0] sm:$0xff] }
  0xce   :  { %v594_v28 = vadd.f32 %v593_v22, %v592_v17  ;;  %v282_v12 = vpop.permute.xlu1 %281  ;;  %v47_v22 = vld [vmem:[%s1257_s1 + $0x118] sm:$0xff] }
  0xcf   :  { %v600_v31 = vsel %vm520_vm1, %v472_v26, 0.0  ;;  %v482_v32 = vmul.f32 %v282_v12, %v54_v25  ;;  %v55_v25 = vld [vmem:[%s1257_s1 + $0x158] sm:$0xff]  ;;  %v48_v12 = vld [vmem:[%s1257_s1 + $0x120] sm:$0xff] }
  0xd0   :  { %v595_v33 = vrot.slane %v594_v28, 1  ;;  %v1019_v34 = vadd.f32 %v600_v31, %v599_v9  ;;  %v321_v35 = vpop.permute.xlu0 %320  ;;  %v82_v9 = vld [vmem:[%s1257_s1 + $0x230] sm:$0xff] }
  0xd1   :  { %v625_v36 = vsel %vm520_vm1, %v482_v32, 0.0  ;;  %v491_v37 = vmul.f32 %v321_v35, %v63_v29 }
  0xd2   :  { %v596_v39 = vadd.f32 %v595_v33, %v594_v28  ;;  %v1023_v40 = vadd.f32 %v625_v36, %v624_v11  ;;  %v364_v41 = vpop.permute.xlu1 %363  ;;  %v65_v28 = vld [vmem:[%s1257_s1 + $0x1a8] sm:$0xff]  ;;  %v56_v33 = vld [vmem:[%s1257_s1 + $0x160] sm:$0xff] }
  0xd3   :  { %v648_v13 = vsel %vm520_vm1, %v491_v37, 0.0  ;;  %v501_v16 = vmul.f32 %v364_v41, %v73_v3  ;;  %v84_v41 = vld [vmem:[%s1257_s1 + $0x240] sm:$0xff] }
  0xd4   :  { %v742_v27 = vmul.f32 %v726_v38, %v596_v39  ;;  %v1027_v43 = vadd.f32 %v648_v13, %v647_v42  ;;  %v360_v44 = vpop.permute.xlu0 %359  ;;  %v49_v42 = vld [vmem:[%s1257_s1 + $0x128] sm:$0xff] }
  0xd5   :  { %v500_v17 = vmul.f32 %v360_v44, %v72_v4  ;;  %v673_v30 = vsel %vm520_vm1, %v501_v16, 0.0 }
  0xd6   :  { %v759_v45 = vrot.slane %v742_v27, 6  ;;  %v325_v46 = vpop.permute.xlu1 %324 }
  0xd7   :  { %v492_v20 = vmul.f32 %v325_v46, %v64_v7  ;;  %v672_v31 = vsel %vm520_vm1, %v500_v17, 0.0  ;;  %v67_v17 = vld [vmem:[%s1257_s1 + $0x1b8] sm:$0xff] }
  0xd8   :  { %v1029_v47 = vsel %vm760_vm4, %v759_v45, %v758_v61  ;;  %v243_v48 = vpop.permute.xlu0 %242 }
  0xd9   :  { %v473_v18 = vmul.f32 %v243_v48, %v45_v5  ;;  %v650_v36 = vsel %vm520_vm1, %v492_v20, 0.0  ;;  %v674_v48 = vadd.f32 %v673_v30, %v672_v31 }
  0xda   :  { %v407_v49 = vpop.permute.xlu1 %406 }
  0xdb   :  { %v511_v21 = vmul.f32 %v407_v49, %v83_v8  ;;  %v602_v32 = vsel %vm520_vm1, %v473_v18, 0.0 }
  0xdc   :  { %v403_v50 = vpop.permute.xlu0 %402  ;;  %v603_v49 = vadd.f32 %v602_v32, %v1019_v34  ;;  %v85_v34 = vld [vmem:[%s1257_s1 + $0x248] sm:$0xff] }
  0xdd   :  { %v510_v23 = vmul.f32 %v403_v50, %v82_v9  ;;  %v698_v37 = vsel %vm520_vm1, %v511_v21, 0.0 }
  0xde   :  { %v368_v51 = vpop.permute.xlu1 %367 }
  0xdf   :  { %v502_v38 = vmul.f32 %v368_v51, %v74_v24  ;;  %v697_v27 = vsel %vm520_vm1, %v510_v23, 0.0  ;;  %v75_v51 = vld [vmem:[%s1257_s1 + $0x1f8] sm:$0xff]  ;;  %v58_v24 = vld [vmem:[%s1257_s1 + $0x170] sm:$0xff] }
  0xe0   :  { %v286_v52 = vpop.permute.xlu0 %285  ;;  %v699_v5 = vadd.f32 %v698_v37, %v697_v27 }
  0xe1   :  { %v483_v39 = vmul.f32 %v286_v52, %v55_v25  ;;  %v675_v7 = vsel %vm520_vm1, %v502_v38, 0.0  ;;  %v87_v38 = vld [vmem:[%s1257_s1 + $0x258] sm:$0xff] }
  0xe2   :  { %v329_v53 = vpop.permute.xlu1 %328  ;;  %v676_v30 = vadd.f32 %v675_v7, %v674_v48 }
  0xe3   :  { %v493_v44 = vmul.f32 %v329_v53, %v65_v28  ;;  %v651_v53 = vadd.f32 %v650_v36, %v1027_v43  ;;  %v627_v8 = vsel %vm520_vm1, %v483_v39, 0.0  ;;  %v57_v43 = vld [vmem:[%s1257_s1 + $0x168] sm:$0xff] }
  0xe4   :  { %v247_v14 = vpop.permute.xlu0 %246 }
  0xe5   :  { %v474_v26 = vmul.f32 %v247_v14, %v46_v10  ;;  %v50_v14 = vld [vmem:[%s1257_s1 + $0x130] sm:$0xff]  ;;  %v652_v10 = vsel %vm520_vm1, %v493_v44, 0.0  ;;  %v68_v44 = vld [vmem:[%s1257_s1 + $0x1c0] sm:$0xff] }
  0xe6   :  { %v290_v54 = vpop.permute.xlu1 %289  ;;  %v653_v31 = vadd.f32 %v652_v10, %v651_v53  ;;  %v77_v53 = vld [vmem:[%s1257_s1 + $0x208] sm:$0xff] }
  0xe7   :  { %v604_v45 = vsel %vm520_vm1, %v474_v26, 0.0  ;;  %v484_v50 = vmul.f32 %v290_v54, %v56_v33  ;;  %v66_v54 = vld [vmem:[%s1257_s1 + $0x1b0] sm:$0xff] }
  0xe8   :  { %v411_v55 = vpop.permute.xlu0 %410  ;;  %v605_v9 = vadd.f32 %v604_v45, %v603_v49  ;;  %v86_v33 = vld [vmem:[%s1257_s1 + $0x250] sm:$0xff] }
  0xe9   :  { %v512_v3 = vmul.f32 %v411_v55, %v84_v41  ;;  %v629_v20 = vsel %vm520_vm1, %v484_v50, 0.0 }
  0xea   :  { %v251_v56 = vpop.permute.xlu1 %250 }
  0xeb   :  { %v475_v35 = vmul.f32 %v251_v56, %v47_v22  ;;  %v727_v56 = vrot.slane %v963_v19, 3  ;;  %v700_v26 = vsel %vm520_vm1, %v512_v3, 0.0 }
  0xec   :  { %v1031_v57 = vpop.permute.xlu0 %371  ;;  %v701_v39 = vadd.f32 %v700_v26, %v699_v5 }
  0xed   :  { %v503_v16 = vmul.f32 %v1031_v57, %v75_v51  ;;  %v628_v57 = vadd.f32 %v627_v8, %v1023_v40 }
  0xee   :  { %v1033_v58 = vpop.permute.xlu1 %414 }
  0xef   :  { %v513_v22 = vmul.f32 %v1033_v58, %v85_v34  ;;  %v76_v58 = vld [vmem:[%s1257_s1 + $0x200] sm:$0xff]  ;;  %v677_v36 = vsel %vm520_vm1, %v503_v16, 0.0 }
  0xf0   :  { %v1035_v59 = vpop.permute.xlu0 %332  ;;  %v678_v51 = vadd.f32 %v677_v36, %v676_v30  ;;  %v60_v34 = vld [vmem:[%s1257_s1 + $0x180] sm:$0xff] }
  0xf1   :  { %v494_v23 = vmul.f32 %v1035_v59, %v66_v54  ;;  %v702_v41 = vsel %vm520_vm1, %v513_v22, 0.0 }
  0xf2   :  { %v1037_v60 = vpop.permute.xlu1 %375  ;;  %v703_v7 = vadd.f32 %v702_v41, %v701_v39  ;;  %v90_v41 = vld [vmem:[%s1257_s1 + $0x270] sm:$0xff] }
  0xf4   :  { %v1039_v61 = vpop.permute.xlu0 %293 }
  0xf5   :  { %v485_v28 = vmul.f32 %v1039_v61, %v57_v43  ;;  %v51_v61 = vld [vmem:[%s1257_s1 + $0x138] sm:$0x1f]  ;;  %v88_v43 = vld [vmem:[%s1257_s1 + $0x260] sm:$0xff] }
  0xf6   :  { %v1041_v62 = vpop.permute.xlu1 %336 }
  0xf7   :  { %v495_v59 = vmul.f32 %v1041_v62, %v67_v17  ;;  %v631_v48 = vsel %vm520_vm1, %v485_v28, 0.0  ;;  %v78_v17 = vld [vmem:[%s1257_s1 + $0x210] sm:$0xff] }
  0xf8   :  { %v255_v63 = vpop.permute.xlu0 %254 }
  0xf9   :  { %v476_v46 = vmul.f32 %v255_v63, %v48_v12  ;;  %v606_v63 = vsel %vm520_vm1, %v475_v35, 0.0  ;;  %v630_v35 = vadd.f32 %v629_v20, %v628_v57 }
  0xfa   :  { %v1043_v0 = vpop.permute.xlu1 %297  ;;  %v607_v21 = vadd.f32 %v606_v63, %v605_v9 }
  0xfb   :  { %v486_v37 = vmul.f32 %v1043_v0, %v58_v24  ;;  %v59_v0 = vld [vmem:[%s1257_s1 + $0x178] sm:$0xff]  ;;  %v632_v9 = vadd.f32 %v631_v48, %v630_v35  ;;  %v70_v24 = vld [vmem:[%s1257_s1 + $0x1d0] sm:$0xff] }
  0xfc   :  { %v1045_v1 = vpop.permute.xlu0 %418 }
  0xfd   :  { %v514_v49 = vmul.f32 %v1045_v1, %v86_v33  ;;  %v633_v54 = vsel %vm520_vm1, %v486_v37, 0.0  ;;  %v61_v33 = vld [vmem:[%s1257_s1 + $0x188] sm:$0x1f] }
  0xfe   :  { %v259_v2 = vpop.permute.xlu1 %258 }
  0xff   :  { %v477_v4 = vmul.f32 %v259_v2, %v49_v42  ;;  %v608_v2 = vsel %vm520_vm1, %v476_v46, 0.0  ;;  %v654_v42 = vsel %vm520_vm1, %v494_v23, 0.0  ;;  %v504_v46 = vmul.f32 %v1037_v60, %v76_v58  ;;  %v79_v58 = vld [vmem:[%s1257_s1 + $0x218] sm:$0xff] }
 0x100   :  { %v1056_v6 = vpop.permute.xlu0 %379  ;;  %v609_v32 = vadd.f32 %v608_v2, %v607_v21  ;;  %v655_v8 = vadd.f32 %v654_v42, %v653_v31  ;;  %v634_v21 = vadd.f32 %v633_v54, %v632_v9 }
 0x101   :  { %v610_v12 = vsel %vm520_vm1, %v477_v4, 0.0  ;;  %v679_v16 = vsel %vm520_vm1, %v504_v46, 0.0 }
 0x102   :  { %v1070_v15 = vpop.permute.xlu1 %422  ;;  %v611_v27 = vadd.f32 %v610_v12, %v609_v32 }
 0x103   :  { %v515_v3 = vmul.f32 %v1070_v15, %v87_v38  ;;  %v69_v15 = vld [vmem:[%s1257_s1 + $0x1c8] sm:$0xff] }
 0x104   :  { %v1075_v11 = vpop.permute.xlu0 %340 }
 0x105   :  { %v496_v1 = vmul.f32 %v1075_v11, %v68_v44  ;;  %v704_v11 = vsel %vm520_vm1, %v514_v49, 0.0  ;;  %v706_v22 = vsel %vm520_vm1, %v515_v3, 0.0 }
 0x106   :  { %v1089_v29 = vpop.permute.xlu1 %383  ;;  %v705_v12 = vadd.f32 %v704_v11, %v703_v7 }
 0x107   :  { %v506_v30 = vmul.f32 %v1089_v29, %v78_v17 }
 0x108   :  { %v1105_v13 = vpop.permute.xlu0 %301  ;;  %v707_v36 = vadd.f32 %v706_v22, %v705_v12 }
 0x109   :  { %v487_v4 = vmul.f32 %v1105_v13, %v59_v0  ;;  %v505_v13 = vmul.f32 %v1056_v6, %v77_v53  ;;  %v658_v6 = vsel %vm520_vm1, %v496_v1, 0.0 }
 0x10a   :  { %v1113_v52 = vpop.permute.xlu1 %344 }
 0x10b   :  { %v635_v26 = vsel %vm520_vm1, %v487_v4, 0.0  ;;  %v681_v35 = vsel %vm520_vm1, %v505_v13, 0.0  ;;  %v81_v13 = vld [vmem:[%s1257_s1 + $0x228] sm:$0x1f] }
 0x10c   :  { %v263_v55 = vpop.permute.xlu0 %262  ;;  %v636_v29 = vadd.f32 %v635_v26, %v634_v21 }
 0x10d   :  { %v478_v18 = vmul.f32 %v263_v55, %v50_v14  ;;  %v656_v14 = vsel %vm520_vm1, %v495_v59, 0.0 }
 0x10e   :  { %v306_v25 = vpop.permute.xlu1 %305  ;;  %v657_v20 = vadd.f32 %v656_v14, %v655_v8 }
 0x10f   :  { %v612_v62 = vsel %vm520_vm1, %v478_v18, 0.0  ;;  %v488_v2 = vmul.f32 %v306_v25, %v60_v34  ;;  %v89_v18 = vld [vmem:[%s1257_s1 + $0x268] sm:$0xff]  ;;  %v497_v25 = vmul.f32 %v1113_v52, %v69_v15 }
 0x110   :  { %v427_v40 = vpop.permute.xlu0 %426  ;;  %v613_v63 = vadd.f32 %v612_v62, %v611_v27  ;;  %v659_v37 = vadd.f32 %v658_v6, %v657_v20  ;;  %v80_v62 = vld [vmem:[%s1257_s1 + $0x220] sm:$0xff] }
 0x111   :  { %v516_v28 = vmul.f32 %v427_v40, %v88_v43  ;;  %v637_v52 = vsel %vm520_vm1, %v488_v2, 0.0  ;;  %v660_v42 = vsel %vm520_vm1, %v497_v25, 0.0 }
 0x112   :  { %v267_v45 = vpop.permute.xlu1 %266  ;;  %v638_v46 = vadd.f32 %v637_v52, %v636_v29  ;;  %v661_v34 = vadd.f32 %v660_v42, %v659_v37  ;;  %v728_v29 = vrot.slane %v963_v19, 4 }
 0x113   :  { %v479_v50 = vmul.f32 %v267_v45, %v51_v61  ;;  %v680_v61 = vadd.f32 %v679_v16, %v678_v51  ;;  %v708_v27 = vsel %vm520_vm1, %v516_v28, 0.0  ;;  %v683_v45 = vsel %vm520_vm1, %v506_v30, 0.0  ;;  %v71_v51 = vld [vmem:[%s1257_s1 + $0x1d8] sm:$0x1f] }
 0x114   :  { %v388_v60 = vpop.permute.xlu0 %387 }
 0x115   :  { %v614_v5 = vsel %vm538_vm2, %v479_v50, 0.0  ;;  %v507_v44 = vmul.f32 %v388_v60, %v79_v58  ;;  %v709_v60 = vadd.f32 %v708_v27, %v707_v36  ;;  %v682_v7 = vadd.f32 %v681_v35, %v680_v61 }
 0x116   :  { %v615_v55 = vadd.f32 %v614_v5, %v613_v63  ;;  %v431_v10 = vpop.permute.xlu1 %430  ;;  %v91_v5 = vld [vmem:[%s1257_s1 + $0x278] sm:$0x1f] }
 0x117   :  { %v517_v59 = vmul.f32 %v431_v10, %v89_v18  ;;  %v685_v8 = vsel %vm520_vm1, %v507_v44, 0.0  ;;  %v684_v17 = vadd.f32 %v683_v45, %v682_v7  ;;  %v729_v45 = vrot.slane %v963_v19, 5 }
 0x118   :  { %v616_v23 = vrot.slane %v615_v55, 4  ;;  %v349_v57 = vpop.permute.xlu0 %348 }
 0x119   :  { %v498_v40 = vmul.f32 %v349_v57, %v70_v24  ;;  %v710_v49 = vsel %vm520_vm1, %v517_v59, 0.0  ;;  %v686_v6 = vadd.f32 %v685_v8, %v684_v17 }
 0x11a   :  { %v617_v31 = vadd.f32 %v616_v23, %v615_v55  ;;  %v392_v32 = vpop.permute.xlu1 %391  ;;  %v711_v55 = vadd.f32 %v710_v49, %v709_v60 }
 0x11b   :  { %v662_v14 = vsel %vm520_vm1, %v498_v40, 0.0  ;;  %v508_v53 = vmul.f32 %v392_v32, %v80_v62 }
 0x11c   :  { %v618_v38 = vrot.slane %v617_v31, 2  ;;  %v310_v39 = vpop.permute.xlu0 %309  ;;  %v663_v10 = vadd.f32 %v662_v14, %v661_v34  ;;  %v730_v34 = vrot.slane %v963_v19, 6 }
 0x11d   :  { %v489_v0 = vmul.f32 %v310_v39, %v61_v33  ;;  %v687_v2 = vsel %vm520_vm1, %v508_v53, 0.0 }
 0x11e   :  { %v619_v48 = vadd.f32 %v618_v38, %v617_v31  ;;  %v435_v50 = vpop.permute.xlu1 %434  ;;  %v688_v58 = vadd.f32 %v687_v2, %v686_v6 }
 0x11f   :  { %v639_v3 = vsel %vm538_vm2, %v489_v0, 0.0  ;;  %v518_v63 = vmul.f32 %v435_v50, %v90_v41 }
 0x120   :  { %v620_v54 = vrot.slane %v619_v48, 1  ;;  %v640_v1 = vadd.f32 %v639_v3, %v638_v46  ;;  %v353_v4 = vpop.permute.xlu0 %352 }
 0x121   :  { %v712_v9 = vsel %vm520_vm1, %v518_v63, 0.0  ;;  %v499_v15 = vmul.f32 %v353_v4, %v71_v51  ;;  %v731_v63 = vrot.slane %v963_v19, 7 }
 0x122   :  { %v621_v43 = vadd.f32 %v620_v54, %v619_v48  ;;  %v641_v16 = vrot.slane %v640_v1, 4  ;;  %v439_v11 = vpop.permute.xlu1 %438  ;;  %v713_v23 = vadd.f32 %v712_v9, %v711_v55 }
 0x123   :  { %v664_v18 = vsel %vm538_vm2, %v499_v15, 0.0  ;;  %v519_v20 = vmul.f32 %v439_v11, %v91_v5 }
 0x124   :  { %v743_v21 = vmul.f32 %v727_v56, %v621_v43  ;;  %v642_v22 = vadd.f32 %v641_v16, %v640_v1  ;;  %v665_v24 = vadd.f32 %v664_v18, %v663_v10  ;;  %v396_v57 = vpop.permute.xlu0 %395 }
 0x125   :  { %v714_v26 = vsel %vm538_vm2, %v519_v20, 0.0  ;;  %v509_v25 = vmul.f32 %v396_v57, %v81_v13 }
 0x126   :  { %v762_v28 = vrot.slane %v743_v21, 5  ;;  %v643_v12 = vrot.slane %v642_v22, 2  ;;  %v666_v30 = vrot.slane %v665_v24, 4  ;;  %v715_v31 = vadd.f32 %v714_v26, %v713_v23 }
 0x127   :  { %v689_v59 = vsel %vm538_vm2, %v509_v25, 0.0 }
 0x128   :  { %v764_v32 = vsel %vm763_vm5, %v762_v28, %v1029_v47  ;;  %v644_v33 = vadd.f32 %v643_v12, %v642_v22  ;;  %v667_v56 = vadd.f32 %v666_v30, %v665_v24  ;;  %v716_v61 = vrot.slane %v715_v31, 4 }
 0x129   :  { %v690_v35 = vadd.f32 %v689_v59, %v688_v58 }
 0x12a   :  { %v645_v52 = vrot.slane %v644_v33, 1  ;;  %v668_v40 = vrot.slane %v667_v56, 2  ;;  %v717_v36 = vadd.f32 %v716_v61, %v715_v31 }
 0x12b   :  { %v691_v37 = vrot.slane %v690_v35, 4 }
 0x12c   :  { %v646_v38 = vadd.f32 %v645_v52, %v644_v33  ;;  %v669_v62 = vadd.f32 %v668_v40, %v667_v56  ;;  %v718_v39 = vrot.slane %v717_v36, 2 }
 0x12d   :  { %v692_v41 = vadd.f32 %v691_v37, %v690_v35 }
 0x12e   :  { %v744_v42 = vmul.f32 %v728_v29, %v646_v38  ;;  %v670_v27 = vrot.slane %v669_v62, 1  ;;  %v719_v44 = vadd.f32 %v718_v39, %v717_v36 }
 0x12f   :  { %v693_v0 = vrot.slane %v692_v41, 2 }
 0x130   :  { %v765_v47 = vrot.slane %v744_v42, 4  ;;  %v671_v46 = vadd.f32 %v670_v27, %v669_v62  ;;  %v720_v48 = vrot.slane %v719_v44, 1 }
 0x131   :  { %v694_v49 = vadd.f32 %v693_v0, %v692_v41 }
 0x132   :  { %v767_v50 = vsel %vm766_vm6, %v765_v47, %v764_v32  ;;  %v745_v51 = vmul.f32 %v729_v45, %v671_v46  ;;  %v721_v14 = vadd.f32 %v720_v48, %v719_v44 }
 0x133   :  { %v695_v53 = vrot.slane %v694_v49, 1 }
 0x134   :  { %v768_v3 = vrot.slane %v745_v51, 3  ;;  %v747_v1 = vmul.f32 %v731_v63, %v721_v14 }
 0x135   :  { %v696_v60 = vadd.f32 %v695_v53, %v694_v49 }
 0x136   :  { %v770_v54 = vsel %vm769_vm7, %v768_v3, %v767_v50  ;;  %v774_v7 = vrot.slane %v747_v1, 1 }
 0x137   :  { %v746_v4 = vmul.f32 %v730_v34, %v696_v60 }
 0x139   :  { %v771_v5 = vrot.slane %v746_v4, 2 }
 0x13b   :  { %v773_v8 = vsel %vm772_vm8, %v771_v5, %v770_v54 }
 0x13c   :  { %v776_v9 = vsel %vm775_vm9, %v774_v7, %v773_v8 }
 0x13d   :  { %778 = vst.msk [vmem:[%s1258_s2] sm:$0xff] %vm520_vm1, %v776_v9 }

// kernel: recipe_encoder_forward.21
= control target key start
LH: loop header
LB: loop body
LE: loop exit
PB: predicated region body
PF: predicated region fallthrough
CT: control target
= control target key end

     0   :  { %s358_s12 = smov 0   ;;  %s384_s0 = inlined_call_operand.vmem [shape: f32[16,32], index: 0, kind: input, shape index: {}]   ;;  %s385_s1 = inlined_call_operand.vmem [shape: bf16[32,96], index: 1, kind: input, shape index: {}]   ;;  %s386_s2 = inlined_call_operand.vmem [shape: f32[1,96], index: 2, kind: input, shape index: {}]   ;;  %s387_s3 = inlined_call_operand.vmem [shape: bf16[16,96], index: 3, kind: output, shape index: {}]  }
   0x1 LB: > { %s292_s13 = sadd.s32 4294967295, %s334_s12   ;;  %p296_p0 = scmp.ge.s32.totalorder %s334_s12, 1  ;;  %s334_s12 = sphi %s358_s12, %s13_s12  }
   0x2   : > { %p136_p1 = scmp.lt.s32.totalorder %s334_s12, 3 }
   0x4   : > { %p137_p2 = pnand %p296_p0, %p136_p1 }
   0x5   : > { %v326_v0 = vld [vmem:[%s385_s1] sm:$0xff] (!%p137_p2)   ;;  %v336_v1 = vmov (!%p137_p2), 0.0   ;;  %v327_v2 = vld [vmem:[%s385_s1 + $0x8] sm:$0xff] (!%p137_p2)   ;;  %vm337_vm0 = vmmov (!%p137_p2), 0   ;;  %p158_p3 = scmp.lt.s32.totalorder (!%p137_p2), %s292_s13, 1  ;;  %vm192_vm1 = vcmask (!%p137_p2), 261120  }
   0x6   : > { %140 = sbr.rel (%p137_p2) target bundleno = 236 (0xec), region = 32  ;;  %308 = vmatprep.subr.bf16.mxu0 (!%p137_p2), %v336_v1  ;;  %312 = vmatprep.mubr.msk.bf16.mxu0 (!%p137_p2), %vm337_vm0, %v336_v1  ;;  %v299_v5 = vld [vmem:[%s386_s2] ss:$0 sm:$0xff] (!%p137_p2)  ;;  %vm237_vm2 = vcmask (!%p137_p2), 781312  }
   0x7   : > { %309 = vmatpush3.bf16.msra.mxu0 (!%p137_p2), %v326_v0 }
   0x8   : > { %310 = vmatprep.subr.bf16.mxu0 (!%p137_p2), %v336_v1 }
   0xb   : > { %311 = vmatpush3.bf16.msra.mxu0 (!%p137_p2), %v327_v2 }
   0xd   : > { %s389_s13 = smov (!%p158_p3, %s292_s13), 1 }
   0xe   : > { %s297_s18 = sshll.u32 %s389_s13, 3  ;;  %s298_s24 = sshll.u32 %s389_s13, 2 }
   0xf   : > { %s161_s21 = scalar_lea.vmem %s384_s0, %s297_s18  ;;  %s165_s27 = scalar_lea.vmem %s387_s3, %s298_s24 }
  0x10   : > { %v167_v3 = vld [vmem:[%s161_s21] sm:$0xff] }
  0x11   : > { %v168_v4 = vpack.c.bf16 %v167_v3, %v167_v3 }
  0x13   : > { %313 = vmatmul.mubr.msk.bf16.vlgmr.msra.gmra.mrb[0].mxu0 %vm192_vm1, %v168_v4 }
  0xe6   : > { %v230_v6 = vpop.f32.mrb[0].mxu0 }
  0xe7   : > { %v231_v7 = vadd.f32 %v299_v5, %v230_v6  ;;  %v314_v8 = vpop.f32.mrb[1].mxu0 }
  0xe8   : > { %v233_v9 = vpop.f32.mrb[2].mxu0 }
  0xe9   : > { %v236_v10 = vpack.c.bf16 %v231_v7, %v231_v7  ;;  %v315_v11 = vpop.f32.mrb[3].mxu0 }
  0xeb   : > { %238 = vst.msk [vmem:[%s165_s27] sm:$0xf] %vm237_vm2, %v236_v10 }
  0xec PF: > { %s13_s12 = sadd.s32 1, %s334_s12  }
  0xed   : > { %p10_p4 = scmp.ge.s32.totalorder %s13_s12, 4  }
  0xef   :  { %12 = sbr.rel (!%p10_p4) target bundleno = 1 (0x1), region = 62 }

// kernel: recipe_encoder_forward.22
= control target key start
LH: loop header
LB: loop body
LE: loop exit
PB: predicated region body
PF: predicated region fallthrough
CT: control target
= control target key end

     0   :  { %s949_s15 = smov 0   ;;  %s1033_s0 = inlined_call_operand.vmem [shape: f32[2,1,1,8], index: 0, kind: input, shape index: {}]   ;;  %s1034_s1 = inlined_call_operand.vmem [shape: bf16[2,4,8,8], index: 1, kind: input, shape index: {}]   ;;  %s1035_s2 = inlined_call_operand.vmem [shape: bf16[2,4,8,8], index: 2, kind: input, shape index: {}]   ;;  %s1036_s3 = inlined_call_operand.vmem [shape: bf16[2,4,8,8], index: 3, kind: input, shape index: {}]   ;;  %s1037_s4 = inlined_call_operand.vmem [shape: bf16[2,4,8,8], index: 4, kind: output, shape index: {}]  }
   0x1 LB: > { %s797_s16 = sadd.s32 4294967295, %s920_s15   ;;  %p801_p0 = scmp.ge.s32.totalorder %s920_s15, 1  ;;  %s920_s15 = sphi %s949_s15, %s14_s15  }
   0x2   : > { %p190_p1 = scmp.lt.s32.totalorder %s920_s15, 3 }
   0x4   : > { %p191_p2 = pnand %p801_p0, %p190_p1 }
   0x5   : > { %p229_p3 = scmp.lt.s32.totalorder (!%p191_p2), %s797_s16, 1  ;;  %v922_v0 = vmov (!%p191_p2), 0.0   ;;  %vm923_vm0 = vmmov (!%p191_p2), 0   ;;  %vm265_vm1 = vcmask (!%p191_p2), 64512   ;;  %v458_v13 = vlaneseq (!%p191_p2) }
   0x6   : > { %194 = sbr.rel (%p191_p2) target bundleno = 784 (0x310), region = 36  ;;  %840 = vmatprep.subr.bf16.mxu0 (!%p191_p2), %v922_v0  ;;  %846 = vmatprep.subr.bf16.mxu1 (!%p191_p2), %v922_v0  ;;  %vm518_vm2 = vcmask (!%p191_p2), 1043456   ;;  %vm704_vm3 = vcmask (!%p191_p2), 60416  }
   0x7   : > { %842 = vmatprep.mubr.msk.bf16.mxu0 (!%p191_p2), %vm923_vm0, %v922_v0  ;;  %848 = vmatprep.mubr.msk.bf16.mxu1 (!%p191_p2), %vm923_vm0, %v922_v0  ;;  %v459_v16 = vshrl.u32 (!%p191_p2), %v458_v13, 7 }
   0x9   : > { %v460_v18 = vsub.s32 (!%p191_p2), 0, %v459_v16 }
   0xd   : > { %s1039_s16 = smov (!%p229_p3, %s797_s16), 1 }
   0xe   : > { %s966_s17 = sshll.u32 %s1039_s16, 4  ;;  %s231_s26 = scalar_lea.vmem %s1033_s0, %s1039_s16 }
   0xf   : > { %s241_s20 = scalar_lea.vmem %s1035_s2, %s966_s17  ;;  %s236_s23 = scalar_lea.vmem %s1034_s1, %s966_s17  ;;  %v454_v14 = vld [vmem:[%s231_s26] sm:$0x1] }
  0x10   : > { %v257_v1 = vld [vmem:[%s241_s20] sm:$0xf]  ;;  %v258_v2 = vld [vmem:[%s241_s20 + $0x4] sm:$0xf]  ;;  %v259_v5 = vld [vmem:[%s241_s20 + $0x8] sm:$0xf]  ;;  %s246_s29 = scalar_lea.vmem %s1036_s3, %s966_s17  ;;  %s251_s6 = scalar_lea.vmem %s1037_s4, %s966_s17 }
  0x11   : > { %v270_v3 = vsel %vm265_vm1, %v257_v1, 0  ;;  %v316_v4 = vsel %vm265_vm1, %v258_v2, 0  ;;  %v260_v6 = vld [vmem:[%s241_s20 + $0xc] sm:$0xf]  ;;  %v253_v7 = vld [vmem:[%s236_s23] sm:$0xf] }
  0x12   : > { %841 = vmatpush3.bf16.xpose.msra.mxu0 %v270_v3  ;;  %847 = vmatpush3.bf16.xpose.msra.mxu1 %v316_v4  ;;  %v254_v8 = vld [vmem:[%s236_s23 + $0x4] sm:$0xf]  ;;  %v362_v9 = vsel %vm265_vm1, %v259_v5, 0  ;;  %v408_v10 = vsel %vm265_vm1, %v260_v6, 0  ;;  %v255_v11 = vld [vmem:[%s236_s23 + $0x8] sm:$0xf] }
  0x13   : > { %852 = vmatprep.subr.bf16.mxu0 %v922_v0  ;;  %858 = vmatprep.subr.bf16.mxu1 %v922_v0  ;;  %v256_v12 = vld [vmem:[%s236_s23 + $0xc] sm:$0xf]  ;;  %v455_v15 = vsub.f32 1.0, %v454_v14  ;;  %v261_v5 = vld [vmem:[%s246_s29] sm:$0xf] }
  0x14   : > { %v520_v6 = vsel %vm518_vm2, %v261_v5, 0 }
  0x15   : > { %v456_v17 = vmul.f32 -1e+09, %v455_v15 }
  0x17   : > { %v461_v19 = vrot.slane %v456_v17, %v460_v18 }
  0x19   : > { %843 = vmatmul.mubr.msk.bf16.vlgmr.msra.gmra.mrb[0].mxu0 %vm265_vm1, %v253_v7  ;;  %849 = vmatmul.mubr.msk.bf16.vlgmr.msra.gmra.mrb[0].mxu1 %vm265_vm1, %v254_v8  ;;  %v262_v7 = vld [vmem:[%s246_s29 + $0x4] sm:$0xf] }
  0x1a   : > { %853 = vmatpush3.bf16.xpose.msra.mxu0 %v362_v9  ;;  %859 = vmatpush3.bf16.xpose.msra.mxu1 %v408_v10  ;;  %v566_v8 = vsel %vm518_vm2, %v262_v7, 0  ;;  %v263_v9 = vld [vmem:[%s246_s29 + $0x8] sm:$0xf] }
  0x1b   : > { %854 = vmatprep.mubr.msk.bf16.mxu0 %vm923_vm0, %v922_v0  ;;  %860 = vmatprep.mubr.msk.bf16.mxu1 %vm923_vm0, %v922_v0  ;;  %v612_v10 = vsel %vm518_vm2, %v263_v9, 0 }
  0x1c   : > { %864 = vmatprep.subr.bf16.mxu0 %v922_v0  ;;  %870 = vmatprep.subr.bf16.mxu1 %v922_v0 }
  0x21   : > { %855 = vmatmul.mubr.msk.bf16.vlgmr.msra.gmra.mrb[4].mxu0 %vm265_vm1, %v255_v11  ;;  %861 = vmatmul.mubr.msk.bf16.vlgmr.msra.gmra.mrb[4].mxu1 %vm265_vm1, %v256_v12  ;;  %v264_v11 = vld [vmem:[%s246_s29 + $0xc] sm:$0xf] }
  0x22   : > { %866 = vmatprep.mubr.msk.bf16.mxu0 %vm923_vm0, %v922_v0  ;;  %872 = vmatprep.mubr.msk.bf16.mxu1 %vm923_vm0, %v922_v0  ;;  %v658_v12 = vsel %vm518_vm2, %v264_v11, 0 }
  0x23   : > { %865 = vmatpush3.bf16.msra.mxu0 %v520_v6  ;;  %871 = vmatpush3.bf16.msra.mxu1 %v566_v8 }
  0x24   : > { %876 = vmatprep.subr.bf16.mxu0 %v922_v0  ;;  %882 = vmatprep.subr.bf16.mxu1 %v922_v0 }
  0xec   : > { %v306_v20 = vpop.f32.mrb[0].mxu0  ;;  %v352_v21 = vpop.f32.mrb[0].mxu1 }
  0xed   : > { %v450_v22 = vmul.f32 0.35355338, %v306_v20  ;;  %v844_v23 = vpop.f32.mrb[1].mxu0  ;;  %v451_v24 = vmul.f32 0.35355338, %v352_v21  ;;  %v850_v25 = vpop.f32.mrb[1].mxu1 }
  0xee   : > { %v309_v26 = vpop.f32.mrb[2].mxu0  ;;  %v355_v27 = vpop.f32.mrb[2].mxu1 }
  0xef   : > { %v845_v28 = vpop.f32.mrb[3].mxu0  ;;  %v851_v29 = vpop.f32.mrb[3].mxu1  ;;  %v463_v30 = vadd.f32 %v461_v19, %v450_v22  ;;  %v464_v31 = vadd.f32 %v461_v19, %v451_v24 }
  0xf1   : > { %v467_v32 = vsel %vm265_vm1, %v463_v30, -inf  ;;  %v470_v33 = vsel %vm265_vm1, %v464_v31, -inf }
  0xf2   : > { %468 = vmax.xlane.f32.xlu0 %v467_v32 }
  0xf4   : > { %v398_v34 = vpop.f32.mrb[4].mxu0  ;;  %v444_v35 = vpop.f32.mrb[4].mxu1 }
  0xf5   : > { %v452_v36 = vmul.f32 0.35355338, %v398_v34  ;;  %v856_v37 = vpop.f32.mrb[5].mxu0  ;;  %v453_v38 = vmul.f32 0.35355338, %v444_v35  ;;  %v862_v39 = vpop.f32.mrb[5].mxu1 }
  0xf6   : > { %v401_v40 = vpop.f32.mrb[6].mxu0  ;;  %471 = vmax.xlane.f32.xlu0 %v470_v33  ;;  %v447_v41 = vpop.f32.mrb[6].mxu1 }
  0xf7   : > { %v857_v42 = vpop.f32.mrb[7].mxu0  ;;  %v863_v43 = vpop.f32.mrb[7].mxu1  ;;  %v465_v44 = vadd.f32 %v461_v19, %v452_v36  ;;  %v466_v45 = vadd.f32 %v461_v19, %v453_v38 }
  0xf9   : > { %v473_v46 = vsel %vm265_vm1, %v465_v44, -inf  ;;  %v476_v47 = vsel %vm265_vm1, %v466_v45, -inf }
  0xfa   : > { %474 = vmax.xlane.f32.xlu1 %v473_v46 }
  0xfe   : > { %477 = vmax.xlane.f32.xlu1 %v476_v47 }
 0x17f   : > { %v469_v48 = vpop.xlane.xlu0 %468 }
 0x180   : > { %v479_v49 = vsub.f32 %v463_v30, %v469_v48 }
 0x182   : > { %v483_v50 = vmul.f32 1.442695, %v479_v49 }
 0x183   : > { %v472_v51 = vpop.xlane.xlu0 %471 }
 0x184   : > { %898 = vpow2.f32 %v483_v50  ;;  %v480_v52 = vsub.f32 %v464_v31, %v472_v51 }
 0x186   : > { %v485_v53 = vmul.f32 1.442695, %v480_v52 }
 0x187   : > { %v475_v54 = vpop.xlane.xlu1 %474 }
 0x188   : > { %900 = vpow2.f32 %v485_v53  ;;  %v481_v55 = vsub.f32 %v465_v44, %v475_v54 }
 0x18a   : > { %v487_v56 = vmul.f32 1.442695, %v481_v55 }
 0x18b   : > { %v478_v57 = vpop.xlane.xlu1 %477 }
 0x18c   : > { %902 = vpow2.f32 %v487_v56  ;;  %v482_v58 = vsub.f32 %v466_v45, %v478_v57 }
 0x18e   : > { %v899_v59 = vpop.eup %898  ;;  %v489_v60 = vmul.f32 1.442695, %v482_v58 }
 0x18f   : > { %v491_v61 = vsel %vm265_vm1, %v899_v59, 0.0 }
 0x190   : > { %904 = vpow2.f32 %v489_v60  ;;  %492 = vadd.xlane.f32.xlu0 %v491_v61 }
 0x192   : > { %v901_v62 = vpop.eup %900 }
 0x193   : > { %v494_v63 = vsel %vm265_vm1, %v901_v62, 0.0 }
 0x194   : > { %495 = vadd.xlane.f32.xlu1 %v494_v63 }
 0x196   : > { %v903_v1 = vpop.eup %902 }
 0x197   : > { %v497_v2 = vsel %vm265_vm1, %v903_v1, 0.0 }
 0x198   : > { %498 = vadd.xlane.f32.xlu0 %v497_v2 }
 0x19a   : > { %v905_v3 = vpop.eup %904 }
 0x19b   : > { %v500_v4 = vsel %vm265_vm1, %v905_v3, 0.0 }
 0x19c   : > { %501 = vadd.xlane.f32.xlu1 %v500_v4 }
 0x21d   : > { %v493_v13 = vpop.xlane.xlu0 %492 }
 0x21e   : > { %906 = vrcp.f32 %v493_v13 }
 0x221   : > { %v496_v14 = vpop.xlane.xlu1 %495 }
 0x222   : > { %908 = vrcp.f32 %v496_v14 }
 0x225   : > { %v499_v15 = vpop.xlane.xlu0 %498 }
 0x226   : > { %910 = vrcp.f32 %v499_v15 }
 0x228   : > { %v907_v16 = vpop.eup %906 }
 0x229   : > { %v507_v17 = vmul.f32 %v907_v16, %v899_v59  ;;  %v502_v18 = vpop.xlane.xlu1 %501 }
 0x22a   : > { %912 = vrcp.f32 %v502_v18 }
 0x22b   : > { %v511_v19 = vpack.c.bf16 %v507_v17, %v507_v17 }
 0x22c   : > { %v909_v20 = vpop.eup %908 }
 0x22d   : > { %v508_v21 = vmul.f32 %v909_v20, %v901_v62  ;;  %867 = vmatmul.mubr.msk.bf16.vlgmr.msra.gmra.mrb[8].mxu0 %vm265_vm1, %v511_v19 }
 0x22e   : > { %877 = vmatpush3.bf16.msra.mxu0 %v612_v10  ;;  %878 = vmatprep.mubr.msk.bf16.mxu0 %vm923_vm0, %v922_v0 }
 0x22f   : > { %v512_v22 = vpack.c.bf16 %v508_v21, %v508_v21 }
 0x230   : > { %v911_v23 = vpop.eup %910 }
 0x231   : > { %v509_v24 = vmul.f32 %v911_v23, %v903_v1  ;;  %873 = vmatmul.mubr.msk.bf16.vlgmr.msra.gmra.mrb[8].mxu1 %vm265_vm1, %v512_v22 }
 0x232   : > { %883 = vmatpush3.bf16.msra.mxu1 %v658_v12  ;;  %884 = vmatprep.mubr.msk.bf16.mxu1 %vm923_vm0, %v922_v0 }
 0x233   : > { %v513_v25 = vpack.c.bf16 %v509_v24, %v509_v24 }
 0x234   : > { %v913_v26 = vpop.eup %912 }
 0x235   : > { %v510_v27 = vmul.f32 %v913_v26, %v905_v3  ;;  %879 = vmatmul.mubr.msk.bf16.vlgmr.msra.gmra.mrb[12].mxu0 %vm265_vm1, %v513_v25 }
 0x237   : > { %v514_v28 = vpack.c.bf16 %v510_v27, %v510_v27 }
 0x239   : > { %885 = vmatmul.mubr.msk.bf16.vlgmr.msra.gmra.mrb[12].mxu1 %vm265_vm1, %v514_v28 }
 0x300   : > { %v556_v29 = vpop.f32.mrb[8].mxu0 }
 0x301   : > { %v700_v30 = vpack.c.bf16 %v556_v29, %v556_v29  ;;  %v868_v31 = vpop.f32.mrb[9].mxu0 }
 0x302   : > { %v559_v32 = vpop.f32.mrb[10].mxu0 }
 0x303   : > { %705 = vst.msk [vmem:[%s251_s6] sm:$0xf] %vm704_vm3, %v700_v30  ;;  %v869_v0 = vpop.f32.mrb[11].mxu0 }
 0x304   : > { %v602_v33 = vpop.f32.mrb[8].mxu1 }
 0x305   : > { %v701_v34 = vpack.c.bf16 %v602_v33, %v602_v33  ;;  %v874_v35 = vpop.f32.mrb[9].mxu1 }
 0x306   : > { %v605_v36 = vpop.f32.mrb[10].mxu1 }
 0x307   : > { %706 = vst.msk [vmem:[%s251_s6 + $0x4] sm:$0xf] %vm704_vm3, %v701_v34  ;;  %v875_v37 = vpop.f32.mrb[11].mxu1 }
 0x308   : > { %v648_v38 = vpop.f32.mrb[12].mxu0 }
 0x309   : > { %v702_v39 = vpack.c.bf16 %v648_v38, %v648_v38  ;;  %v880_v40 = vpop.f32.mrb[13].mxu0 }
 0x30a   : > { %v651_v41 = vpop.f32.mrb[14].mxu0 }
 0x30b   : > { %707 = vst.msk [vmem:[%s251_s6 + $0x8] sm:$0xf] %vm704_vm3, %v702_v39  ;;  %v881_v42 = vpop.f32.mrb[15].mxu0 }
 0x30c   : > { %v694_v43 = vpop.f32.mrb[12].mxu1 }
 0x30d   : > { %v703_v44 = vpack.c.bf16 %v694_v43, %v694_v43  ;;  %v886_v45 = vpop.f32.mrb[13].mxu1 }
 0x30e   : > { %v697_v46 = vpop.f32.mrb[14].mxu1 }
 0x30f   : > { %708 = vst.msk [vmem:[%s251_s6 + $0xc] sm:$0xf] %vm704_vm3, %v703_v44  ;;  %v887_v47 = vpop.f32.mrb[15].mxu1 }
 0x310 PF: > { %s14_s15 = sadd.s32 1, %s920_s15  }
 0x311   : > { %p11_p4 = scmp.ge.s32.totalorder %s14_s15, 4  }
 0x313   :  { %13 = sbr.rel (!%p11_p4) target bundleno = 1 (0x1), region = 75 }

// kernel: recipe_encoder_forward.23
= control target key start
LH: loop header
LB: loop body
LE: loop exit
PB: predicated region body
PF: predicated region fallthrough
CT: control target
= control target key end

     0   :  { %s517_s21 = smov 0   ;;  %s560_s0 = inlined_call_operand.vmem [shape: bf16[16,32], index: 0, kind: input, shape index: {}]   ;;  %s561_s1 = inlined_call_operand.vmem [shape: bf16[32,32], index: 1, kind: input, shape index: {}]   ;;  %s562_s2 = inlined_call_operand.vmem [shape: f32[1,32], index: 2, kind: input, shape index: {}]   ;;  %s563_s3 = inlined_call_operand.vmem [shape: f32[16,32], index: 3, kind: input, shape index: {}]   ;;  %s564_s4 = inlined_call_operand.vmem [shape: f32[1,32], index: 4, kind: input, shape index: {}]   ;;  %s565_s5 = inlined_call_operand.vmem [shape: f32[1,32], index: 5, kind: input, shape index: {}]   ;;  %s566_s6 = inlined_call_operand.vmem [shape: f32[16,32], index: 6, kind: output, shape index: {}]  }
   0x1 LB: > { %s431_s22 = sadd.s32 4294967295, %s478_s21   ;;  %p435_p0 = scmp.ge.s32.totalorder %s478_s21, 1  ;;  %s478_s21 = sphi %s517_s21, %s16_s21  }
   0x2   : > { %p220_p1 = scmp.lt.s32.totalorder %s478_s21, 3 }
   0x4   : > { %p221_p2 = pnand %p435_p0, %p220_p1 }
   0x5   : > { %v468_v0 = vld [vmem:[%s561_s1] sm:$0xff] (!%p221_p2)   ;;  %v480_v1 = vmov (!%p221_p2), 0.0   ;;  %v469_v2 = vld [vmem:[%s561_s1 + $0x8] sm:$0xff] (!%p221_p2)   ;;  %vm481_vm0 = vmmov (!%p221_p2), 0   ;;  %p252_p3 = scmp.lt.s32.totalorder (!%p221_p2), %s431_s22, 1  ;;  %vm289_vm1 = vcmask (!%p221_p2), 261120  }
   0x6   : > { %224 = sbr.rel (%p221_p2) target bundleno = 547 (0x223), region = 44  ;;  %450 = vmatprep.subr.bf16.mxu0 (!%p221_p2), %v480_v1  ;;  %454 = vmatprep.mubr.msk.bf16.mxu0 (!%p221_p2), %vm481_vm0, %v480_v1  ;;  %v439_v4 = vld [vmem:[%s562_s2] ss:$0 sm:$0xff] (!%p221_p2) }
   0x7   : > { %451 = vmatpush3.bf16.msra.mxu0 (!%p221_p2), %v468_v0  ;;  %v443_v22 = vld [vmem:[%s564_s4] ss:$0 sm:$0xff] (!%p221_p2) }
   0x8   : > { %452 = vmatprep.subr.bf16.mxu0 (!%p221_p2), %v480_v1  ;;  %v444_v24 = vld [vmem:[%s565_s5] ss:$0 sm:$0xff] (!%p221_p2) }
   0xb   : > { %453 = vmatpush3.bf16.msra.mxu0 (!%p221_p2), %v469_v2 }
   0xd   : > { %s568_s22 = smov (!%p252_p3, %s431_s22), 1 }
   0xe   : > { %s436_s27 = sshll.u32 %s568_s22, 2  ;;  %s437_s7 = sshll.u32 %s568_s22, 3 }
   0xf   : > { %s255_s30 = scalar_lea.vmem %s560_s0, %s436_s27  ;;  %s259_s10 = scalar_lea.vmem %s563_s3, %s437_s7 }
  0x10   : > { %v265_v3 = vld [vmem:[%s255_s30] sm:$0xf]  ;;  %s263_s19 = scalar_lea.vmem %s566_s6, %s437_s7 }
  0x11   : > { %455 = vmatmul.mubr.msk.bf16.vlgmr.msra.gmra.mrb[0].mxu0 %vm289_vm1, %v265_v3  ;;  %v333_v6 = vld [vmem:[%s259_s10] sm:$0xff] }
  0xe4   : > { %v327_v5 = vpop.f32.mrb[0].mxu0 }
  0xe5   : > { %v328_v7 = vadd.f32 %v439_v4, %v327_v5  ;;  %v456_v8 = vpop.f32.mrb[1].mxu0 }
  0xe6   : > { %v330_v9 = vpop.f32.mrb[2].mxu0 }
  0xe7   : > { %v457_v10 = vpop.f32.mrb[3].mxu0  ;;  %v334_v11 = vadd.f32 %v333_v6, %v328_v7 }
  0xe9   : > { %v335_v12 = vsel %vm289_vm1, %v334_v11, 0.0 }
  0xea   : > { %336 = vadd.xlane.f32.xlu0 %v335_v12 }
 0x177   : > { %v337_v13 = vpop.xlane.xlu0 %336 }
 0x178   : > { %v339_v14 = vmul.f32 0.03125, %v337_v13 }
 0x17a   : > { %v340_v15 = vsub.f32 %v334_v11, %v339_v14 }
 0x17c   : > { %v341_v16 = vmul.f32 %v340_v15, %v340_v15 }
 0x17e   : > { %v342_v17 = vsel %vm289_vm1, %v341_v16, 0.0 }
 0x17f   : > { %343 = vadd.xlane.f32.xlu0 %v342_v17 }
 0x20c   : > { %v344_v18 = vpop.xlane.xlu0 %343 }
 0x20d   : > { %v345_v19 = vmul.f32 0.03125, %v344_v18 }
 0x20f   : > { %v346_v20 = vadd.f32 1e-05, %v345_v19 }
 0x211   : > { %470 = vrsqrt.f32 %v346_v20 }
 0x21b   : > { %v471_v21 = vpop.eup %470 }
 0x21c   : > { %v348_v23 = vmul.f32 %v471_v21, %v340_v15 }
 0x21e   : > { %v356_v25 = vmul.f32 %v443_v22, %v348_v23 }
 0x220   : > { %v364_v26 = vadd.f32 %v444_v24, %v356_v25 }
 0x222   : > { %365 = vst.msk [vmem:[%s263_s19] sm:$0xff] %vm289_vm1, %v364_v26 }
 0x223 PF: > { %s16_s21 = sadd.s32 1, %s478_s21  }
 0x224   : > { %p13_p4 = scmp.ge.s32.totalorder %s16_s21, 4  }
 0x226   :  { %15 = sbr.rel (!%p13_p4) target bundleno = 1 (0x1), region = 77 }

// kernel: recipe_encoder_forward.25
= control target key start
LH: loop header
LB: loop body
LE: loop exit
PB: predicated region body
PF: predicated region fallthrough
CT: control target
= control target key end

     0   :  { %vm20_vm0 = vcmask 64512   ;;  %v24_v0 = vlaneseq  ;;  %vm88_vm1 = vcmask 261120   ;;  %vm180_vm2 = vcmask 1041409   ;;  %s262_s0 = inlined_call_operand.vmem [shape: f32[8,8], index: 0, kind: input, shape index: {}]   ;;  %s263_s1 = inlined_call_operand.vmem [shape: f32[8,8,32], index: 1, kind: input, shape index: {}]   ;;  %s264_s2 = inlined_call_operand.vmem [shape: f32[8,32], index: 2, kind: output, shape index: {}]  }
   0x1   :  { %v11_v1 = vld [vmem:[%s262_s0] sm:$0xff]  ;;  %v14_v23 = vld [vmem:[%s263_s1 + $0x10] sm:$0xff]  ;;  %v15_v25 = vld [vmem:[%s263_s1 + $0x18] sm:$0xff]  ;;  %vm183_vm3 = vcmask 1042434   ;;  %vm186_vm4 = vcmask 1043459   ;;  %vm189_vm5 = vcmask 1044484  }
   0x2   :  { %v21_v2 = vsel %vm20_vm0, %v11_v1, 0.0  ;;  %v25_v3 = vshrl.u32 %v24_v0, 7  ;;  %v12_v24 = vld [vmem:[%s263_s1] sm:$0xff]  ;;  %v17_v30 = vld [vmem:[%s263_s1 + $0x28] sm:$0xff]  ;;  %v18_v37 = vld [vmem:[%s263_s1 + $0x30] sm:$0xff]  ;;  %vm192_vm6 = vcmask 1045509  }
   0x3   :  { %22 = vadd.xlane.f32.xlu0 %v21_v2  ;;  %v16_v27 = vld [vmem:[%s263_s1 + $0x20] sm:$0xff]  ;;  %v19_v47 = vld [vmem:[%s263_s1 + $0x38] sm:$0xff]  ;;  %v13_v54 = vld [vmem:[%s263_s1 + $0x8] sm:$0xff]  ;;  %vm195_vm7 = vcmask 1046534   ;;  %vm198_vm8 = vcmask 1047559  }
   0x4   :  { %v40_v4 = vsub.s32 2, %v25_v3  ;;  %v26_v5 = vsub.s32 0, %v25_v3  ;;  %v47_v8 = vsub.s32 3, %v25_v3  ;;  %v54_v10 = vsub.s32 4, %v25_v3 }
   0x5   :  { %v61_v12 = vsub.s32 5, %v25_v3  ;;  %v33_v13 = vsub.s32 1, %v25_v3  ;;  %v68_v15 = vsub.s32 6, %v25_v3  ;;  %v75_v18 = vsub.s32 7, %v25_v3 }
   0x6   :  { %v41_v6 = vrot.slane %v11_v1, %v40_v4  ;;  %v27_v7 = vrot.slane %v11_v1, %v26_v5  ;;  %v48_v9 = vrot.slane %v11_v1, %v47_v8  ;;  %v55_v11 = vrot.slane %v11_v1, %v54_v10 }
   0x7   :  { %v62_v14 = vrot.slane %v11_v1, %v61_v12  ;;  %v34_v16 = vrot.slane %v11_v1, %v33_v13  ;;  %v69_v17 = vrot.slane %v11_v1, %v68_v15  ;;  %v76_v19 = vrot.slane %v11_v1, %v75_v18 }
   0x8   :  { %43 = vbcast.lane.b32.xlu1 %v41_v6, 256 }
   0xc   :  { %29 = vbcast.lane.b32.xlu1 %v27_v7, 256 }
  0x10   :  { %50 = vbcast.lane.b32.xlu1 %v48_v9, 256 }
  0x14   :  { %57 = vbcast.lane.b32.xlu1 %v55_v11, 256 }
  0x18   :  { %64 = vbcast.lane.b32.xlu1 %v62_v14, 256 }
  0x19   :  { %36 = vbcast.lane.b32.xlu0 %v34_v16, 256 }
  0x1c   :  { %71 = vbcast.lane.b32.xlu1 %v69_v17, 256 }
  0x20   :  { %78 = vbcast.lane.b32.xlu1 %v76_v19, 256 }
  0x7a   :  { %v44_v20 = vpop.permute.xlu1 %43 }
  0x7b   :  { %v82_v28 = vmul.f32 %v44_v20, %v14_v23 }
  0x7d   :  { %v103_v35 = vsel %vm88_vm1, %v82_v28, 0.0 }
  0x7e   :  { %v30_v21 = vpop.permute.xlu1 %29  ;;  %v104_v41 = vrot.slane %v103_v35, 4 }
  0x7f   :  { %v80_v29 = vmul.f32 %v30_v21, %v12_v24 }
  0x80   :  { %v105_v55 = vadd.f32 %v104_v41, %v103_v35 }
  0x81   :  { %v89_v36 = vsel %vm88_vm1, %v80_v29, 0.0 }
  0x82   :  { %v51_v22 = vpop.permute.xlu1 %50  ;;  %v90_v42 = vrot.slane %v89_v36, 4  ;;  %v106_v2 = vrot.slane %v105_v55, 2 }
  0x83   :  { %v83_v31 = vmul.f32 %v51_v22, %v15_v25 }
  0x84   :  { %v91_v56 = vadd.f32 %v90_v42, %v89_v36  ;;  %v107_v13 = vadd.f32 %v106_v2, %v105_v55 }
  0x85   :  { %v110_v38 = vsel %vm88_vm1, %v83_v31, 0.0 }
  0x86   :  { %v58_v26 = vpop.permute.xlu1 %57  ;;  %v111_v45 = vrot.slane %v110_v38, 4  ;;  %v92_v3 = vrot.slane %v91_v56, 2  ;;  %v108_v22 = vrot.slane %v107_v13, 1 }
  0x87   :  { %v84_v32 = vmul.f32 %v58_v26, %v16_v27 }
  0x88   :  { %v112_v58 = vadd.f32 %v111_v45, %v110_v38  ;;  %v93_v14 = vadd.f32 %v92_v3, %v91_v56 }
  0x89   :  { %v117_v39 = vsel %vm88_vm1, %v84_v32, 0.0 }
  0x8a   :  { %v65_v33 = vpop.permute.xlu1 %64  ;;  %v118_v48 = vrot.slane %v117_v39, 4  ;;  %v113_v5 = vrot.slane %v112_v58, 2  ;;  %v94_v23 = vrot.slane %v93_v14, 1 }
  0x8b   :  { %v85_v34 = vmul.f32 %v65_v33, %v17_v30  ;;  %v109_v33 = vadd.f32 %v108_v22, %v107_v13 }
  0x8c   :  { %v119_v60 = vadd.f32 %v118_v48, %v117_v39  ;;  %v114_v15 = vadd.f32 %v113_v5, %v112_v58 }
  0x8d   :  { %v124_v43 = vsel %vm88_vm1, %v85_v34, 0.0  ;;  %v95_v34 = vadd.f32 %v94_v23, %v93_v14 }
  0x8e   :  { %v72_v40 = vpop.permute.xlu1 %71  ;;  %v125_v51 = vrot.slane %v124_v43, 4  ;;  %v120_v8 = vrot.slane %v119_v60, 2  ;;  %v115_v24 = vrot.slane %v114_v15, 1 }
  0x8f   :  { %v86_v44 = vmul.f32 %v72_v40, %v18_v37 }
  0x90   :  { %v23_v46 = vpop.xlane.xlu0 %22  ;;  %v126_v0 = vadd.f32 %v125_v51, %v124_v43  ;;  %v121_v17 = vadd.f32 %v120_v8, %v119_v60  ;;  %v116_v36 = vadd.f32 %v115_v24, %v114_v15 }
  0x91   :  { %v131_v49 = vsel %vm88_vm1, %v86_v44, 0.0  ;;  %v145_v50 = vadd.f32 1e-12, %v23_v46 }
  0x92   :  { %v132_v52 = vrot.slane %v131_v49, 4  ;;  %v79_v53 = vpop.permute.xlu1 %78  ;;  %v127_v10 = vrot.slane %v126_v0, 2  ;;  %v122_v26 = vrot.slane %v121_v17, 1 }
  0x93   :  { %v87_v57 = vmul.f32 %v79_v53, %v19_v47  ;;  %206 = vrcp.f32 %v145_v50 }
  0x94   :  { %v37_v59 = vpop.permute.xlu0 %36  ;;  %v133_v61 = vadd.f32 %v132_v52, %v131_v49  ;;  %v128_v20 = vadd.f32 %v127_v10, %v126_v0  ;;  %v123_v40 = vadd.f32 %v122_v26, %v121_v17 }
  0x95   :  { %v138_v62 = vsel %vm88_vm1, %v87_v57, 0.0  ;;  %v81_v63 = vmul.f32 %v37_v59, %v13_v54 }
  0x96   :  { %v139_v1 = vrot.slane %v138_v62, 4  ;;  %v134_v9 = vrot.slane %v133_v61, 2  ;;  %v129_v29 = vrot.slane %v128_v20, 1 }
  0x97   :  { %v96_v4 = vsel %vm88_vm1, %v81_v63, 0.0 }
  0x98   :  { %v140_v6 = vadd.f32 %v139_v1, %v138_v62  ;;  %v97_v7 = vrot.slane %v96_v4, 4  ;;  %v135_v18 = vadd.f32 %v134_v9, %v133_v61  ;;  %v130_v44 = vadd.f32 %v129_v29, %v128_v20 }
  0x9a   :  { %v141_v11 = vrot.slane %v140_v6, 2  ;;  %v98_v12 = vadd.f32 %v97_v7, %v96_v4  ;;  %v136_v27 = vrot.slane %v135_v18, 1 }
  0x9c   :  { %v99_v16 = vrot.slane %v98_v12, 2  ;;  %v142_v21 = vadd.f32 %v141_v11, %v140_v6  ;;  %v137_v41 = vadd.f32 %v136_v27, %v135_v18 }
  0x9d   :  { %v207_v19 = vpop.eup %206 }
  0x9e   :  { %v100_v25 = vadd.f32 %v99_v16, %v98_v12  ;;  %v149_v28 = vrot.slane %v207_v19, 2  ;;  %v143_v30 = vrot.slane %v142_v21, 1  ;;  %v150_v31 = vrot.slane %v207_v19, 3 }
  0x9f   :  { %v151_v35 = vrot.slane %v207_v19, 4  ;;  %v148_v37 = vrot.slane %v207_v19, 1  ;;  %v152_v38 = vrot.slane %v207_v19, 5  ;;  %v153_v42 = vrot.slane %v207_v19, 6 }
  0xa0   :  { %v101_v32 = vrot.slane %v100_v25, 1  ;;  %v165_v43 = vmul.f32 %v149_v28, %v109_v33  ;;  %v144_v45 = vadd.f32 %v143_v30, %v142_v21  ;;  %v166_v46 = vmul.f32 %v150_v31, %v116_v36 }
  0xa1   :  { %v167_v48 = vmul.f32 %v151_v35, %v123_v40  ;;  %v154_v49 = vrot.slane %v207_v19, 7  ;;  %v163_v50 = vmul.f32 %v207_v19, %v95_v34  ;;  %v168_v51 = vmul.f32 %v152_v38, %v130_v44 }
  0xa2   :  { %v102_v39 = vadd.f32 %v101_v32, %v100_v25  ;;  %v169_v53 = vmul.f32 %v153_v42, %v137_v41  ;;  %v182_v54 = vrot.slane %v165_v43, 6  ;;  %v185_v56 = vrot.slane %v166_v46, 5 }
  0xa3   :  { %v170_v55 = vmul.f32 %v154_v49, %v144_v45  ;;  %v188_v58 = vrot.slane %v167_v48, 4  ;;  %v191_v60 = vrot.slane %v168_v51, 3 }
  0xa4   :  { %v164_v47 = vmul.f32 %v148_v37, %v102_v39  ;;  %v194_v62 = vrot.slane %v169_v53, 2 }
  0xa5   :  { %v197_v0 = vrot.slane %v170_v55, 1 }
  0xa6   :  { %v179_v52 = vrot.slane %v164_v47, 7 }
  0xa8   :  { %v181_v57 = vsel %vm180_vm2, %v179_v52, %v163_v50 }
  0xa9   :  { %v184_v59 = vsel %vm183_vm3, %v182_v54, %v181_v57 }
  0xaa   :  { %v187_v61 = vsel %vm186_vm4, %v185_v56, %v184_v59 }
  0xab   :  { %v190_v63 = vsel %vm189_vm5, %v188_v58, %v187_v61 }
  0xac   :  { %v193_v1 = vsel %vm192_vm6, %v191_v60, %v190_v63 }
  0xad   :  { %v196_v2 = vsel %vm195_vm7, %v194_v62, %v193_v1 }
  0xae   :  { %v199_v3 = vsel %vm198_vm8, %v197_v0, %v196_v2 }
  0xaf   :  { %201 = vst.msk [vmem:[%s264_s2] sm:$0xff] %vm88_vm1, %v199_v3 }

// kernel: recipe_encoder_forward.24
= control target key start
LH: loop header
LB: loop body
LE: loop exit
PB: predicated region body
PF: predicated region fallthrough
CT: control target
= control target key end

     0   :  { %s2906_s24 = smov 0   ;;  %s3500_s0 = inlined_call_operand.vmem [shape: f32[16,32], index: 0, kind: input, shape index: {}]   ;;  %s3501_s1 = inlined_call_operand.vmem [shape: bf16[32,2048], index: 1, kind: input, shape index: {}]   ;;  %s3502_s2 = inlined_call_operand.vmem [shape: f32[1,2048], index: 2, kind: input, shape index: {}]   ;;  %s3503_s3 = inlined_call_operand.vmem [shape: bf16[2048,32], index: 3, kind: input, shape index: {}]   ;;  %s3504_s4 = inlined_call_operand.vmem [shape: f32[1,32], index: 4, kind: input, shape index: {}]   ;;  %s3505_s5 = inlined_call_operand.vmem [shape: f32[1,32], index: 5, kind: input, shape index: {}]   ;;  %s3506_s6 = inlined_call_operand.vmem [shape: f32[1,32], index: 6, kind: input, shape index: {}]   ;;  %s3507_s7 = inlined_call_operand.vmem [shape: f32[16,32], index: 7, kind: output, shape index: {}]  }
   0x1 LB: > { %s2361_s25 = sadd.s32 4294967295, %s2863_s24   ;;  %p2365_p0 = scmp.ge.s32.totalorder %s2863_s24, 1  ;;  %s2863_s24 = sphi %s2906_s24, %s17_s24  }
   0x2   : > { %p236_p1 = scmp.lt.s32.totalorder %s2863_s24, 3 }
   0x4   : > { %p237_p2 = pnand %p2365_p0, %p236_p1 }
   0x5   : > { %v285_v0 = vld [vmem:[%s3501_s1] sm:$0xff] (!%p237_p2)  ;;  %v286_v2 = vld [vmem:[%s3501_s1 + $0x8] sm:$0xff] (!%p237_p2)  ;;  %p2923_p3 = scmp.lt.s32.totalorder (!%p237_p2), %s2361_s25, 1  ;;  %v2865_v8 = vmov (!%p237_p2), 0   ;;  %vm419_vm0 = vcmask (!%p237_p2), 261120   ;;  %v2734_v27 = vld [vmem:[%s3503_s3 + $0x50] sm:$0xff] (!%p237_p2)   ;;  %v359_v59 = vlaneseq (!%p237_p2) }
   0x6   : > { %240 = sbr.rel (%p237_p2) target bundleno = 1456 (0x5b0), region = 48  ;;  %v287_v1 = vld [vmem:[%s3501_s1 + $0x40] sm:$0xff] (!%p237_p2)  ;;  %v288_v4 = vld [vmem:[%s3501_s1 + $0x48] sm:$0xff] (!%p237_p2)  ;;  %455 = vmatprep.mubr.bf16.mxu0 (!%p237_p2), %v2865_v8  ;;  %496 = vmatprep.mubr.bf16.mxu1 (!%p237_p2), %v2865_v8  ;;  %v2735_v28 = vld [vmem:[%s3503_s3 + $0xd0] sm:$0xff] (!%p237_p2)  }
   0x7   : > { %v2370_v3 = vcombine.high (!%p237_p2), %v285_v0, %v287_v1  ;;  %v2369_v5 = vcombine.low (!%p237_p2), %v285_v0, %v287_v1  ;;  %v289_v6 = vld [vmem:[%s3501_s1 + $0x80] sm:$0xff] (!%p237_p2)  ;;  %v2372_v9 = vcombine.high (!%p237_p2), %v286_v2, %v288_v4  ;;  %v2371_v10 = vcombine.low (!%p237_p2), %v286_v2, %v288_v4  ;;  %v290_v12 = vld [vmem:[%s3501_s1 + $0x88] sm:$0xff] (!%p237_p2)  ;;  %v2736_v29 = vld [vmem:[%s3503_s3 + $0x10] sm:$0xff] (!%p237_p2)  }
   0x8   : > { %v291_v7 = vld [vmem:[%s3501_s1 + $0xc0] sm:$0xff] (!%p237_p2)  ;;  %v292_v13 = vld [vmem:[%s3501_s1 + $0xc8] sm:$0xff] (!%p237_p2)  ;;  %v2737_v30 = vld [vmem:[%s3503_s3 + $0x90] sm:$0xff] (!%p237_p2)   ;;  %v360_v60 = vshrl.u32 (!%p237_p2), %v359_v59, 7 }
   0x9   : > { %v2374_v11 = vcombine.high (!%p237_p2), %v289_v6, %v291_v7  ;;  %423 = vmatprep.subr.bf16.mxu0 (!%p237_p2), %v2370_v3  ;;  %v2376_v14 = vcombine.high (!%p237_p2), %v290_v12, %v292_v13  ;;  %464 = vmatprep.subr.bf16.mxu1 (!%p237_p2), %v2372_v9  ;;  %v2373_v15 = vcombine.low (!%p237_p2), %v289_v6, %v291_v7  ;;  %v2726_v16 = vld [vmem:[%s3503_s3 + $0x40] sm:$0xff] (!%p237_p2)   ;;  %v2730_v23 = vld [vmem:[%s3503_s3 + $0x48] sm:$0xff] (!%p237_p2)   ;;  %v2738_v31 = vld [vmem:[%s3503_s3 + $0x58] sm:$0xff] (!%p237_p2)  }
   0xa   : > { %424 = vmatpush1.bf16.msra.mxu0 (!%p237_p2), %v2369_v5  ;;  %465 = vmatpush1.bf16.msra.mxu1 (!%p237_p2), %v2371_v10  ;;  %v2375_v17 = vcombine.low (!%p237_p2), %v290_v12, %v292_v13  ;;  %v2727_v18 = vld [vmem:[%s3503_s3 + $0xc0] sm:$0xff] (!%p237_p2)   ;;  %v2731_v24 = vld [vmem:[%s3503_s3 + $0xc8] sm:$0xff] (!%p237_p2)   ;;  %v2739_v32 = vld [vmem:[%s3503_s3 + $0xd8] sm:$0xff] (!%p237_p2)   ;;  %v3071_v61 = vsub.s32 (!%p237_p2), 0, %v360_v60  ;;  %v3076_v63 = vsub.s32 (!%p237_p2), 2, %v360_v60  ;;  %v3078_v0 = vsub.s32 (!%p237_p2), 1, %v360_v60 }
   0xb   : > { %425 = vmatprep.subr.bf16.mxu0 (!%p237_p2), %v2374_v11  ;;  %466 = vmatprep.subr.bf16.mxu1 (!%p237_p2), %v2376_v14  ;;  %v2728_v20 = vld [vmem:[%s3503_s3] sm:$0xff] (!%p237_p2)   ;;  %v2732_v25 = vld [vmem:[%s3503_s3 + $0x8] sm:$0xff] (!%p237_p2)   ;;  %v2740_v33 = vld [vmem:[%s3503_s3 + $0x18] sm:$0xff] (!%p237_p2)   ;;  %v3080_v1 = vsub.s32 (!%p237_p2), 3, %v360_v60 }
   0xc   : > { %v2729_v22 = vld [vmem:[%s3503_s3 + $0x80] sm:$0xff] (!%p237_p2)   ;;  %v2733_v26 = vld [vmem:[%s3503_s3 + $0x88] sm:$0xff] (!%p237_p2)   ;;  %v2741_v34 = vld [vmem:[%s3503_s3 + $0x98] sm:$0xff] (!%p237_p2)  }
   0xd   : > { %s3510_s25 = smov (!%p2923_p3, %s2361_s25), 1  ;;  %v2742_v35 = vld [vmem:[%s3503_s3 + $0x60] sm:$0xff]   ;;  %v2746_v39 = vld [vmem:[%s3503_s3 + $0x68] sm:$0xff]   ;;  %v2750_v43 = vld [vmem:[%s3503_s3 + $0x70] sm:$0xff]  }
   0xe   : > { %s2366_s20 = sshll.u32 %s3510_s25, 3  ;;  %426 = vmatpush1.bf16.msra.mxu0 %v2373_v15  ;;  %467 = vmatpush1.bf16.msra.mxu1 %v2375_v17  ;;  %v2743_v36 = vld [vmem:[%s3503_s3 + $0xe0] sm:$0xff]   ;;  %v2747_v40 = vld [vmem:[%s3503_s3 + $0xe8] sm:$0xff]   ;;  %v2751_v44 = vld [vmem:[%s3503_s3 + $0xf0] sm:$0xff]  }
   0xf   : > { %s2957_s27 = scalar_lea.vmem %s3500_s0, %s2366_s20  ;;  %2541 = vmatprep.subr.bf16.mxu0 %v2726_v16  ;;  %2563 = vmatprep.subr.bf16.mxu1 %v2727_v18  ;;  %v2744_v37 = vld [vmem:[%s3503_s3 + $0x20] sm:$0xff]   ;;  %v2748_v41 = vld [vmem:[%s3503_s3 + $0x28] sm:$0xff]   ;;  %v2752_v45 = vld [vmem:[%s3503_s3 + $0x30] sm:$0xff]  }
  0x10   : > { %v275_v19 = vld [vmem:[%s2957_s27] sm:$0xff]  ;;  %v2749_v42 = vld [vmem:[%s3503_s3 + $0xa8] sm:$0xff]   ;;  %v2753_v46 = vld [vmem:[%s3503_s3 + $0xb0] sm:$0xff]  }
  0x11   : > { %v2966_v21 = vpack.c.bf16 %v275_v19, %v275_v19  ;;  %v2745_v38 = vld [vmem:[%s3503_s3 + $0xa0] sm:$0xff]   ;;  %v2754_v47 = vld [vmem:[%s3503_s3 + $0x78] sm:$0xff]   ;;  %v786_v51 = vld [vmem:[%s3501_s1 + $0x10] sm:$0xff] }
  0x12   : > { %v2755_v48 = vld [vmem:[%s3503_s3 + $0xf8] sm:$0xff]   ;;  %v788_v52 = vld [vmem:[%s3501_s1 + $0x50] sm:$0xff]  ;;  %v293_v62 = vld [vmem:[%s3502_s2] sm:$0xf] }
  0x13   : > { %2377 = vmatmul.mubr.msk.bf16.vlgmr.msra.gmra.mrb[0].mxu0 %vm419_vm0, %v2966_v21  ;;  %2378 = vmatmul.mubr.msk.bf16.vlgmr.msra.gmra.mrb[0].mxu1 %vm419_vm0, %v2966_v21  ;;  %v2756_v49 = vld [vmem:[%s3503_s3 + $0x38] sm:$0xff]   ;;  %v2412_v54 = vcombine.high %v786_v51, %v788_v52  ;;  %v2411_v56 = vcombine.low %v786_v51, %v788_v52  ;;  %v362_v2 = vrot.slane %v293_v62, %v3071_v61  ;;  %v2774_v52 = vld [vmem:[%s3503_s3 + $0x160] sm:$0xff]   ;;  %v2781_v59 = vld [vmem:[%s3503_s3 + $0x1a8] sm:$0xff]  }
  0x14   : > { %2542 = vmatpush3.bf16.msra.mxu0 %v2728_v20  ;;  %2564 = vmatpush3.bf16.msra.mxu1 %v2729_v22  ;;  %v2757_v50 = vld [vmem:[%s3503_s3 + $0xb8] sm:$0xff]   ;;  %v370_v3 = vrot.slane %v293_v62, %v3076_v63  ;;  %v366_v4 = vrot.slane %v293_v62, %v3078_v0  ;;  %v374_v5 = vrot.slane %v293_v62, %v3080_v1  ;;  %v2782_v60 = vld [vmem:[%s3503_s3 + $0x170] sm:$0xff]  }
  0x15   : > { %2543 = vmatprep.subr.bf16.mxu0 %v2730_v23  ;;  %2565 = vmatprep.subr.bf16.mxu1 %v2731_v24  ;;  %v787_v53 = vld [vmem:[%s3501_s1 + $0x18] sm:$0xff]  ;;  %v790_v23 = vld [vmem:[%s3501_s1 + $0x90] sm:$0xff] }
  0x16   : > { %v789_v55 = vld [vmem:[%s3501_s1 + $0x58] sm:$0xff]  ;;  %v792_v24 = vld [vmem:[%s3501_s1 + $0xd0] sm:$0xff] }
  0x17   : > { %v2413_v57 = vcombine.low %v787_v53, %v789_v55  ;;  %v2414_v58 = vcombine.high %v787_v53, %v789_v55  ;;  %v2773_v51 = vld [vmem:[%s3503_s3 + $0x198] sm:$0xff]   ;;  %v2775_v53 = vld [vmem:[%s3503_s3 + $0x1e0] sm:$0xff]   ;;  %v2783_v62 = vld [vmem:[%s3503_s3 + $0x1f0] sm:$0xff]  }
  0x18   : > { %2544 = vmatpush3.bf16.msra.mxu0 %v2732_v25  ;;  %2566 = vmatpush3.bf16.msra.mxu1 %v2733_v26  ;;  %v791_v26 = vld [vmem:[%s3501_s1 + $0x98] sm:$0xff]  ;;  %v2777_v55 = vld [vmem:[%s3503_s3 + $0x1a0] sm:$0xff]  }
  0x19   : > { %2545 = vmatprep.subr.bf16.mxu0 %v2734_v27  ;;  %2567 = vmatprep.subr.bf16.mxu1 %v2735_v28  ;;  %v793_v27 = vld [vmem:[%s3501_s1 + $0xd8] sm:$0xff] }
  0x1c   : > { %2546 = vmatpush3.bf16.msra.mxu0 %v2736_v29  ;;  %2568 = vmatpush3.bf16.msra.mxu1 %v2737_v30 }
  0x1d   : > { %2547 = vmatprep.subr.bf16.mxu0 %v2738_v31  ;;  %2569 = vmatprep.subr.bf16.mxu1 %v2739_v32  ;;  %v2416_v31 = vcombine.high %v790_v23, %v792_v24 }
  0x20   : > { %2548 = vmatpush3.bf16.msra.mxu0 %v2740_v33  ;;  %2570 = vmatpush3.bf16.msra.mxu1 %v2741_v34  ;;  %v2418_v33 = vcombine.high %v791_v26, %v793_v27  ;;  %v2415_v34 = vcombine.low %v790_v23, %v792_v24  ;;  %v794_v24 = vld [vmem:[%s3502_s2 + $0x4] sm:$0xf] }
  0x21   : > { %2549 = vmatprep.subr.bf16.mxu0 %v2742_v35  ;;  %2571 = vmatprep.subr.bf16.mxu1 %v2743_v36  ;;  %v2417_v35 = vcombine.low %v791_v26, %v793_v27  ;;  %v2758_v36 = vld [vmem:[%s3503_s3 + $0x140] sm:$0xff]  }
  0x24   : > { %2550 = vmatpush3.bf16.msra.mxu0 %v2744_v37  ;;  %2572 = vmatpush3.bf16.msra.mxu1 %v2745_v38  ;;  %v2759_v37 = vld [vmem:[%s3503_s3 + $0x1c0] sm:$0xff]  }
  0x25   : > { %2551 = vmatprep.subr.bf16.mxu0 %v2746_v39  ;;  %2573 = vmatprep.subr.bf16.mxu1 %v2747_v40  ;;  %v2760_v38 = vld [vmem:[%s3503_s3 + $0x100] sm:$0xff]   ;;  %v2762_v40 = vld [vmem:[%s3503_s3 + $0x148] sm:$0xff]  }
  0x26   : > { %v2761_v39 = vld [vmem:[%s3503_s3 + $0x180] sm:$0xff]  }
  0x28   : > { %2552 = vmatpush3.bf16.msra.mxu0 %v2748_v41  ;;  %2574 = vmatpush3.bf16.msra.mxu1 %v2749_v42  ;;  %v2763_v41 = vld [vmem:[%s3503_s3 + $0x1c8] sm:$0xff]  }
  0x29   : > { %2553 = vmatprep.subr.bf16.mxu0 %v2750_v43  ;;  %2575 = vmatprep.subr.bf16.mxu1 %v2751_v44  ;;  %v2764_v42 = vld [vmem:[%s3503_s3 + $0x108] sm:$0xff]   ;;  %v2766_v44 = vld [vmem:[%s3503_s3 + $0x150] sm:$0xff]  }
  0x2a   : > { %v2765_v43 = vld [vmem:[%s3503_s3 + $0x188] sm:$0xff]  }
  0x2c   : > { %2554 = vmatpush3.bf16.msra.mxu0 %v2752_v45  ;;  %2576 = vmatpush3.bf16.msra.mxu1 %v2753_v46  ;;  %v2767_v45 = vld [vmem:[%s3503_s3 + $0x1d0] sm:$0xff]  }
  0x2d   : > { %2555 = vmatprep.subr.bf16.mxu0 %v2754_v47  ;;  %2577 = vmatprep.subr.bf16.mxu1 %v2755_v48  ;;  %v2768_v46 = vld [vmem:[%s3503_s3 + $0x110] sm:$0xff]   ;;  %v2770_v48 = vld [vmem:[%s3503_s3 + $0x158] sm:$0xff]  }
  0x2e   : > { %v2769_v47 = vld [vmem:[%s3503_s3 + $0x190] sm:$0xff]  }
  0x30   : > { %2556 = vmatpush3.bf16.msra.mxu0 %v2756_v49  ;;  %2578 = vmatpush3.bf16.msra.mxu1 %v2757_v50  ;;  %v2771_v49 = vld [vmem:[%s3503_s3 + $0x1d8] sm:$0xff]  }
  0x31   : > { %920 = vmatprep.subr.bf16.mxu0 %v2412_v54  ;;  %961 = vmatprep.subr.bf16.mxu1 %v2414_v58  ;;  %v2772_v50 = vld [vmem:[%s3503_s3 + $0x118] sm:$0xff]   ;;  %v2776_v54 = vld [vmem:[%s3503_s3 + $0x120] sm:$0xff]   ;;  %v2780_v58 = vld [vmem:[%s3503_s3 + $0x128] sm:$0xff]  }
  0xe6   : > { %v457_v6 = vpop.f32.mrb[0].mxu0  ;;  %v498_v9 = vpop.f32.mrb[0].mxu1 }
  0xe7   : > { %v458_v7 = vadd.f32 %v457_v6, %v362_v2  ;;  %v459_v10 = vpop.f32.mrb[1].mxu0  ;;  %v499_v11 = vadd.f32 %v498_v9, %v370_v3  ;;  %v500_v13 = vpop.f32.mrb[1].mxu1  ;;  %v2784_v2 = vld [vmem:[%s3503_s3 + $0x130] sm:$0xff]   ;;  %v2788_v6 = vld [vmem:[%s3503_s3 + $0x138] sm:$0xff]   ;;  %v1283_v9 = vld [vmem:[%s3501_s1 + $0x20] sm:$0xff] }
  0xe8   : > { %v460_v12 = vadd.f32 %v459_v10, %v366_v4  ;;  %v461_v14 = vpop.f32.mrb[2].mxu0  ;;  %v501_v16 = vadd.f32 %v500_v13, %v374_v5  ;;  %v502_v17 = vpop.f32.mrb[2].mxu1  ;;  %v2785_v3 = vld [vmem:[%s3503_s3 + $0x1b0] sm:$0xff]   ;;  %v2786_v4 = vld [vmem:[%s3503_s3 + $0x178] sm:$0xff]   ;;  %v1285_v10 = vld [vmem:[%s3501_s1 + $0x60] sm:$0xff] }
  0xe9   : > { %v505_v15 = vmax.f32 %v458_v7, 0.0  ;;  %v462_v18 = vpop.f32.mrb[3].mxu0  ;;  %v507_v19 = vmax.f32 %v499_v11, 0.0  ;;  %v503_v22 = vpop.f32.mrb[3].mxu1  ;;  %v2787_v5 = vld [vmem:[%s3503_s3 + $0x1f8] sm:$0xff]   ;;  %v1284_v11 = vld [vmem:[%s3501_s1 + $0x28] sm:$0xff]  ;;  %v2453_v14 = vcombine.low %v1283_v9, %v1285_v10 }
  0xea   : > { %v506_v20 = vmax.f32 %v460_v12, 0.0  ;;  %v508_v25 = vmax.f32 %v501_v16, 0.0  ;;  %v2789_v7 = vld [vmem:[%s3503_s3 + $0x1b8] sm:$0xff]   ;;  %v2454_v12 = vcombine.high %v1283_v9, %v1285_v10  ;;  %v1286_v13 = vld [vmem:[%s3501_s1 + $0x68] sm:$0xff] }
  0xeb   : > { %v509_v29 = vpack.c.bf16 %v505_v15, %v505_v15  ;;  %v511_v32 = vpack.c.bf16 %v507_v19, %v507_v19  ;;  %v2455_v15 = vcombine.low %v1284_v11, %v1286_v13  ;;  %v2456_v16 = vcombine.high %v1284_v11, %v1286_v13  ;;  %v2796_v9 = vld [vmem:[%s3503_s3 + $0x208] sm:$0xff]   ;;  %v2798_v11 = vld [vmem:[%s3503_s3 + $0x250] sm:$0xff]  }
  0xec   : > { %v510_v28 = vpack.c.bf16 %v506_v20, %v506_v20  ;;  %v512_v30 = vpack.c.bf16 %v508_v25, %v508_v25  ;;  %v2797_v10 = vld [vmem:[%s3503_s3 + $0x288] sm:$0xff]   ;;  %v2800_v13 = vld [vmem:[%s3503_s3 + $0x210] sm:$0xff]  }
  0xee   : > { %737 = vmatprep.mubr.bf16.mxu0 %v510_v28  ;;  %777 = vmatprep.mubr.bf16.mxu1 %v512_v30  ;;  %v863_v30 = vrot.slane %v794_v24, %v3071_v61 }
  0xef   : > { %738 = vmatmul.mubr.bf16.vlgmr.msra.gmra.mrb[4].mxu0 %v509_v29  ;;  %778 = vmatmul.mubr.bf16.vlgmr.msra.gmra.mrb[4].mxu1 %v511_v32  ;;  %v867_v32 = vrot.slane %v794_v24, %v3078_v0 }
  0xf0   : > { %921 = vmatpush1.bf16.msra.mxu0 %v2411_v56  ;;  %962 = vmatpush1.bf16.msra.mxu1 %v2413_v57  ;;  %v2778_v56 = vld [vmem:[%s3503_s3 + $0x168] sm:$0xff]  }
  0xf1   : > { %922 = vmatprep.subr.bf16.mxu0 %v2416_v31  ;;  %963 = vmatprep.subr.bf16.mxu1 %v2418_v33  ;;  %v2779_v57 = vld [vmem:[%s3503_s3 + $0x1e8] sm:$0xff]   ;;  %v871_v31 = vrot.slane %v794_v24, %v3076_v63  ;;  %v875_v33 = vrot.slane %v794_v24, %v3080_v1 }
  0xf2   : > { %952 = vmatprep.mubr.bf16.mxu0 %v2865_v8  ;;  %993 = vmatprep.mubr.bf16.mxu1 %v2865_v8  ;;  %v2810_v24 = vld [vmem:[%s3503_s3 + $0x268] sm:$0xff]  }
  0xf4   : > { %923 = vmatpush1.bf16.msra.mxu0 %v2415_v34  ;;  %964 = vmatpush1.bf16.msra.mxu1 %v2417_v35 }
  0xf5   : > { %2585 = vmatprep.subr.bf16.mxu0 %v2758_v36  ;;  %2607 = vmatprep.subr.bf16.mxu1 %v2759_v37 }
  0xf7   : > { %2419 = vmatmul.mubr.msk.bf16.vlgmr.msra.gmra.mrb[8].mxu0 %vm419_vm0, %v2966_v21  ;;  %2420 = vmatmul.mubr.msk.bf16.vlgmr.msra.gmra.mrb[8].mxu1 %vm419_vm0, %v2966_v21 }
  0xf8   : > { %2586 = vmatpush3.bf16.msra.mxu0 %v2760_v38  ;;  %2608 = vmatpush3.bf16.msra.mxu1 %v2761_v39 }
  0xf9   : > { %2587 = vmatprep.subr.bf16.mxu0 %v2762_v40  ;;  %2609 = vmatprep.subr.bf16.mxu1 %v2763_v41 }
  0xfc   : > { %2588 = vmatpush3.bf16.msra.mxu0 %v2764_v42  ;;  %2610 = vmatpush3.bf16.msra.mxu1 %v2765_v43 }
  0xfd   : > { %2589 = vmatprep.subr.bf16.mxu0 %v2766_v44  ;;  %2611 = vmatprep.subr.bf16.mxu1 %v2767_v45 }
 0x100   : > { %2590 = vmatpush3.bf16.msra.mxu0 %v2768_v46  ;;  %2612 = vmatpush3.bf16.msra.mxu1 %v2769_v47 }
 0x101   : > { %2591 = vmatprep.subr.bf16.mxu0 %v2770_v48  ;;  %2613 = vmatprep.subr.bf16.mxu1 %v2771_v49  ;;  %v1287_v49 = vld [vmem:[%s3501_s1 + $0xa0] sm:$0xff] }
 0x104   : > { %2592 = vmatpush3.bf16.msra.mxu0 %v2772_v50  ;;  %2614 = vmatpush3.bf16.msra.mxu1 %v2773_v51  ;;  %v1289_v50 = vld [vmem:[%s3501_s1 + $0xe0] sm:$0xff] }
 0x105   : > { %2593 = vmatprep.subr.bf16.mxu0 %v2774_v52  ;;  %2615 = vmatprep.subr.bf16.mxu1 %v2775_v53  ;;  %v1288_v52 = vld [vmem:[%s3501_s1 + $0xa8] sm:$0xff] }
 0x106   : > { %v1290_v53 = vld [vmem:[%s3501_s1 + $0xe8] sm:$0xff] }
 0x108   : > { %2594 = vmatpush3.bf16.msra.mxu0 %v2776_v54  ;;  %2616 = vmatpush3.bf16.msra.mxu1 %v2777_v55 }
 0x109   : > { %2595 = vmatprep.subr.bf16.mxu0 %v2778_v56  ;;  %2617 = vmatprep.subr.bf16.mxu1 %v2779_v57  ;;  %v2458_v57 = vcombine.high %v1287_v49, %v1289_v50 }
 0x10c   : > { %2596 = vmatpush3.bf16.msra.mxu0 %v2780_v58  ;;  %2618 = vmatpush3.bf16.msra.mxu1 %v2781_v59  ;;  %v2460_v59 = vcombine.high %v1288_v52, %v1290_v53 }
 0x10d   : > { %2597 = vmatprep.subr.bf16.mxu0 %v2782_v60  ;;  %2619 = vmatprep.subr.bf16.mxu1 %v2783_v62  ;;  %v2457_v60 = vcombine.low %v1287_v49, %v1289_v50  ;;  %v2459_v62 = vcombine.low %v1288_v52, %v1290_v53 }
 0x110   : > { %2598 = vmatpush3.bf16.msra.mxu0 %v2784_v2  ;;  %2620 = vmatpush3.bf16.msra.mxu1 %v2785_v3  ;;  %v2790_v2 = vld [vmem:[%s3503_s3 + $0x240] sm:$0xff]  }
 0x111   : > { %2599 = vmatprep.subr.bf16.mxu0 %v2786_v4  ;;  %2621 = vmatprep.subr.bf16.mxu1 %v2787_v5  ;;  %v2791_v3 = vld [vmem:[%s3503_s3 + $0x2c0] sm:$0xff]  }
 0x112   : > { %v2792_v4 = vld [vmem:[%s3503_s3 + $0x200] sm:$0xff]  }
 0x113   : > { %v2793_v5 = vld [vmem:[%s3503_s3 + $0x280] sm:$0xff]  }
 0x114   : > { %2600 = vmatpush3.bf16.msra.mxu0 %v2788_v6  ;;  %2622 = vmatpush3.bf16.msra.mxu1 %v2789_v7  ;;  %v2794_v6 = vld [vmem:[%s3503_s3 + $0x248] sm:$0xff]  }
 0x115   : > { %1417 = vmatprep.subr.bf16.mxu0 %v2454_v12  ;;  %1458 = vmatprep.subr.bf16.mxu1 %v2456_v16  ;;  %v2795_v7 = vld [vmem:[%s3503_s3 + $0x2c8] sm:$0xff]   ;;  %v2799_v12 = vld [vmem:[%s3503_s3 + $0x2d0] sm:$0xff]   ;;  %v2803_v16 = vld [vmem:[%s3503_s3 + $0x2d8] sm:$0xff]  }
 0x1c2   : > { %v2557_v17 = vpop.f32.mrb[4].mxu0  ;;  %v2579_v18 = vpop.f32.mrb[4].mxu1 }
 0x1c3   : > { %v2558_v19 = vpop.f32.mrb[5].mxu0  ;;  %v2580_v22 = vpop.f32.mrb[5].mxu1 }
 0x1c4   : > { %v2559_v20 = vadd.f32 %v2558_v19, %v2557_v17  ;;  %v2560_v23 = vpop.f32.mrb[6].mxu0  ;;  %v2581_v25 = vadd.f32 %v2580_v22, %v2579_v18  ;;  %v2582_v26 = vpop.f32.mrb[6].mxu1  ;;  %v2804_v17 = vld [vmem:[%s3503_s3 + $0x218] sm:$0xff]   ;;  %v2806_v19 = vld [vmem:[%s3503_s3 + $0x260] sm:$0xff]  }
 0x1c5   : > { %v2561_v27 = vpop.f32.mrb[7].mxu0  ;;  %v2583_v28 = vpop.f32.mrb[7].mxu1  ;;  %v2805_v18 = vld [vmem:[%s3503_s3 + $0x298] sm:$0xff]   ;;  %v2808_v22 = vld [vmem:[%s3503_s3 + $0x220] sm:$0xff]   ;;  %v2812_v26 = vld [vmem:[%s3503_s3 + $0x228] sm:$0xff]  }
 0x1c6   : > { %v3215_v29 = vadd.f32 %v2581_v25, %v2559_v20  ;;  %v2807_v20 = vld [vmem:[%s3503_s3 + $0x2e0] sm:$0xff]   ;;  %v2811_v25 = vld [vmem:[%s3503_s3 + $0x2e8] sm:$0xff]   ;;  %v2814_v28 = vld [vmem:[%s3503_s3 + $0x270] sm:$0xff]  }
 0x1c7   : > { %v2809_v23 = vld [vmem:[%s3503_s3 + $0x2a0] sm:$0xff]   ;;  %v2813_v27 = vld [vmem:[%s3503_s3 + $0x2a8] sm:$0xff]  }
 0x1ca   : > { %v954_v34 = vpop.f32.mrb[8].mxu0  ;;  %v995_v36 = vpop.f32.mrb[8].mxu1 }
 0x1cb   : > { %v955_v35 = vadd.f32 %v954_v34, %v863_v30  ;;  %v956_v37 = vpop.f32.mrb[9].mxu0  ;;  %v996_v38 = vadd.f32 %v995_v36, %v871_v31  ;;  %v997_v40 = vpop.f32.mrb[9].mxu1  ;;  %v2815_v30 = vld [vmem:[%s3503_s3 + $0x2f0] sm:$0xff]   ;;  %v2819_v34 = vld [vmem:[%s3503_s3 + $0x2f8] sm:$0xff]  }
 0x1cc   : > { %v957_v39 = vadd.f32 %v956_v37, %v867_v32  ;;  %v958_v41 = vpop.f32.mrb[10].mxu0  ;;  %v998_v43 = vadd.f32 %v997_v40, %v875_v33  ;;  %v999_v44 = vpop.f32.mrb[10].mxu1  ;;  %v2816_v31 = vld [vmem:[%s3503_s3 + $0x230] sm:$0xff]   ;;  %v2818_v33 = vld [vmem:[%s3503_s3 + $0x278] sm:$0xff]  }
 0x1cd   : > { %v1002_v42 = vmax.f32 %v955_v35, 0.0  ;;  %v959_v45 = vpop.f32.mrb[11].mxu0  ;;  %v1004_v46 = vmax.f32 %v996_v38, 0.0  ;;  %v1000_v48 = vpop.f32.mrb[11].mxu1  ;;  %v2817_v32 = vld [vmem:[%s3503_s3 + $0x2b0] sm:$0xff]   ;;  %v2820_v35 = vld [vmem:[%s3503_s3 + $0x238] sm:$0xff]  }
 0x1ce   : > { %v1003_v47 = vmax.f32 %v957_v39, 0.0  ;;  %v1005_v51 = vmax.f32 %v998_v43, 0.0  ;;  %v2821_v36 = vld [vmem:[%s3503_s3 + $0x2b8] sm:$0xff]   ;;  %v1780_v37 = vld [vmem:[%s3501_s1 + $0x30] sm:$0xff]  ;;  %v2368_v45 = vld [vmem:[%s3504_s4] ss:$0 sm:$0xff] }
 0x1cf   : > { %v1006_v55 = vpack.c.bf16 %v1002_v42, %v1002_v42  ;;  %v1008_v58 = vpack.c.bf16 %v1004_v46, %v1004_v46  ;;  %v1782_v38 = vld [vmem:[%s3501_s1 + $0x70] sm:$0xff]  ;;  %v1781_v39 = vld [vmem:[%s3501_s1 + $0x38] sm:$0xff] }
 0x1d0   : > { %v1007_v54 = vpack.c.bf16 %v1003_v47, %v1003_v47  ;;  %v1009_v56 = vpack.c.bf16 %v1005_v51, %v1005_v51  ;;  %v2496_v40 = vcombine.high %v1780_v37, %v1782_v38  ;;  %v1783_v41 = vld [vmem:[%s3501_s1 + $0x78] sm:$0xff]  ;;  %v2495_v42 = vcombine.low %v1780_v37, %v1782_v38  ;;  %v2856_v47 = vld [vmem:[%s2957_s27] sm:$0xff]  ;;  %s273_s27 = scalar_lea.vmem %s3507_s7, %s2366_s20 }
 0x1d1   : > { %v2497_v43 = vcombine.low %v1781_v39, %v1783_v41  ;;  %v2498_v44 = vcombine.high %v1781_v39, %v1783_v41  ;;  %v284_v48 = vadd.f32 %v2856_v47, %v2368_v45  ;;  %v2823_v37 = vld [vmem:[%s3503_s3 + $0x3c0] sm:$0xff]   ;;  %v2828_v41 = vld [vmem:[%s3503_s3 + $0x308] sm:$0xff]   ;;  %v2833_v45 = vld [vmem:[%s3503_s3 + $0x390] sm:$0xff]  }
 0x1d2   : > { %1234 = vmatprep.mubr.bf16.mxu0 %v1007_v54  ;;  %1274 = vmatprep.mubr.bf16.mxu1 %v1009_v56  ;;  %v1291_v54 = vld [vmem:[%s3502_s2 + $0x8] sm:$0xf]  ;;  %v2824_v38 = vld [vmem:[%s3503_s3 + $0x300] sm:$0xff]   ;;  %v2835_v47 = vld [vmem:[%s3503_s3 + $0x3d8] sm:$0xff]  }
 0x1d3   : > { %1235 = vmatmul.mubr.bf16.vlgmr.msra.gmra.mrb[12].mxu0 %v1006_v55  ;;  %1275 = vmatmul.mubr.bf16.vlgmr.msra.gmra.mrb[12].mxu1 %v1008_v58  ;;  %v2825_v39 = vld [vmem:[%s3503_s3 + $0x380] sm:$0xff]  }
 0x1d4   : > { %1418 = vmatpush1.bf16.msra.mxu0 %v2453_v14  ;;  %1459 = vmatpush1.bf16.msra.mxu1 %v2455_v15  ;;  %v2801_v14 = vld [vmem:[%s3503_s3 + $0x290] sm:$0xff]   ;;  %v2802_v15 = vld [vmem:[%s3503_s3 + $0x258] sm:$0xff]  }
 0x1d5   : > { %1419 = vmatprep.subr.bf16.mxu0 %v2458_v57  ;;  %1460 = vmatprep.subr.bf16.mxu1 %v2460_v59  ;;  %v785_v59 = vadd.f32 %v3215_v29, %v284_v48  ;;  %v2836_v48 = vld [vmem:[%s3503_s3 + $0x318] sm:$0xff]  }
 0x1d6   : > { %1449 = vmatprep.mubr.bf16.mxu0 %v2865_v8  ;;  %1490 = vmatprep.mubr.bf16.mxu1 %v2865_v8 }
 0x1d8   : > { %1420 = vmatpush1.bf16.msra.mxu0 %v2457_v60  ;;  %1461 = vmatpush1.bf16.msra.mxu1 %v2459_v62  ;;  %v1360_v62 = vrot.slane %v1291_v54, %v3071_v61 }
 0x1d9   : > { %2629 = vmatprep.subr.bf16.mxu0 %v2790_v2  ;;  %2651 = vmatprep.subr.bf16.mxu1 %v2791_v3  ;;  %v1368_v2 = vrot.slane %v1291_v54, %v3076_v63  ;;  %v1364_v3 = vrot.slane %v1291_v54, %v3078_v0 }
 0x1db   : > { %2461 = vmatmul.mubr.msk.bf16.vlgmr.msra.gmra.mrb[16].mxu0 %vm419_vm0, %v2966_v21  ;;  %2462 = vmatmul.mubr.msk.bf16.vlgmr.msra.gmra.mrb[16].mxu1 %vm419_vm0, %v2966_v21 }
 0x1dc   : > { %2630 = vmatpush3.bf16.msra.mxu0 %v2792_v4  ;;  %2652 = vmatpush3.bf16.msra.mxu1 %v2793_v5  ;;  %v1372_v5 = vrot.slane %v1291_v54, %v3080_v1  ;;  %v2842_v54 = vld [vmem:[%s3503_s3 + $0x368] sm:$0xff]  }
 0x1dd   : > { %2631 = vmatprep.subr.bf16.mxu0 %v2794_v6  ;;  %2653 = vmatprep.subr.bf16.mxu1 %v2795_v7 }
 0x1e0   : > { %2632 = vmatpush3.bf16.msra.mxu0 %v2796_v9  ;;  %2654 = vmatpush3.bf16.msra.mxu1 %v2797_v10 }
 0x1e1   : > { %2633 = vmatprep.subr.bf16.mxu0 %v2798_v11  ;;  %2655 = vmatprep.subr.bf16.mxu1 %v2799_v12 }
 0x1e4   : > { %2634 = vmatpush3.bf16.msra.mxu0 %v2800_v13  ;;  %2656 = vmatpush3.bf16.msra.mxu1 %v2801_v14 }
 0x1e5   : > { %2635 = vmatprep.subr.bf16.mxu0 %v2802_v15  ;;  %2657 = vmatprep.subr.bf16.mxu1 %v2803_v16 }
 0x1e8   : > { %2636 = vmatpush3.bf16.msra.mxu0 %v2804_v17  ;;  %2658 = vmatpush3.bf16.msra.mxu1 %v2805_v18 }
 0x1e9   : > { %2637 = vmatprep.subr.bf16.mxu0 %v2806_v19  ;;  %2659 = vmatprep.subr.bf16.mxu1 %v2807_v20 }
 0x1ec   : > { %2638 = vmatpush3.bf16.msra.mxu0 %v2808_v22  ;;  %2660 = vmatpush3.bf16.msra.mxu1 %v2809_v23  ;;  %v1784_v22 = vld [vmem:[%s3501_s1 + $0xb0] sm:$0xff] }
 0x1ed   : > { %2639 = vmatprep.subr.bf16.mxu0 %v2810_v24  ;;  %2661 = vmatprep.subr.bf16.mxu1 %v2811_v25  ;;  %v1786_v23 = vld [vmem:[%s3501_s1 + $0xf0] sm:$0xff]  ;;  %v1785_v25 = vld [vmem:[%s3501_s1 + $0xb8] sm:$0xff] }
 0x1f0   : > { %2640 = vmatpush3.bf16.msra.mxu0 %v2812_v26  ;;  %2662 = vmatpush3.bf16.msra.mxu1 %v2813_v27  ;;  %v1787_v26 = vld [vmem:[%s3501_s1 + $0xf8] sm:$0xff] }
 0x1f1   : > { %2641 = vmatprep.subr.bf16.mxu0 %v2814_v28  ;;  %2663 = vmatprep.subr.bf16.mxu1 %v2815_v30 }
 0x1f4   : > { %2642 = vmatpush3.bf16.msra.mxu0 %v2816_v31  ;;  %2664 = vmatpush3.bf16.msra.mxu1 %v2817_v32  ;;  %v2500_v31 = vcombine.high %v1784_v22, %v1786_v23 }
 0x1f5   : > { %2643 = vmatprep.subr.bf16.mxu0 %v2818_v33  ;;  %2665 = vmatprep.subr.bf16.mxu1 %v2819_v34  ;;  %v2502_v33 = vcombine.high %v1785_v25, %v1787_v26  ;;  %v2499_v34 = vcombine.low %v1784_v22, %v1786_v23 }
 0x1f8   : > { %2644 = vmatpush3.bf16.msra.mxu0 %v2820_v35  ;;  %2666 = vmatpush3.bf16.msra.mxu1 %v2821_v36  ;;  %v2501_v35 = vcombine.low %v1785_v25, %v1787_v26  ;;  %v2822_v36 = vld [vmem:[%s3503_s3 + $0x340] sm:$0xff]  }
 0x1f9   : > { %1914 = vmatprep.subr.bf16.mxu0 %v2496_v40  ;;  %1955 = vmatprep.subr.bf16.mxu1 %v2498_v44  ;;  %v2826_v40 = vld [vmem:[%s3503_s3 + $0x348] sm:$0xff]   ;;  %v2832_v44 = vld [vmem:[%s3503_s3 + $0x310] sm:$0xff]  }
 0x2a6   : > { %v2601_v46 = vpop.f32.mrb[12].mxu0  ;;  %v2623_v49 = vpop.f32.mrb[12].mxu1 }
 0x2a7   : > { %v2602_v50 = vpop.f32.mrb[13].mxu0  ;;  %v2624_v52 = vpop.f32.mrb[13].mxu1 }
 0x2a8   : > { %v2603_v51 = vadd.f32 %v2602_v50, %v2601_v46  ;;  %v2604_v53 = vpop.f32.mrb[14].mxu0  ;;  %v2625_v55 = vadd.f32 %v2624_v52, %v2623_v49  ;;  %v2626_v56 = vpop.f32.mrb[14].mxu1  ;;  %v2834_v46 = vld [vmem:[%s3503_s3 + $0x358] sm:$0xff]   ;;  %v2838_v50 = vld [vmem:[%s3503_s3 + $0x360] sm:$0xff]  }
 0x2a9   : > { %v2605_v57 = vpop.f32.mrb[15].mxu0  ;;  %v2627_v58 = vpop.f32.mrb[15].mxu1  ;;  %v2837_v49 = vld [vmem:[%s3503_s3 + $0x398] sm:$0xff]   ;;  %v2840_v52 = vld [vmem:[%s3503_s3 + $0x320] sm:$0xff]   ;;  %v2844_v56 = vld [vmem:[%s3503_s3 + $0x328] sm:$0xff]  }
 0x2aa   : > { %v1277_v60 = vadd.f32 %v2625_v55, %v2603_v51  ;;  %v2839_v51 = vld [vmem:[%s3503_s3 + $0x3e0] sm:$0xff]   ;;  %v2843_v55 = vld [vmem:[%s3503_s3 + $0x3e8] sm:$0xff]   ;;  %v2846_v58 = vld [vmem:[%s3503_s3 + $0x370] sm:$0xff]  }
 0x2ab   : > { %v2841_v53 = vld [vmem:[%s3503_s3 + $0x3a0] sm:$0xff]   ;;  %v2845_v57 = vld [vmem:[%s3503_s3 + $0x3a8] sm:$0xff]  }
 0x2ac   : > { %v3358_v4 = vadd.f32 %v1277_v60, %v785_v59  ;;  %v2847_v59 = vld [vmem:[%s3503_s3 + $0x3f0] sm:$0xff]  }
 0x2ad   : > { %v2848_v60 = vld [vmem:[%s3503_s3 + $0x330] sm:$0xff]  }
 0x2ae   : > { %v1451_v6 = vpop.f32.mrb[16].mxu0  ;;  %v1492_v9 = vpop.f32.mrb[16].mxu1 }
 0x2af   : > { %v1452_v7 = vadd.f32 %v1451_v6, %v1360_v62  ;;  %v1453_v10 = vpop.f32.mrb[17].mxu0  ;;  %v1493_v11 = vadd.f32 %v1492_v9, %v1368_v2  ;;  %v1494_v13 = vpop.f32.mrb[17].mxu1  ;;  %v2849_v62 = vld [vmem:[%s3503_s3 + $0x3b0] sm:$0xff]   ;;  %v2850_v2 = vld [vmem:[%s3503_s3 + $0x378] sm:$0xff]  }
 0x2b0   : > { %v1454_v12 = vadd.f32 %v1453_v10, %v1364_v3  ;;  %v1455_v14 = vpop.f32.mrb[18].mxu0  ;;  %v1495_v15 = vadd.f32 %v1494_v13, %v1372_v5  ;;  %v1496_v16 = vpop.f32.mrb[18].mxu1  ;;  %v2851_v3 = vld [vmem:[%s3503_s3 + $0x3f8] sm:$0xff]  }
 0x2b1   : > { %v1499_v29 = vmax.f32 %v1452_v7, 0.0  ;;  %v1456_v17 = vpop.f32.mrb[19].mxu0  ;;  %v1501_v18 = vmax.f32 %v1493_v11, 0.0  ;;  %v1497_v20 = vpop.f32.mrb[19].mxu1  ;;  %v2852_v5 = vld [vmem:[%s3503_s3 + $0x338] sm:$0xff]  }
 0x2b2   : > { %v1500_v19 = vmax.f32 %v1454_v12, 0.0  ;;  %v1502_v24 = vmax.f32 %v1495_v15, 0.0  ;;  %v2853_v6 = vld [vmem:[%s3503_s3 + $0x3b8] sm:$0xff]   ;;  %v1788_v14 = vld [vmem:[%s3502_s2 + $0xc] sm:$0xf] }
 0x2b3   : > { %v1503_v28 = vpack.c.bf16 %v1499_v29, %v1499_v29  ;;  %v1505_v32 = vpack.c.bf16 %v1501_v18, %v1501_v18  ;;  %v1865_v20 = vrot.slane %v1788_v14, %v3076_v63  ;;  %v1861_v22 = vrot.slane %v1788_v14, %v3078_v0 }
 0x2b4   : > { %v1504_v27 = vpack.c.bf16 %v1500_v19, %v1500_v19  ;;  %v1506_v30 = vpack.c.bf16 %v1502_v24, %v1502_v24  ;;  %v1857_v19 = vrot.slane %v1788_v14, %v3071_v61  ;;  %v1869_v23 = vrot.slane %v1788_v14, %v3080_v1 }
 0x2b6   : > { %1731 = vmatprep.mubr.bf16.mxu0 %v1504_v27  ;;  %1771 = vmatprep.mubr.bf16.mxu1 %v1506_v30 }
 0x2b7   : > { %1732 = vmatmul.mubr.bf16.vlgmr.msra.gmra.mrb[20].mxu0 %v1503_v28  ;;  %1772 = vmatmul.mubr.bf16.vlgmr.msra.gmra.mrb[20].mxu1 %v1505_v32 }
 0x2b8   : > { %1915 = vmatpush1.bf16.msra.mxu0 %v2495_v42  ;;  %1956 = vmatpush1.bf16.msra.mxu1 %v2497_v43  ;;  %v2829_v42 = vld [vmem:[%s3503_s3 + $0x388] sm:$0xff]   ;;  %v2830_v43 = vld [vmem:[%s3503_s3 + $0x350] sm:$0xff]  }
 0x2b9   : > { %1916 = vmatprep.subr.bf16.mxu0 %v2500_v31  ;;  %1957 = vmatprep.subr.bf16.mxu1 %v2502_v33 }
 0x2ba   : > { %1946 = vmatprep.mubr.bf16.mxu0 %v2865_v8  ;;  %1987 = vmatprep.mubr.bf16.mxu1 %v2865_v8  ;;  %v2827_v8 = vld [vmem:[%s3503_s3 + $0x3c8] sm:$0xff]  }
 0x2bc   : > { %1917 = vmatpush1.bf16.msra.mxu0 %v2499_v34  ;;  %1958 = vmatpush1.bf16.msra.mxu1 %v2501_v35 }
 0x2bd   : > { %2673 = vmatprep.subr.bf16.mxu0 %v2822_v36  ;;  %2695 = vmatprep.subr.bf16.mxu1 %v2823_v37 }
 0x2bf   : > { %2503 = vmatmul.mubr.msk.bf16.vlgmr.msra.gmra.mrb[24].mxu0 %vm419_vm0, %v2966_v21  ;;  %2504 = vmatmul.mubr.msk.bf16.vlgmr.msra.gmra.mrb[24].mxu1 %vm419_vm0, %v2966_v21  ;;  %v2831_v21 = vld [vmem:[%s3503_s3 + $0x3d0] sm:$0xff]  }
 0x2c0   : > { %2674 = vmatpush3.bf16.msra.mxu0 %v2824_v38  ;;  %2696 = vmatpush3.bf16.msra.mxu1 %v2825_v39 }
 0x2c1   : > { %2675 = vmatprep.subr.bf16.mxu0 %v2826_v40  ;;  %2697 = vmatprep.subr.bf16.mxu1 %v2827_v8 }
 0x2c4   : > { %2676 = vmatpush3.bf16.msra.mxu0 %v2828_v41  ;;  %2698 = vmatpush3.bf16.msra.mxu1 %v2829_v42 }
 0x2c5   : > { %2677 = vmatprep.subr.bf16.mxu0 %v2830_v43  ;;  %2699 = vmatprep.subr.bf16.mxu1 %v2831_v21 }
 0x2c8   : > { %2678 = vmatpush3.bf16.msra.mxu0 %v2832_v44  ;;  %2700 = vmatpush3.bf16.msra.mxu1 %v2833_v45 }
 0x2c9   : > { %2679 = vmatprep.subr.bf16.mxu0 %v2834_v46  ;;  %2701 = vmatprep.subr.bf16.mxu1 %v2835_v47 }
 0x2cc   : > { %2680 = vmatpush3.bf16.msra.mxu0 %v2836_v48  ;;  %2702 = vmatpush3.bf16.msra.mxu1 %v2837_v49 }
 0x2cd   : > { %2681 = vmatprep.subr.bf16.mxu0 %v2838_v50  ;;  %2703 = vmatprep.subr.bf16.mxu1 %v2839_v51 }
 0x2d0   : > { %2682 = vmatpush3.bf16.msra.mxu0 %v2840_v52  ;;  %2704 = vmatpush3.bf16.msra.mxu1 %v2841_v53 }
 0x2d1   : > { %2683 = vmatprep.subr.bf16.mxu0 %v2842_v54  ;;  %2705 = vmatprep.subr.bf16.mxu1 %v2843_v55 }
 0x2d4   : > { %2684 = vmatpush3.bf16.msra.mxu0 %v2844_v56  ;;  %2706 = vmatpush3.bf16.msra.mxu1 %v2845_v57 }
 0x2d5   : > { %2685 = vmatprep.subr.bf16.mxu0 %v2846_v58  ;;  %2707 = vmatprep.subr.bf16.mxu1 %v2847_v59 }
 0x2d8   : > { %2686 = vmatpush3.bf16.msra.mxu0 %v2848_v60  ;;  %2708 = vmatpush3.bf16.msra.mxu1 %v2849_v62  ;;  %v2537_v62 = vld [vmem:[%s3505_s5] ss:$0 sm:$0xff] }
 0x2d9   : > { %2687 = vmatprep.subr.bf16.mxu0 %v2850_v2  ;;  %2709 = vmatprep.subr.bf16.mxu1 %v2851_v3  ;;  %v2538_v3 = vld [vmem:[%s3506_s6] ss:$0 sm:$0xff] }
 0x2dc   : > { %2688 = vmatpush3.bf16.msra.mxu0 %v2852_v5  ;;  %2710 = vmatpush3.bf16.msra.mxu1 %v2853_v6 }
 0x38a   : > { %v2645_v7 = vpop.f32.mrb[20].mxu0  ;;  %v2667_v9 = vpop.f32.mrb[20].mxu1 }
 0x38b   : > { %v2646_v10 = vpop.f32.mrb[21].mxu0  ;;  %v2668_v12 = vpop.f32.mrb[21].mxu1 }
 0x38c   : > { %v2647_v11 = vadd.f32 %v2646_v10, %v2645_v7  ;;  %v2648_v13 = vpop.f32.mrb[22].mxu0  ;;  %v2669_v29 = vadd.f32 %v2668_v12, %v2667_v9  ;;  %v2670_v15 = vpop.f32.mrb[22].mxu1 }
 0x38d   : > { %v2649_v16 = vpop.f32.mrb[23].mxu0  ;;  %v2671_v17 = vpop.f32.mrb[23].mxu1 }
 0x38e   : > { %v1774_v18 = vadd.f32 %v2669_v29, %v2647_v11 }
 0x390   : > { %v1779_v24 = vadd.f32 %v1774_v18, %v3358_v4 }
 0x392   : > { %v1948_v25 = vpop.f32.mrb[24].mxu0  ;;  %v1989_v27 = vpop.f32.mrb[24].mxu1 }
 0x393   : > { %v1949_v26 = vadd.f32 %v1948_v25, %v1857_v19  ;;  %v1950_v28 = vpop.f32.mrb[25].mxu0  ;;  %v1990_v30 = vadd.f32 %v1989_v27, %v1865_v20  ;;  %v1991_v32 = vpop.f32.mrb[25].mxu1 }
 0x394   : > { %v1951_v31 = vadd.f32 %v1950_v28, %v1861_v22  ;;  %v1952_v33 = vpop.f32.mrb[26].mxu0  ;;  %v1992_v35 = vadd.f32 %v1991_v32, %v1869_v23  ;;  %v1993_v36 = vpop.f32.mrb[26].mxu1 }
 0x395   : > { %v1996_v34 = vmax.f32 %v1949_v26, 0.0  ;;  %v1953_v61 = vpop.f32.mrb[27].mxu0  ;;  %v1998_v37 = vmax.f32 %v1990_v30, 0.0  ;;  %v1994_v38 = vpop.f32.mrb[27].mxu1 }
 0x396   : > { %v1997_v63 = vmax.f32 %v1951_v31, 0.0  ;;  %v1999_v0 = vmax.f32 %v1992_v35, 0.0 }
 0x397   : > { %v2000_v1 = vpack.c.bf16 %v1996_v34, %v1996_v34  ;;  %v2002_v4 = vpack.c.bf16 %v1998_v37, %v1998_v37 }
 0x398   : > { %v2001_v39 = vpack.c.bf16 %v1997_v63, %v1997_v63  ;;  %v2003_v40 = vpack.c.bf16 %v1999_v0, %v1999_v0 }
 0x39a   : > { %2228 = vmatprep.mubr.bf16.mxu0 %v2001_v39  ;;  %2268 = vmatprep.mubr.bf16.mxu1 %v2003_v40 }
 0x39b   : > { %2229 = vmatmul.mubr.bf16.vlgmr.msra.gmra.mrb[28].mxu0 %v2000_v1  ;;  %2269 = vmatmul.mubr.bf16.vlgmr.msra.gmra.mrb[28].mxu1 %v2002_v4 }
 0x46e   : > { %v2689_v8 = vpop.f32.mrb[28].mxu0  ;;  %v2711_v41 = vpop.f32.mrb[28].mxu1 }
 0x46f   : > { %v2690_v42 = vpop.f32.mrb[29].mxu0  ;;  %v2712_v21 = vpop.f32.mrb[29].mxu1 }
 0x470   : > { %v2691_v43 = vadd.f32 %v2690_v42, %v2689_v8  ;;  %v2692_v44 = vpop.f32.mrb[30].mxu0  ;;  %v2713_v45 = vadd.f32 %v2712_v21, %v2711_v41  ;;  %v2714_v46 = vpop.f32.mrb[30].mxu1 }
 0x471   : > { %v2693_v47 = vpop.f32.mrb[31].mxu0  ;;  %v2715_v48 = vpop.f32.mrb[31].mxu1 }
 0x472   : > { %v2271_v49 = vadd.f32 %v2713_v45, %v2691_v43 }
 0x474   : > { %v2276_v50 = vadd.f32 %v2271_v49, %v1779_v24 }
 0x476   : > { %v2277_v51 = vsel %vm419_vm0, %v2276_v50, 0.0 }
 0x477   : > { %2278 = vadd.xlane.f32.xlu0 %v2277_v51 }
 0x504   : > { %v2279_v52 = vpop.xlane.xlu0 %2278 }
 0x505   : > { %v2281_v53 = vmul.f32 0.03125, %v2279_v52 }
 0x507   : > { %v2282_v54 = vsub.f32 %v2276_v50, %v2281_v53 }
 0x509   : > { %v2283_v55 = vmul.f32 %v2282_v54, %v2282_v54 }
 0x50b   : > { %v2284_v56 = vsel %vm419_vm0, %v2283_v55, 0.0 }
 0x50c   : > { %2285 = vadd.xlane.f32.xlu0 %v2284_v56 }
 0x599   : > { %v2286_v57 = vpop.xlane.xlu0 %2285 }
 0x59a   : > { %v2287_v58 = vmul.f32 0.03125, %v2286_v57 }
 0x59c   : > { %v2288_v59 = vadd.f32 1e-05, %v2287_v58 }
 0x59e   : > { %2854 = vrsqrt.f32 %v2288_v59 }
 0x5a8   : > { %v2855_v60 = vpop.eup %2854 }
 0x5a9   : > { %v2290_v2 = vmul.f32 %v2855_v60, %v2282_v54 }
 0x5ab   : > { %v2298_v5 = vmul.f32 %v2537_v62, %v2290_v2 }
 0x5ad   : > { %v2306_v6 = vadd.f32 %v2538_v3, %v2298_v5 }
 0x5af   : > { %2307 = vst.msk [vmem:[%s273_s27] sm:$0xff] %vm419_vm0, %v2306_v6 }
 0x5b0 PF: > { %s17_s24 = sadd.s32 1, %s2863_s24  }
 0x5b1   : > { %p14_p4 = scmp.ge.s32.totalorder %s17_s24, 4  }
 0x5b3   :  { %16 = sbr.rel (!%p14_p4) target bundleno = 1 (0x1), region = 78 }

// kernel: recipe_encoder_forward.33
= control target key start
LH: loop header
LB: loop body
LE: loop exit
PB: predicated region body
PF: predicated region fallthrough
CT: control target
= control target key end

     0   :  { %v163_v0 = vmov 0.0   ;;  %vm164_vm0 = vmmov 0   ;;  %vm72_vm1 = vcmask 785408   ;;  %s212_s1 = inlined_call_operand.vmem [shape: bf16[96,128], index: 1, kind: input, shape index: {}]   ;;  %s213_s0 = inlined_call_operand.vmem [shape: f32[8,96], index: 0, kind: input, shape index: {}]   ;;  %s214_s2 = inlined_call_operand.vmem [shape: f32[1,128], index: 2, kind: input, shape index: {}]   ;;  %s215_s3 = inlined_call_operand.vmem [shape: f32[8,128], index: 3, kind: output, shape index: {}]  }
   0x1   :  { %137 = vmatprep.subr.bf16.mxu0 %v163_v0  ;;  %v155_v1 = vld [vmem:[%s212_s1] sm:$0xff]   ;;  %149 = vmatprep.mubr.msk.bf16.mxu0 %vm164_vm0, %v163_v0  ;;  %v156_v2 = vld [vmem:[%s212_s1 + $0x8] sm:$0xff]   ;;  %v157_v3 = vld [vmem:[%s212_s1 + $0x10] sm:$0xff]  }
   0x2   :  { %138 = vmatpush3.bf16.msra.mxu0 %v155_v1  ;;  %v158_v4 = vld [vmem:[%s212_s1 + $0x18] sm:$0xff]   ;;  %v159_v5 = vld [vmem:[%s212_s1 + $0x20] sm:$0xff]   ;;  %v160_v6 = vld [vmem:[%s212_s1 + $0x28] sm:$0xff]  }
   0x3   :  { %139 = vmatprep.subr.bf16.mxu0 %v163_v0  ;;  %v15_v7 = vld [vmem:[%s213_s0] sm:$0xff] }
   0x4   :  { %v16_v8 = vpack.c.bf16 %v15_v7, %v15_v7  ;;  %v122_v9 = vld [vmem:[%s214_s2] ss:$0 sm:$0xff] }
   0x6   :  { %140 = vmatpush3.bf16.msra.mxu0 %v156_v2 }
   0x7   :  { %141 = vmatprep.subr.bf16.mxu0 %v163_v0 }
   0xa   :  { %142 = vmatpush3.bf16.msra.mxu0 %v157_v3 }
   0xb   :  { %143 = vmatprep.subr.bf16.mxu0 %v163_v0 }
   0xe   :  { %144 = vmatpush3.bf16.msra.mxu0 %v158_v4 }
   0xf   :  { %145 = vmatprep.subr.bf16.mxu0 %v163_v0 }
  0x12   :  { %146 = vmatpush3.bf16.msra.mxu0 %v159_v5 }
  0x13   :  { %147 = vmatprep.subr.bf16.mxu0 %v163_v0 }
  0x16   :  { %148 = vmatpush3.bf16.msra.mxu0 %v160_v6 }
  0x19   :  { %150 = vmatmul.mubr.msk.bf16.vlgmr.msra.gmra.mrb[0].mxu0 %vm72_vm1, %v16_v8 }
  0xec   :  { %v110_v10 = vpop.f32.mrb[0].mxu0 }
  0xed   :  { %v111_v11 = vadd.f32 %v122_v9, %v110_v10  ;;  %v151_v12 = vpop.f32.mrb[1].mxu0 }
  0xee   :  { %v113_v13 = vpop.f32.mrb[2].mxu0 }
  0xef   :  { %161 = vtanh.f32 %v111_v11  ;;  %v152_v14 = vpop.f32.mrb[3].mxu0 }
  0xf9   :  { %v162_v15 = vpop.eup %161 }
  0xfa   :  { %117 = vst [vmem:[%s215_s3] sm:$0xff] %v162_v15 }

// kernel: recipe_encoder_forward.17
= control target key start
LH: loop header
LB: loop body
LE: loop exit
PB: predicated region body
PF: predicated region fallthrough
CT: control target
= control target key end

     0   :  { %s1034_s24 = smov 0   ;;  %s1311_s0 = inlined_call_operand.vmem [shape: f32[160,32], index: 0, kind: input, shape index: {}]   ;;  %s1312_s1 = inlined_call_operand.vmem [shape: bf16[32,128], index: 1, kind: input, shape index: {}]   ;;  %s1313_s2 = inlined_call_operand.vmem [shape: f32[1,128], index: 2, kind: input, shape index: {}]   ;;  %s1314_s3 = inlined_call_operand.vmem [shape: bf16[128,32], index: 3, kind: input, shape index: {}]   ;;  %s1315_s4 = inlined_call_operand.vmem [shape: f32[1,32], index: 4, kind: input, shape index: {}]   ;;  %s1316_s5 = inlined_call_operand.vmem [shape: f32[1,32], index: 5, kind: input, shape index: {}]   ;;  %s1317_s6 = inlined_call_operand.vmem [shape: f32[1,32], index: 6, kind: input, shape index: {}]   ;;  %s1318_s7 = inlined_call_operand.vmem [shape: f32[160,32], index: 7, kind: output, shape index: {}]  }
   0x1 LB: > { %s820_s25 = sadd.s32 4294967295, %s990_s24   ;;  %p824_p0 = scmp.ge.s32.totalorder %s990_s24, 1  ;;  %s990_s24 = sphi %s1034_s24, %s17_s24  }
   0x2   : > { %p238_p1 = scmp.lt.s32.totalorder %s990_s24, 3 }
   0x4   : > { %p239_p2 = pnand %p824_p0, %p238_p1 }
   0x5   : > { %v954_v0 = vld [vmem:[%s1312_s1] sm:$0xff] (!%p239_p2)   ;;  %v992_v1 = vmov (!%p239_p2), 0.0   ;;  %v955_v2 = vld [vmem:[%s1312_s1 + $0x8] sm:$0xff] (!%p239_p2)   ;;  %vm993_vm0 = vmmov (!%p239_p2), 0   ;;  %s270_s30 = smul.u32 (!%p239_p2), 10, %s820_s25  ;;  %vm354_vm1 = vcmask (!%p239_p2), 261120  }
   0x6   : > { %242 = sbr.rel (%p239_p2) target bundleno = 801 (0x321), region = 48  ;;  %868 = vmatprep.subr.bf16.mxu0 (!%p239_p2), %v992_v1  ;;  %928 = vmatprep.subr.bf16.mxu1 (!%p239_p2), %v992_v1  ;;  %v956_v3 = vld [vmem:[%s1314_s3] sm:$0xff] (!%p239_p2)   ;;  %v957_v4 = vld [vmem:[%s1314_s3 + $0x8] sm:$0xff] (!%p239_p2)   ;;  %v958_v8 = vld [vmem:[%s1314_s3 + $0x10] sm:$0xff] (!%p239_p2)  }
   0x7   : > { %869 = vmatpush3.bf16.msra.mxu0 (!%p239_p2), %v954_v0  ;;  %872 = vmatprep.mubr.msk.bf16.mxu0 (!%p239_p2), %vm993_vm0, %v992_v1  ;;  %p271_p3 = scmp.lt.s32.totalorder (!%p239_p2), %s270_s30, 19  ;;  %v959_v11 = vld [vmem:[%s1314_s3 + $0x18] sm:$0xff] (!%p239_p2)   ;;  %v960_v13 = vld [vmem:[%s1314_s3 + $0x20] sm:$0xff] (!%p239_p2)   ;;  %v961_v16 = vld [vmem:[%s1314_s3 + $0x28] sm:$0xff] (!%p239_p2)  }
   0x8   : > { %870 = vmatprep.subr.bf16.mxu0 (!%p239_p2), %v992_v1  ;;  %912 = vmatprep.mubr.msk.bf16.mxu1 (!%p239_p2), %vm993_vm0, %v992_v1  ;;  %v962_v24 = vld [vmem:[%s1314_s3 + $0x30] sm:$0xff] (!%p239_p2)   ;;  %v963_v25 = vld [vmem:[%s1314_s3 + $0x38] sm:$0xff] (!%p239_p2)   ;;  %v828_v26 = vld [vmem:[%s1313_s2] ss:$0 sm:$0xff] (!%p239_p2) }
   0x9   : > { %936 = vmatpush3.bf16.msra.mxu1 (!%p239_p2), %v956_v3 }
   0xa   : > { %929 = vmatprep.subr.bf16.mxu1 (!%p239_p2), %v992_v1 }
   0xb   : > { %871 = vmatpush3.bf16.msra.mxu0 (!%p239_p2), %v955_v2 }
   0xc   : > { %892 = vmatprep.subr.bf16.mxu0 (!%p239_p2), %v992_v1 }
   0xd   : > { %s1320_s30 = smov (!%p271_p3, %s270_s30), 19  ;;  %937 = vmatpush3.bf16.msra.mxu1 %v957_v4 }
   0xe   : > { %s825_s12 = sshll.u32 %s1320_s30, 3  ;;  %930 = vmatprep.subr.bf16.mxu1 %v992_v1 }
   0xf   : > { %s1071_s15 = scalar_lea.vmem %s1311_s0, %s825_s12  ;;  %s1258_s18 = scalar_lea.vmem %s1318_s7, %s825_s12 }
  0x10   : > { %v1074_v5 = vld [vmem:[%s1071_s15] sm:$0xff]  ;;  %v1077_v6 = vld [vmem:[%s1071_s15 + $0x8] sm:$0xff]  ;;  %v1089_v9 = vld [vmem:[%s1071_s15 + $0x10] sm:$0xff] }
  0x11   : > { %v293_v7 = vpack.c.bf16 %v1077_v6, %v1074_v5  ;;  %938 = vmatpush3.bf16.msra.mxu1 %v958_v8  ;;  %v1092_v10 = vld [vmem:[%s1071_s15 + $0x18] sm:$0xff]  ;;  %v1110_v14 = vld [vmem:[%s1071_s15 + $0x20] sm:$0xff]  ;;  %v1113_v15 = vld [vmem:[%s1071_s15 + $0x28] sm:$0xff] }
  0x12   : > { %931 = vmatprep.subr.bf16.mxu1 %v992_v1  ;;  %v294_v12 = vpack.c.bf16 %v1092_v10, %v1089_v9  ;;  %v295_v17 = vpack.c.bf16 %v1113_v15, %v1110_v14  ;;  %v1128_v18 = vld [vmem:[%s1071_s15 + $0x30] sm:$0xff]  ;;  %v1131_v19 = vld [vmem:[%s1071_s15 + $0x38] sm:$0xff]  ;;  %v1141_v21 = vld [vmem:[%s1071_s15 + $0x40] sm:$0xff] }
  0x13   : > { %873 = vmatmul.mubr.msk.bf16.vlgmr.msra.gmra.mrb[0].mxu0 %vm354_vm1, %v293_v7  ;;  %v296_v20 = vpack.c.bf16 %v1131_v19, %v1128_v18  ;;  %v1144_v22 = vld [vmem:[%s1071_s15 + $0x48] sm:$0xff] }
  0x14   : > { %876 = vmatprep.mubr.msk.bf16.mxu0 %vm993_vm0, %v992_v1  ;;  %893 = vmatpush3.bf16.msra.mxu0 %v956_v3  ;;  %v297_v23 = vpack.c.bf16 %v1144_v22, %v1141_v21 }
  0x15   : > { %894 = vmatprep.subr.bf16.mxu0 %v992_v1  ;;  %939 = vmatpush3.bf16.msra.mxu1 %v959_v11 }
  0x16   : > { %932 = vmatprep.subr.bf16.mxu1 %v992_v1 }
  0x18   : > { %895 = vmatpush3.bf16.msra.mxu0 %v957_v4 }
  0x19   : > { %896 = vmatprep.subr.bf16.mxu0 %v992_v1  ;;  %940 = vmatpush3.bf16.msra.mxu1 %v960_v13 }
  0x1a   : > { %933 = vmatprep.subr.bf16.mxu1 %v992_v1 }
  0x1b   : > { %877 = vmatmul.mubr.msk.bf16.gmra.mrb[4].mxu0 %vm354_vm1, %v294_v12 }
  0x1c   : > { %880 = vmatprep.mubr.msk.bf16.mxu0 %vm993_vm0, %v992_v1  ;;  %897 = vmatpush3.bf16.msra.mxu0 %v958_v8 }
  0x1d   : > { %898 = vmatprep.subr.bf16.mxu0 %v992_v1  ;;  %941 = vmatpush3.bf16.msra.mxu1 %v961_v16 }
  0x1e   : > { %934 = vmatprep.subr.bf16.mxu1 %v992_v1 }
  0x20   : > { %899 = vmatpush3.bf16.msra.mxu0 %v959_v11 }
  0x21   : > { %900 = vmatprep.subr.bf16.mxu0 %v992_v1  ;;  %942 = vmatpush3.bf16.msra.mxu1 %v962_v24 }
  0x22   : > { %935 = vmatprep.subr.bf16.mxu1 %v992_v1 }
  0x23   : > { %881 = vmatmul.mubr.msk.bf16.gmra.mrb[8].mxu0 %vm354_vm1, %v295_v17 }
  0x24   : > { %884 = vmatprep.mubr.msk.bf16.mxu0 %vm993_vm0, %v992_v1  ;;  %901 = vmatpush3.bf16.msra.mxu0 %v960_v13  ;;  %v827_v13 = vld [vmem:[%s1315_s4] ss:$0 sm:$0xff] }
  0x25   : > { %902 = vmatprep.subr.bf16.mxu0 %v992_v1  ;;  %943 = vmatpush3.bf16.msra.mxu1 %v963_v25  ;;  %v306_v17 = vadd.f32 %v827_v13, %v1077_v6 }
  0x28   : > { %903 = vmatpush3.bf16.msra.mxu0 %v961_v16  ;;  %v305_v16 = vadd.f32 %v827_v13, %v1074_v5 }
  0x29   : > { %904 = vmatprep.subr.bf16.mxu0 %v992_v1 }
  0x2b   : > { %885 = vmatmul.mubr.msk.bf16.gmra.mrb[12].mxu0 %vm354_vm1, %v296_v20 }
  0x2c   : > { %888 = vmatprep.mubr.msk.bf16.mxu0 %vm993_vm0, %v992_v1  ;;  %905 = vmatpush3.bf16.msra.mxu0 %v962_v24 }
  0x2d   : > { %906 = vmatprep.subr.bf16.mxu0 %v992_v1 }
  0x30   : > { %907 = vmatpush3.bf16.msra.mxu0 %v963_v25 }
  0x33   : > { %889 = vmatmul.mubr.msk.bf16.gmra.mrb[16].mxu0 %vm354_vm1, %v297_v23 }
  0x34   : > { %908 = vmatprep.mubr.msk.bf16.mxu0 %vm993_vm0, %v992_v1 }
  0xe6   : > { %v404_v27 = vpop.f32.mrb[0].mxu0 }
  0xe7   : > { %v405_v28 = vadd.f32 %v828_v26, %v404_v27  ;;  %v874_v29 = vpop.f32.mrb[1].mxu0 }
  0xe8   : > { %v407_v30 = vpop.f32.mrb[2].mxu0 }
  0xe9   : > { %v408_v31 = vadd.f32 %v828_v26, %v407_v30  ;;  %v875_v32 = vpop.f32.mrb[3].mxu0  ;;  %v443_v33 = vmax.f32 %v405_v28, 0.0  ;;  %v307_v28 = vadd.f32 %v827_v13, %v1089_v9  ;;  %v308_v30 = vadd.f32 %v827_v13, %v1092_v10 }
  0xea   : > { %v310_v9 = vadd.f32 %v827_v13, %v1113_v15 }
  0xeb   : > { %v444_v34 = vmax.f32 %v408_v31, 0.0 }
  0xed   : > { %v453_v35 = vpack.c.bf16 %v444_v34, %v443_v33 }
  0xee   : > { %v412_v36 = vpop.f32.mrb[4].mxu0 }
  0xef   : > { %v413_v37 = vadd.f32 %v828_v26, %v412_v36  ;;  %v878_v38 = vpop.f32.mrb[5].mxu0  ;;  %909 = vmatmul.mubr.bf16.vlgmr.msra.gmra.mrb[20].mxu0 %v453_v35  ;;  %v309_v36 = vadd.f32 %v827_v13, %v1110_v14  ;;  %v312_v14 = vadd.f32 %v827_v13, %v1131_v19 }
  0xf0   : > { %v415_v39 = vpop.f32.mrb[6].mxu0 }
  0xf1   : > { %v416_v40 = vadd.f32 %v828_v26, %v415_v39  ;;  %v879_v41 = vpop.f32.mrb[7].mxu0  ;;  %v445_v42 = vmax.f32 %v413_v37, 0.0 }
  0xf3   : > { %v446_v43 = vmax.f32 %v416_v40, 0.0 }
  0xf5   : > { %v454_v44 = vpack.c.bf16 %v446_v43, %v445_v42 }
  0xf6   : > { %v420_v45 = vpop.f32.mrb[8].mxu0 }
  0xf7   : > { %v421_v46 = vadd.f32 %v828_v26, %v420_v45  ;;  %v882_v47 = vpop.f32.mrb[9].mxu0  ;;  %913 = vmatmul.mubr.bf16.vlgmr.msra.gmra.mrb[0].mxu1 %v454_v44  ;;  %v311_v45 = vadd.f32 %v827_v13, %v1128_v18 }
  0xf8   : > { %v423_v48 = vpop.f32.mrb[10].mxu0  ;;  %916 = vmatprep.mubr.msk.bf16.mxu1 %vm993_vm0, %v992_v1 }
  0xf9   : > { %v424_v49 = vadd.f32 %v828_v26, %v423_v48  ;;  %v883_v50 = vpop.f32.mrb[11].mxu0  ;;  %v447_v51 = vmax.f32 %v421_v46, 0.0 }
  0xfb   : > { %v448_v52 = vmax.f32 %v424_v49, 0.0 }
  0xfd   : > { %v455_v53 = vpack.c.bf16 %v448_v52, %v447_v51 }
  0xfe   : > { %v428_v54 = vpop.f32.mrb[12].mxu0 }
  0xff   : > { %v429_v55 = vadd.f32 %v828_v26, %v428_v54  ;;  %v886_v56 = vpop.f32.mrb[13].mxu0  ;;  %917 = vmatmul.mubr.bf16.gmra.mrb[4].mxu1 %v455_v53  ;;  %v313_v53 = vadd.f32 %v827_v13, %v1141_v21  ;;  %v314_v54 = vadd.f32 %v827_v13, %v1144_v22 }
 0x100   : > { %v431_v57 = vpop.f32.mrb[14].mxu0  ;;  %920 = vmatprep.mubr.msk.bf16.mxu1 %vm993_vm0, %v992_v1 }
 0x101   : > { %v432_v58 = vadd.f32 %v828_v26, %v431_v57  ;;  %v887_v59 = vpop.f32.mrb[15].mxu0  ;;  %v449_v60 = vmax.f32 %v429_v55, 0.0 }
 0x103   : > { %v450_v61 = vmax.f32 %v432_v58, 0.0 }
 0x105   : > { %v456_v62 = vpack.c.bf16 %v450_v61, %v449_v60 }
 0x106   : > { %v436_v63 = vpop.f32.mrb[16].mxu0 }
 0x107   : > { %v437_v0 = vadd.f32 %v828_v26, %v436_v63  ;;  %v890_v2 = vpop.f32.mrb[17].mxu0  ;;  %921 = vmatmul.mubr.bf16.gmra.mrb[8].mxu1 %v456_v62 }
 0x108   : > { %v439_v3 = vpop.f32.mrb[18].mxu0  ;;  %924 = vmatprep.mubr.msk.bf16.mxu1 %vm993_vm0, %v992_v1 }
 0x109   : > { %v440_v4 = vadd.f32 %v828_v26, %v439_v3  ;;  %v891_v7 = vpop.f32.mrb[19].mxu0  ;;  %v451_v8 = vmax.f32 %v437_v0, 0.0 }
 0x10b   : > { %v452_v11 = vmax.f32 %v440_v4, 0.0 }
 0x10d   : > { %v457_v12 = vpack.c.bf16 %v452_v11, %v451_v8 }
 0x10f   : > { %925 = vmatmul.mubr.bf16.gmra.mrb[12].mxu1 %v457_v12 }
 0x1c2   : > { %v540_v20 = vpop.f32.mrb[20].mxu0 }
 0x1c3   : > { %v579_v23 = vadd.f32 %v540_v20, %v305_v16  ;;  %v910_v24 = vpop.f32.mrb[21].mxu0 }
 0x1c4   : > { %v543_v25 = vpop.f32.mrb[22].mxu0 }
 0x1c5   : > { %v580_v27 = vadd.f32 %v543_v25, %v306_v17  ;;  %v911_v1 = vpop.f32.mrb[23].mxu0  ;;  %v589_v26 = vsel %vm354_vm1, %v579_v23, 0.0 }
 0x1c6   : > { %590 = vadd.xlane.f32.xlu0 %v589_v26 }
 0x1c7   : > { %v592_v29 = vsel %vm354_vm1, %v580_v27, 0.0 }
 0x1ca   : > { %v548_v31 = vpop.f32.mrb[0].mxu1  ;;  %593 = vadd.xlane.f32.xlu0 %v592_v29 }
 0x1cb   : > { %v581_v5 = vadd.f32 %v548_v31, %v307_v28  ;;  %v914_v32 = vpop.f32.mrb[1].mxu1 }
 0x1cc   : > { %v551_v6 = vpop.f32.mrb[2].mxu1 }
 0x1cd   : > { %v582_v33 = vadd.f32 %v551_v6, %v308_v30  ;;  %v915_v34 = vpop.f32.mrb[3].mxu1  ;;  %v595_v35 = vsel %vm354_vm1, %v581_v5, 0.0 }
 0x1ce   : > { %596 = vadd.xlane.f32.xlu1 %v595_v35 }
 0x1cf   : > { %v598_v37 = vsel %vm354_vm1, %v582_v33, 0.0 }
 0x1d2   : > { %599 = vadd.xlane.f32.xlu1 %v598_v37  ;;  %v556_v38 = vpop.f32.mrb[4].mxu1 }
 0x1d3   : > { %v583_v39 = vadd.f32 %v556_v38, %v309_v36  ;;  %v918_v10 = vpop.f32.mrb[5].mxu1 }
 0x1d4   : > { %v559_v40 = vpop.f32.mrb[6].mxu1 }
 0x1d5   : > { %v584_v41 = vadd.f32 %v559_v40, %v310_v9  ;;  %v919_v42 = vpop.f32.mrb[7].mxu1  ;;  %v601_v43 = vsel %vm354_vm1, %v583_v39, 0.0 }
 0x1d6   : > { %602 = vadd.xlane.f32.xlu0 %v601_v43 }
 0x1d7   : > { %v604_v44 = vsel %vm354_vm1, %v584_v41, 0.0 }
 0x1d8   : > { %605 = vadd.xlane.f32.xlu1 %v604_v44 }
 0x1da   : > { %v564_v46 = vpop.f32.mrb[8].mxu1 }
 0x1db   : > { %v585_v47 = vadd.f32 %v564_v46, %v311_v45  ;;  %v922_v15 = vpop.f32.mrb[9].mxu1 }
 0x1dc   : > { %v567_v48 = vpop.f32.mrb[10].mxu1 }
 0x1dd   : > { %v586_v49 = vadd.f32 %v567_v48, %v312_v14  ;;  %v923_v50 = vpop.f32.mrb[11].mxu1  ;;  %v607_v51 = vsel %vm354_vm1, %v585_v47, 0.0 }
 0x1de   : > { %608 = vadd.xlane.f32.xlu0 %v607_v51 }
 0x1df   : > { %v610_v52 = vsel %vm354_vm1, %v586_v49, 0.0 }
 0x1e0   : > { %611 = vadd.xlane.f32.xlu1 %v610_v52 }
 0x1e2   : > { %v572_v18 = vpop.f32.mrb[12].mxu1 }
 0x1e3   : > { %v587_v55 = vadd.f32 %v572_v18, %v313_v53  ;;  %v926_v56 = vpop.f32.mrb[13].mxu1 }
 0x1e4   : > { %v575_v19 = vpop.f32.mrb[14].mxu1 }
 0x1e5   : > { %v588_v57 = vadd.f32 %v575_v19, %v314_v54  ;;  %v927_v58 = vpop.f32.mrb[15].mxu1  ;;  %v613_v59 = vsel %vm354_vm1, %v587_v55, 0.0 }
 0x1e6   : > { %614 = vadd.xlane.f32.xlu0 %v613_v59  ;;  %v1244_v59 = vld [vmem:[%s1316_s5] ss:$0 sm:$0xff] }
 0x1e7   : > { %v616_v60 = vsel %vm354_vm1, %v588_v57, 0.0 }
 0x1e8   : > { %617 = vadd.xlane.f32.xlu1 %v616_v60 }
 0x253   : > { %v591_v61 = vpop.xlane.xlu0 %590 }
 0x254   : > { %v620_v62 = vmul.f32 0.03125, %v591_v61 }
 0x256   : > { %v1191_v63 = vsub.f32 %v579_v23, %v620_v62 }
 0x257   : > { %v594_v21 = vpop.xlane.xlu0 %593 }
 0x258   : > { %v621_v0 = vmul.f32 0.03125, %v594_v21  ;;  %v640_v22 = vmul.f32 %v1191_v63, %v1191_v63  ;;  %v1250_v21 = vld [vmem:[%s1317_s6] ss:$0 sm:$0xff] }
 0x25a   : > { %v1195_v2 = vsub.f32 %v580_v27, %v621_v0  ;;  %v650_v3 = vsel %vm354_vm1, %v640_v22, 0.0 }
 0x25b   : > { %v597_v4 = vpop.xlane.xlu1 %596  ;;  %651 = vadd.xlane.f32.xlu0 %v650_v3 }
 0x25c   : > { %v622_v7 = vmul.f32 0.03125, %v597_v4  ;;  %v641_v8 = vmul.f32 %v1195_v2, %v1195_v2 }
 0x25e   : > { %v1200_v11 = vsub.f32 %v581_v5, %v622_v7  ;;  %v653_v12 = vsel %vm354_vm1, %v641_v8, 0.0 }
 0x25f   : > { %v600_v13 = vpop.xlane.xlu1 %599  ;;  %654 = vadd.xlane.f32.xlu1 %v653_v12 }
 0x260   : > { %v623_v16 = vmul.f32 0.03125, %v600_v13  ;;  %v642_v17 = vmul.f32 %v1200_v11, %v1200_v11 }
 0x262   : > { %v1205_v20 = vsub.f32 %v582_v33, %v623_v16  ;;  %v656_v23 = vsel %vm354_vm1, %v642_v17, 0.0 }
 0x263   : > { %657 = vadd.xlane.f32.xlu0 %v656_v23  ;;  %v603_v24 = vpop.xlane.xlu0 %602 }
 0x264   : > { %v624_v25 = vmul.f32 0.03125, %v603_v24  ;;  %v643_v27 = vmul.f32 %v1205_v20, %v1205_v20 }
 0x265   : > { %v606_v1 = vpop.xlane.xlu1 %605 }
 0x266   : > { %v1210_v26 = vsub.f32 %v583_v39, %v624_v25  ;;  %v625_v28 = vmul.f32 0.03125, %v606_v1  ;;  %v659_v29 = vsel %vm354_vm1, %v643_v27, 0.0 }
 0x267   : > { %660 = vadd.xlane.f32.xlu1 %v659_v29 }
 0x268   : > { %v1213_v30 = vsub.f32 %v584_v41, %v625_v28  ;;  %v644_v31 = vmul.f32 %v1210_v26, %v1210_v26 }
 0x26a   : > { %v662_v5 = vsel %vm354_vm1, %v644_v31, 0.0  ;;  %v645_v32 = vmul.f32 %v1213_v30, %v1213_v30 }
 0x26b   : > { %663 = vadd.xlane.f32.xlu0 %v662_v5  ;;  %v609_v6 = vpop.xlane.xlu0 %608 }
 0x26c   : > { %v626_v33 = vmul.f32 0.03125, %v609_v6  ;;  %v665_v34 = vsel %vm354_vm1, %v645_v32, 0.0 }
 0x26d   : > { %v612_v35 = vpop.xlane.xlu1 %611  ;;  %666 = vadd.xlane.f32.xlu1 %v665_v34 }
 0x26e   : > { %v1221_v36 = vsub.f32 %v585_v47, %v626_v33  ;;  %v627_v37 = vmul.f32 0.03125, %v612_v35 }
 0x270   : > { %v1223_v9 = vsub.f32 %v586_v49, %v627_v37  ;;  %v646_v38 = vmul.f32 %v1221_v36, %v1221_v36 }
 0x272   : > { %v668_v39 = vsel %vm354_vm1, %v646_v38, 0.0  ;;  %v647_v10 = vmul.f32 %v1223_v9, %v1223_v9 }
 0x273   : > { %669 = vadd.xlane.f32.xlu0 %v668_v39  ;;  %v615_v40 = vpop.xlane.xlu0 %614 }
 0x274   : > { %v628_v41 = vmul.f32 0.03125, %v615_v40  ;;  %v671_v42 = vsel %vm354_vm1, %v647_v10, 0.0 }
 0x275   : > { %v618_v43 = vpop.xlane.xlu1 %617  ;;  %672 = vadd.xlane.f32.xlu1 %v671_v42 }
 0x276   : > { %v1231_v44 = vsub.f32 %v587_v55, %v628_v41  ;;  %v629_v45 = vmul.f32 0.03125, %v618_v43 }
 0x278   : > { %v1233_v14 = vsub.f32 %v588_v57, %v629_v45  ;;  %v648_v46 = vmul.f32 %v1231_v44, %v1231_v44 }
 0x27a   : > { %v674_v47 = vsel %vm354_vm1, %v648_v46, 0.0  ;;  %v649_v15 = vmul.f32 %v1233_v14, %v1233_v14 }
 0x27b   : > { %675 = vadd.xlane.f32.xlu0 %v674_v47 }
 0x27c   : > { %v677_v48 = vsel %vm354_vm1, %v649_v15, 0.0 }
 0x27d   : > { %678 = vadd.xlane.f32.xlu1 %v677_v48 }
 0x2e8   : > { %v652_v49 = vpop.xlane.xlu0 %651 }
 0x2e9   : > { %v680_v50 = vmul.f32 0.03125, %v652_v49 }
 0x2eb   : > { %v690_v51 = vadd.f32 1e-05, %v680_v50 }
 0x2ec   : > { %v655_v52 = vpop.xlane.xlu1 %654 }
 0x2ed   : > { %964 = vrsqrt.f32 %v690_v51  ;;  %v681_v53 = vmul.f32 0.03125, %v655_v52 }
 0x2ef   : > { %v691_v54 = vadd.f32 1e-05, %v681_v53 }
 0x2f0   : > { %v658_v18 = vpop.xlane.xlu0 %657 }
 0x2f1   : > { %966 = vrsqrt.f32 %v691_v54  ;;  %v682_v55 = vmul.f32 0.03125, %v658_v18 }
 0x2f3   : > { %v692_v56 = vadd.f32 1e-05, %v682_v55 }
 0x2f4   : > { %v661_v19 = vpop.xlane.xlu1 %660 }
 0x2f5   : > { %968 = vrsqrt.f32 %v692_v56  ;;  %v683_v57 = vmul.f32 0.03125, %v661_v19 }
 0x2f7   : > { %v965_v58 = vpop.eup %964  ;;  %v693_v60 = vadd.f32 1e-05, %v683_v57 }
 0x2f8   : > { %v710_v61 = vmul.f32 %v965_v58, %v1191_v63  ;;  %v664_v62 = vpop.xlane.xlu0 %663 }
 0x2f9   : > { %970 = vrsqrt.f32 %v693_v60  ;;  %v684_v0 = vmul.f32 0.03125, %v664_v62 }
 0x2fa   : > { %v727_v22 = vmul.f32 %v1244_v59, %v710_v61  ;;  %v667_v3 = vpop.xlane.xlu1 %666 }
 0x2fb   : > { %v967_v4 = vpop.eup %966  ;;  %v694_v63 = vadd.f32 1e-05, %v684_v0  ;;  %v685_v7 = vmul.f32 0.03125, %v667_v3 }
 0x2fc   : > { %v744_v8 = vadd.f32 %v1250_v21, %v727_v22  ;;  %v711_v12 = vmul.f32 %v967_v4, %v1195_v2 }
 0x2fd   : > { %972 = vrsqrt.f32 %v694_v63  ;;  %v695_v13 = vadd.f32 1e-05, %v685_v7 }
 0x2fe   : > { %754 = vst.msk [vmem:[%s1258_s18] sm:$0xff] %vm354_vm1, %v744_v8  ;;  %v728_v16 = vmul.f32 %v1244_v59, %v711_v12 }
 0x2ff   : > { %v969_v17 = vpop.eup %968  ;;  %974 = vrsqrt.f32 %v695_v13 }
 0x300   : > { %v745_v23 = vadd.f32 %v1250_v21, %v728_v16  ;;  %v712_v24 = vmul.f32 %v969_v17, %v1200_v11  ;;  %v670_v25 = vpop.xlane.xlu0 %669 }
 0x301   : > { %v686_v27 = vmul.f32 0.03125, %v670_v25 }
 0x302   : > { %755 = vst.msk [vmem:[%s1258_s18 + $0x8] sm:$0xff] %vm354_vm1, %v745_v23  ;;  %v729_v1 = vmul.f32 %v1244_v59, %v712_v24  ;;  %v673_v2 = vpop.xlane.xlu1 %672 }
 0x303   : > { %v971_v28 = vpop.eup %970  ;;  %v696_v29 = vadd.f32 1e-05, %v686_v27  ;;  %v687_v31 = vmul.f32 0.03125, %v673_v2 }
 0x304   : > { %v746_v5 = vadd.f32 %v1250_v21, %v729_v1  ;;  %v713_v32 = vmul.f32 %v971_v28, %v1205_v20 }
 0x305   : > { %976 = vrsqrt.f32 %v696_v29  ;;  %v697_v6 = vadd.f32 1e-05, %v687_v31 }
 0x306   : > { %756 = vst.msk [vmem:[%s1258_s18 + $0x10] sm:$0xff] %vm354_vm1, %v746_v5  ;;  %v730_v11 = vmul.f32 %v1244_v59, %v713_v32 }
 0x307   : > { %v973_v33 = vpop.eup %972  ;;  %978 = vrsqrt.f32 %v697_v6 }
 0x308   : > { %v747_v34 = vadd.f32 %v1250_v21, %v730_v11  ;;  %v714_v35 = vmul.f32 %v973_v33, %v1210_v26  ;;  %v676_v37 = vpop.xlane.xlu0 %675 }
 0x309   : > { %v975_v38 = vpop.eup %974  ;;  %v688_v39 = vmul.f32 0.03125, %v676_v37 }
 0x30a   : > { %757 = vst.msk [vmem:[%s1258_s18 + $0x18] sm:$0xff] %vm354_vm1, %v747_v34  ;;  %v731_v20 = vmul.f32 %v1244_v59, %v714_v35  ;;  %v715_v10 = vmul.f32 %v975_v38, %v1213_v30  ;;  %v679_v40 = vpop.xlane.xlu1 %678 }
 0x30b   : > { %v698_v41 = vadd.f32 1e-05, %v688_v39  ;;  %v689_v42 = vmul.f32 0.03125, %v679_v40 }
 0x30c   : > { %v748_v43 = vadd.f32 %v1250_v21, %v731_v20  ;;  %v732_v45 = vmul.f32 %v1244_v59, %v715_v10 }
 0x30d   : > { %980 = vrsqrt.f32 %v698_v41  ;;  %v699_v26 = vadd.f32 1e-05, %v689_v42 }
 0x30e   : > { %758 = vst.msk [vmem:[%s1258_s18 + $0x20] sm:$0xff] %vm354_vm1, %v748_v43  ;;  %v749_v46 = vadd.f32 %v1250_v21, %v732_v45 }
 0x30f   : > { %v977_v47 = vpop.eup %976  ;;  %982 = vrsqrt.f32 %v699_v26 }
 0x310   : > { %759 = vst.msk [vmem:[%s1258_s18 + $0x28] sm:$0xff] %vm354_vm1, %v749_v46  ;;  %v716_v30 = vmul.f32 %v977_v47, %v1221_v36 }
 0x311   : > { %v979_v15 = vpop.eup %978 }
 0x312   : > { %v733_v48 = vmul.f32 %v1244_v59, %v716_v30  ;;  %v717_v49 = vmul.f32 %v979_v15, %v1223_v9 }
 0x314   : > { %v750_v50 = vadd.f32 %v1250_v21, %v733_v48  ;;  %v734_v51 = vmul.f32 %v1244_v59, %v717_v49 }
 0x316   : > { %760 = vst.msk [vmem:[%s1258_s18 + $0x30] sm:$0xff] %vm354_vm1, %v750_v50  ;;  %v751_v52 = vadd.f32 %v1250_v21, %v734_v51 }
 0x317   : > { %v981_v53 = vpop.eup %980 }
 0x318   : > { %761 = vst.msk [vmem:[%s1258_s18 + $0x38] sm:$0xff] %vm354_vm1, %v751_v52  ;;  %v718_v36 = vmul.f32 %v981_v53, %v1231_v44 }
 0x319   : > { %v983_v54 = vpop.eup %982 }
 0x31a   : > { %v735_v18 = vmul.f32 %v1244_v59, %v718_v36  ;;  %v719_v55 = vmul.f32 %v983_v54, %v1233_v14 }
 0x31c   : > { %v752_v9 = vadd.f32 %v1250_v21, %v735_v18  ;;  %v736_v56 = vmul.f32 %v1244_v59, %v719_v55 }
 0x31e   : > { %762 = vst.msk [vmem:[%s1258_s18 + $0x40] sm:$0xff] %vm354_vm1, %v752_v9  ;;  %v753_v19 = vadd.f32 %v1250_v21, %v736_v56 }
 0x320   : > { %763 = vst.msk [vmem:[%s1258_s18 + $0x48] sm:$0xff] %vm354_vm1, %v753_v19 }
 0x321 PF: > { %s17_s24 = sadd.s32 1, %s990_s24  }
 0x322   : > { %p14_p4 = scmp.ge.s32.totalorder %s17_s24, 4  }
 0x324   :  { %16 = sbr.rel (!%p14_p4) target bundleno = 1 (0x1), region = 78 }

</bundles_post_ra>
